<compile_context>
chip_gen: v7x
topology: tpu7x:2x2x1
jax: 0.10.0
libtpu: 0.0.40
codegen_flags: <defaults>
</compile_context>

<pallas_src>
import functools

import jax
import jax.numpy as jnp
from jax.experimental import pallas as pl
from jax.experimental.pallas import tpu as pltpu


# ---------------------------------------------------------------------------
# Pallas kernel 1: conv-as-matmul  (bf16 x @ bf16 w) + f32 bias + ReLU
#   x:[M,K] bf16, w:[K,Cout] bf16, b:[1,Cout] f32 -> out:[M,Cout] bf16
#   Grid tiles M only (K <= 576 for these convs); no accumulator scratch.
# ---------------------------------------------------------------------------
def _conv_matmul_kernel(x_ref, w_ref, b_ref, o_ref):
    acc = jnp.dot(x_ref[...], w_ref[...], preferred_element_type=jnp.float32)
    o_ref[...] = jnp.maximum(acc + b_ref[...], 0.0).astype(o_ref.dtype)


def matmul_bias_relu(x, w, b, *, tm=256):
    M, K = x.shape
    Kw, N = w.shape
    assert K == Kw
    if M % tm != 0:
        tm = M
    nm = M // tm
    return pl.pallas_call(
        _conv_matmul_kernel,
        out_shape=jax.ShapeDtypeStruct((M, N), jnp.bfloat16),
        grid_spec=pltpu.PrefetchScalarGridSpec(
            num_scalar_prefetch=0,
            grid=(nm,),
            in_specs=[
                pl.BlockSpec((tm, K), lambda i: (i, 0)),
                pl.BlockSpec((K, N), lambda i: (0, 0)),
                pl.BlockSpec((1, N), lambda i: (0, 0)),
            ],
            out_specs=pl.BlockSpec((tm, N), lambda i: (i, 0)),
        ),
        compiler_params=pltpu.CompilerParams(dimension_semantics=("parallel",)),
    )(x, w, b)


# ---------------------------------------------------------------------------
# Pallas kernel 2: fused FC1 (K-tiled, ReLU) + FC2 (padded to 128 lanes)
#   x:[M,K] bf16, w1:[K,512] bf16, b1:[1,512] f32,
#   w2:[512,NP] f32, b2:[1,NP] f32  ->  out:[M,NP] f32
# ---------------------------------------------------------------------------
def _fc_fused_kernel(x_ref, w1_ref, b1_ref, w2_ref, b2_ref, o_ref, acc_ref, *, nk):
    k = pl.program_id(1)

    @pl.when(k == 0)
    def _():
        acc_ref[...] = jnp.zeros_like(acc_ref)

    acc_ref[...] += jnp.dot(
        x_ref[...], w1_ref[...], preferred_element_type=jnp.float32
    )

    @pl.when(k == nk - 1)
    def _():
        h = jnp.maximum(acc_ref[...] + b1_ref[...], 0.0)
        o_ref[...] = (
            jnp.dot(h, w2_ref[...], preferred_element_type=jnp.float32)
            + b2_ref[...]
        ).astype(o_ref.dtype)


def fc1_fc2_fused(x, w1, b1, w2, b2, *, kt=2048, tm=256):
    M, K = x.shape
    K1, H = w1.shape
    H2, NP = w2.shape
    assert K == K1 and H == H2
    if K % kt != 0:
        kt = K
        for cand in (2048, 1024, 512, 256, 128):
            if K % cand == 0:
                kt = cand
                break
    nk = K // kt
    if M % tm != 0:
        tm = M
    nm = M // tm

    kernel = functools.partial(_fc_fused_kernel, nk=nk)
    return pl.pallas_call(
        kernel,
        out_shape=jax.ShapeDtypeStruct((M, NP), jnp.float32),
        grid_spec=pltpu.PrefetchScalarGridSpec(
            num_scalar_prefetch=0,
            grid=(nm, nk),
            in_specs=[
                pl.BlockSpec((tm, kt), lambda i, k: (i, k)),
                pl.BlockSpec((kt, H), lambda i, k: (k, 0)),
                pl.BlockSpec((1, H), lambda i, k: (0, 0)),
                pl.BlockSpec((H, NP), lambda i, k: (0, 0)),
                pl.BlockSpec((1, NP), lambda i, k: (0, 0)),
            ],
            out_specs=pl.BlockSpec((tm, NP), lambda i, k: (i, 0)),
            scratch_shapes=[pltpu.VMEM((tm, H), jnp.float32)],
        ),
        compiler_params=pltpu.CompilerParams(
            dimension_semantics=("parallel", "arbitrary")
        ),
    )(x, w1, b1, w2, b2)


# ---------------------------------------------------------------------------
# Plain-JAX glue: im2col patch extraction (data rearrangement only)
# ---------------------------------------------------------------------------
def im2col(x_nhwc, kh, kw, stride, pad):
    x = jnp.pad(x_nhwc, ((0, 0), (pad, pad), (pad, pad), (0, 0)))
    n, hp, wp, c = x.shape
    oh = (hp - kh) // stride + 1
    ow = (wp - kw) // stride + 1
    patches = []
    for i in range(kh):
        for j in range(kw):
            patches.append(
                jax.lax.slice(
                    x,
                    (0, i, j, 0),
                    (n, i + stride * (oh - 1) + 1, j + stride * (ow - 1) + 1, c),
                    (1, stride, stride, 1),
                )
            )  # each (n, oh, ow, c)
    cols = jnp.stack(patches, axis=3)              # (n, oh, ow, kh*kw, c)
    cols = cols.reshape(n * oh * ow, kh * kw * c)  # column order: (kh, kw, cin)
    return cols, oh, ow


def conv2d_relu(x_nhwc, w2d, b, kh, kw, stride, pad, cout):
    """PyTorch-semantics Conv2d + ReLU; hot path is the Pallas matmul kernel."""
    n = x_nhwc.shape[0]
    cols, oh, ow = im2col(x_nhwc, kh, kw, stride, pad)
    y = matmul_bias_relu(cols, w2d, b)             # [n*oh*ow, cout] bf16
    return y.reshape(n, oh, ow, cout)


# ---------------------------------------------------------------------------
# ModelDQN construction (mirrors the PyTorch __init__)
# ---------------------------------------------------------------------------
def padding_size(input_size, kernel_size, stride):
    return ((stride - 1) * input_size - stride + kernel_size) // 2


def output_size(input_size, kernel_size=1, stride=1, pad=0, dilation=1):
    return (input_size + 2 * pad - dilation * (kernel_size - 1) - 1) // stride + 1


def init_params(key, input_size, state_history, n_channels, num_actions):
    cin = n_channels * state_history
    pad1 = padding_size(input_size, 8, 4)
    out1 = output_size(input_size, 8, 4, pad1, 1)
    pad2 = padding_size(input_size, 4, 2)
    out2 = output_size(out1, 4, 2, pad2, 1)
    pad3 = padding_size(input_size, 3, 1)
    out3 = output_size(out2, 3, 1, pad3, 1)
    flat_dim = out3 * out3 * 64

    keys = jax.random.split(key, 10)

    def winit(k, shape, fan_in):
        return (1.0 / jnp.sqrt(fan_in)) * jax.random.normal(k, shape, jnp.float32)

    params = {
        "w1": winit(keys[0], (32, cin, 8, 8), cin * 64),
        "b1": winit(keys[1], (32,), cin * 64),
        "w2": winit(keys[2], (64, 32, 4, 4), 32 * 16),
        "b2": winit(keys[3], (64,), 32 * 16),
        "w3": winit(keys[4], (64, 64, 3, 3), 64 * 9),
        "b3": winit(keys[5], (64,), 64 * 9),
        "fc1_w": winit(keys[6], (512, flat_dim), flat_dim),   # [out, in] (PyTorch)
        "fc1_b": winit(keys[7], (512,), flat_dim),
        "fc2_w": winit(keys[8], (num_actions, 512), 512),
        "fc2_b": winit(keys[9], (num_actions,), 512),
    }
    cfg = {
        "pad1": pad1, "pad2": pad2, "pad3": pad3,
        "out3": out3, "flat_dim": flat_dim,
        "num_actions": num_actions,
        "padded_actions": ((num_actions + 127) // 128) * 128,
    }
    return params, cfg


def prepare_params(params, cfg):
    """One-time re-layout (outside jit): bf16 weights, [K,N] FC weights, NHWC-
    flatten-ordered fc1 rows, lane-padded fc2 columns."""

    def conv_prep(w_oihw, b):
        cout, cin, kh, kw = w_oihw.shape
        w2d = jnp.transpose(w_oihw, (2, 3, 1, 0)).reshape(kh * kw * cin, cout)
        return w2d.astype(jnp.bfloat16), b.reshape(1, cout).astype(jnp.float32)

    c1w, c1b = conv_prep(params["w1"], params["b1"])
    c2w, c2b = conv_prep(params["w2"], params["b2"])
    c3w, c3b = conv_prep(params["w3"], params["b3"])

    # fc1: [512, flat(NCHW order: c,h,w)] -> [flat(NHWC order: h,w,c), 512]
    out = cfg["out3"]
    c = 64
    fc1 = params["fc1_w"].reshape(512, c, out, out)
    fc1 = jnp.transpose(fc1, (2, 3, 1, 0)).reshape(out * out * c, 512)
    fc1 = fc1.astype(jnp.bfloat16)
    fc1b = params["fc1_b"].reshape(1, 512).astype(jnp.float32)

    # fc2: [num_actions, 512] -> [512, NP] zero-padded to lane-dense width
    na = cfg["num_actions"]
    np_ = cfg["padded_actions"]
    fc2 = jnp.zeros((512, np_), jnp.float32).at[:, :na].set(params["fc2_w"].T)
    fc2b = jnp.zeros((1, np_), jnp.float32).at[:, :na].set(
        params["fc2_b"].reshape(1, na)
    )

    return {
        "c1_w": c1w, "c1_b": c1b,
        "c2_w": c2w, "c2_b": c2b,
        "c3_w": c3w, "c3_b": c3b,
        "fc1_w": fc1, "fc1_b": fc1b,
        "fc2_w": fc2, "fc2_b": fc2b,
    }


def model_dqn_forward(x_nchw, p, cfg):
    # layout: x arrives NCHW (PyTorch); converted to NHWC (bf16) for the convs.
    x = jnp.transpose(x_nchw, (0, 2, 3, 1)).astype(jnp.bfloat16)

    x = conv2d_relu(x, p["c1_w"], p["c1_b"], 8, 8, 4, cfg["pad1"], 32)
    x = conv2d_relu(x, p["c2_w"], p["c2_b"], 4, 4, 2, cfg["pad2"], 64)
    x = conv2d_relu(x, p["c3_w"], p["c3_b"], 3, 3, 1, cfg["pad3"], 64)

    # NHWC flatten (fc1 weight rows were pre-permuted to match) -> no transpose.
    flat = x.reshape(x.shape[0], -1)

    q = fc1_fc2_fused(flat, p["fc1_w"], p["fc1_b"], p["fc2_w"], p["fc2_b"])
    return q[:, : cfg["num_actions"]]


if __name__ == "__main__":
    # Small shapes consistent with the module: batch=2, n_channels=1,
    # state_history=4 (=> 4 input channels), spatial 16x16, num_actions=6.
    input_size = 16
    state_history = 4
    n_channels = 1
    num_actions = 6
    batch = 2

    key = jax.random.PRNGKey(0)
    k_params, k_x = jax.random.split(key)
    params, cfg = init_params(
        k_params, input_size, state_history, n_channels, num_actions
    )
    prepped = prepare_params(params, cfg)
    x = jax.random.normal(
        k_x, (batch, n_channels * state_history, input_size, input_size),
        jnp.float32,
    )

    fwd = jax.jit(lambda xx, pp: model_dqn_forward(xx, pp, cfg))
    out = fwd(x, prepped)
    jax.block_until_ready(out)
    assert out.shape == (batch, num_actions), out.shape
    assert bool(jnp.all(jnp.isfinite(out)))
    print("KERNEL_OK")
</pallas_src>

<mosaic_0001>
module attributes {stable_mosaic.version = 11 : i64} {
  func.func @_conv_matmul_kernel(%arg0: i32, %arg1: memref<256x256xbf16, #tpu.memory_space<vmem>>, %arg2: memref<256x32xbf16, #tpu.memory_space<vmem>>, %arg3: memref<1x32xf32, #tpu.memory_space<vmem>>, %arg4: memref<256x32xbf16, #tpu.memory_space<vmem>>) attributes {dimension_semantics = [#tpu.dimension_semantics<parallel>], iteration_bounds = array<i64: 2>, scalar_prefetch = 0 : i64, scratch_operands = 0 : i64, tpu.core_type = #tpu.core_type<tc>, window_params = [{transform_indices = @transform_0, window_bounds = array<i64: 256, 256>}, {pipeline_mode = #tpu.pipeline_mode<synchronous>, transform_indices = @transform_1, window_bounds = array<i64: 256, 32>}, {pipeline_mode = #tpu.pipeline_mode<synchronous>, transform_indices = @transform_2, window_bounds = array<i64: 1, 32>}, {transform_indices = @transform_3, window_bounds = array<i64: 256, 32>}]} {
    %c0 = arith.constant 0 : index
    %c0_0 = arith.constant 0 : index
    %0 = vector.load %arg1[%c0, %c0_0] : memref<256x256xbf16, #tpu.memory_space<vmem>>, vector<256x256xbf16>
    %c0_1 = arith.constant 0 : index
    %c0_2 = arith.constant 0 : index
    %1 = vector.load %arg2[%c0_1, %c0_2] : memref<256x32xbf16, #tpu.memory_space<vmem>>, vector<256x32xbf16>
    %cst = arith.constant dense<0.000000e+00> : vector<256x32xf32>
    %2 = tpu.matmul %0, %1, %cst {dimension_numbers = #tpu.dot_dimension_numbers<[1], [0], [0], [1], [0, 0, 1, 1], [], []>} : vector<256x256xbf16>, vector<256x32xbf16>, vector<256x32xf32> -> vector<256x32xf32>
    %c0_3 = arith.constant 0 : index
    %c0_4 = arith.constant 0 : index
    %3 = vector.load %arg3[%c0_3, %c0_4] : memref<1x32xf32, #tpu.memory_space<vmem>>, vector<1x32xf32>
    %4 = vector.broadcast %3 : vector<1x32xf32> to vector<256x32xf32>
    %5 = arith.addf %2, %4 : vector<256x32xf32>
    %cst_5 = arith.constant 0.000000e+00 : f32
    %6 = vector.broadcast %cst_5 : f32 to vector<256x32xf32>
    %7 = arith.maximumf %5, %6 : vector<256x32xf32>
    %8 = arith.truncf %7 : vector<256x32xf32> to vector<256x32xbf16>
    %c0_6 = arith.constant 0 : index
    %c0_7 = arith.constant 0 : index
    %9 = vector.load %arg4[%c0_6, %c0_7] : memref<256x32xbf16, #tpu.memory_space<vmem>>, vector<256x32xbf16>
    tpu.vector_store %arg4[%c0_6, %c0_7], %8 {strides = array<i32>} : memref<256x32xbf16, #tpu.memory_space<vmem>>, vector<256x32xbf16>,
    return
  }
  func.func @transform_0(%arg0: i32) -> (i32, i32) {
    %c0_i32 = arith.constant 0 : i32
    %c0_i32_0 = arith.constant 0 : i32
    return %arg0, %c0_i32 : i32, i32
  }
  func.func @transform_1(%arg0: i32) -> (i32, i32) {
    %c0_i32 = arith.constant 0 : i32
    %c0_i32_0 = arith.constant 0 : i32
    %c0_i32_1 = arith.constant 0 : i32
    return %c0_i32, %c0_i32_0 : i32, i32
  }
  func.func @transform_2(%arg0: i32) -> (i32, i32) {
    %c0_i32 = arith.constant 0 : i32
    %c0_i32_0 = arith.constant 0 : i32
    %c0_i32_1 = arith.constant 0 : i32
    return %c0_i32, %c0_i32_0 : i32, i32
  }
  func.func @transform_3(%arg0: i32) -> (i32, i32) {
    %c0_i32 = arith.constant 0 : i32
    %c0_i32_0 = arith.constant 0 : i32
    return %arg0, %c0_i32 : i32, i32
  }
}

module attributes {stable_mosaic.version = 11 : i64} {
  func.func @_conv_matmul_kernel(%arg0: i32, %arg1: memref<256x512xbf16, #tpu.memory_space<vmem>>, %arg2: memref<512x64xbf16, #tpu.memory_space<vmem>>, %arg3: memref<1x64xf32, #tpu.memory_space<vmem>>, %arg4: memref<256x64xbf16, #tpu.memory_space<vmem>>) attributes {dimension_semantics = [#tpu.dimension_semantics<parallel>], iteration_bounds = array<i64: 2>, scalar_prefetch = 0 : i64, scratch_operands = 0 : i64, tpu.core_type = #tpu.core_type<tc>, window_params = [{transform_indices = @transform_0, window_bounds = array<i64: 256, 512>}, {pipeline_mode = #tpu.pipeline_mode<synchronous>, transform_indices = @transform_1, window_bounds = array<i64: 512, 64>}, {pipeline_mode = #tpu.pipeline_mode<synchronous>, transform_indices = @transform_2, window_bounds = array<i64: 1, 64>}, {transform_indices = @transform_3, window_bounds = array<i64: 256, 64>}]} {
    %c0 = arith.constant 0 : index
    %c0_0 = arith.constant 0 : index
    %0 = vector.load %arg1[%c0, %c0_0] : memref<256x512xbf16, #tpu.memory_space<vmem>>, vector<256x512xbf16>
    %c0_1 = arith.constant 0 : index
    %c0_2 = arith.constant 0 : index
    %1 = vector.load %arg2[%c0_1, %c0_2] : memref<512x64xbf16, #tpu.memory_space<vmem>>, vector<512x64xbf16>
    %cst = arith.constant dense<0.000000e+00> : vector<256x64xf32>
    %2 = tpu.matmul %0, %1, %cst {dimension_numbers = #tpu.dot_dimension_numbers<[1], [0], [0], [1], [0, 0, 1, 1], [], []>} : vector<256x512xbf16>, vector<512x64xbf16>, vector<256x64xf32> -> vector<256x64xf32>
    %c0_3 = arith.constant 0 : index
    %c0_4 = arith.constant 0 : index
    %3 = vector.load %arg3[%c0_3, %c0_4] : memref<1x64xf32, #tpu.memory_space<vmem>>, vector<1x64xf32>
    %4 = vector.broadcast %3 : vector<1x64xf32> to vector<256x64xf32>
    %5 = arith.addf %2, %4 : vector<256x64xf32>
    %cst_5 = arith.constant 0.000000e+00 : f32
    %6 = vector.broadcast %cst_5 : f32 to vector<256x64xf32>
    %7 = arith.maximumf %5, %6 : vector<256x64xf32>
    %8 = arith.truncf %7 : vector<256x64xf32> to vector<256x64xbf16>
    %c0_6 = arith.constant 0 : index
    %c0_7 = arith.constant 0 : index
    %9 = vector.load %arg4[%c0_6, %c0_7] : memref<256x64xbf16, #tpu.memory_space<vmem>>, vector<256x64xbf16>
    tpu.vector_store %arg4[%c0_6, %c0_7], %8 {strides = array<i32>} : memref<256x64xbf16, #tpu.memory_space<vmem>>, vector<256x64xbf16>,
    return
  }
  func.func @transform_0(%arg0: i32) -> (i32, i32) {
    %c0_i32 = arith.constant 0 : i32
    %c0_i32_0 = arith.constant 0 : i32
    return %arg0, %c0_i32 : i32, i32
  }
  func.func @transform_1(%arg0: i32) -> (i32, i32) {
    %c0_i32 = arith.constant 0 : i32
    %c0_i32_0 = arith.constant 0 : i32
    %c0_i32_1 = arith.constant 0 : i32
    return %c0_i32, %c0_i32_0 : i32, i32
  }
  func.func @transform_2(%arg0: i32) -> (i32, i32) {
    %c0_i32 = arith.constant 0 : i32
    %c0_i32_0 = arith.constant 0 : i32
    %c0_i32_1 = arith.constant 0 : i32
    return %c0_i32, %c0_i32_0 : i32, i32
  }
  func.func @transform_3(%arg0: i32) -> (i32, i32) {
    %c0_i32 = arith.constant 0 : i32
    %c0_i32_0 = arith.constant 0 : i32
    return %arg0, %c0_i32 : i32, i32
  }
}

module attributes {stable_mosaic.version = 11 : i64} {
  func.func @_conv_matmul_kernel(%arg0: i32, %arg1: memref<256x576xbf16, #tpu.memory_space<vmem>>, %arg2: memref<576x64xbf16, #tpu.memory_space<vmem>>, %arg3: memref<1x64xf32, #tpu.memory_space<vmem>>, %arg4: memref<256x64xbf16, #tpu.memory_space<vmem>>) attributes {dimension_semantics = [#tpu.dimension_semantics<parallel>], iteration_bounds = array<i64: 2>, scalar_prefetch = 0 : i64, scratch_operands = 0 : i64, tpu.core_type = #tpu.core_type<tc>, window_params = [{transform_indices = @transform_0, window_bounds = array<i64: 256, 576>}, {pipeline_mode = #tpu.pipeline_mode<synchronous>, transform_indices = @transform_1, window_bounds = array<i64: 576, 64>}, {pipeline_mode = #tpu.pipeline_mode<synchronous>, transform_indices = @transform_2, window_bounds = array<i64: 1, 64>}, {transform_indices = @transform_3, window_bounds = array<i64: 256, 64>}]} {
    %c0 = arith.constant 0 : index
    %c0_0 = arith.constant 0 : index
    %0 = vector.load %arg1[%c0, %c0_0] : memref<256x576xbf16, #tpu.memory_space<vmem>>, vector<256x576xbf16>
    %c0_1 = arith.constant 0 : index
    %c0_2 = arith.constant 0 : index
    %1 = vector.load %arg2[%c0_1, %c0_2] : memref<576x64xbf16, #tpu.memory_space<vmem>>, vector<576x64xbf16>
    %cst = arith.constant dense<0.000000e+00> : vector<256x64xf32>
    %2 = tpu.matmul %0, %1, %cst {dimension_numbers = #tpu.dot_dimension_numbers<[1], [0], [0], [1], [0, 0, 1, 1], [], []>} : vector<256x576xbf16>, vector<576x64xbf16>, vector<256x64xf32> -> vector<256x64xf32>
    %c0_3 = arith.constant 0 : index
    %c0_4 = arith.constant 0 : index
    %3 = vector.load %arg3[%c0_3, %c0_4] : memref<1x64xf32, #tpu.memory_space<vmem>>, vector<1x64xf32>
    %4 = vector.broadcast %3 : vector<1x64xf32> to vector<256x64xf32>
    %5 = arith.addf %2, %4 : vector<256x64xf32>
    %cst_5 = arith.constant 0.000000e+00 : f32
    %6 = vector.broadcast %cst_5 : f32 to vector<256x64xf32>
    %7 = arith.maximumf %5, %6 : vector<256x64xf32>
    %8 = arith.truncf %7 : vector<256x64xf32> to vector<256x64xbf16>
    %c0_6 = arith.constant 0 : index
    %c0_7 = arith.constant 0 : index
    %9 = vector.load %arg4[%c0_6, %c0_7] : memref<256x64xbf16, #tpu.memory_space<vmem>>, vector<256x64xbf16>
    tpu.vector_store %arg4[%c0_6, %c0_7], %8 {strides = array<i32>} : memref<256x64xbf16, #tpu.memory_space<vmem>>, vector<256x64xbf16>,
    return
  }
  func.func @transform_0(%arg0: i32) -> (i32, i32) {
    %c0_i32 = arith.constant 0 : i32
    %c0_i32_0 = arith.constant 0 : i32
    return %arg0, %c0_i32 : i32, i32
  }
  func.func @transform_1(%arg0: i32) -> (i32, i32) {
    %c0_i32 = arith.constant 0 : i32
    %c0_i32_0 = arith.constant 0 : i32
    %c0_i32_1 = arith.constant 0 : i32
    return %c0_i32, %c0_i32_0 : i32, i32
  }
  func.func @transform_2(%arg0: i32) -> (i32, i32) {
    %c0_i32 = arith.constant 0 : i32
    %c0_i32_0 = arith.constant 0 : i32
    %c0_i32_1 = arith.constant 0 : i32
    return %c0_i32, %c0_i32_0 : i32, i32
  }
  func.func @transform_3(%arg0: i32) -> (i32, i32) {
    %c0_i32 = arith.constant 0 : i32
    %c0_i32_0 = arith.constant 0 : i32
    return %arg0, %c0_i32 : i32, i32
  }
}

module attributes {stable_mosaic.version = 11 : i64} {
  func.func @_fc_fused_kernel(%arg0: i32, %arg1: i32, %arg2: memref<2x2048xbf16, #tpu.memory_space<vmem>>, %arg3: memref<2048x512xbf16, #tpu.memory_space<vmem>>, %arg4: memref<1x512xf32, #tpu.memory_space<vmem>>, %arg5: memref<512x128xf32, #tpu.memory_space<vmem>>, %arg6: memref<1x128xf32, #tpu.memory_space<vmem>>, %arg7: memref<2x128xf32, #tpu.memory_space<vmem>>, %arg8: memref<2x512xf32, #tpu.memory_space<vmem>>) attributes {dimension_semantics = [#tpu.dimension_semantics<parallel>, #tpu.dimension_semantics<arbitrary>], iteration_bounds = array<i64: 1, 8>, scalar_prefetch = 0 : i64, scratch_operands = 1 : i64, tpu.core_type = #tpu.core_type<tc>, window_params = [{transform_indices = @transform_0, window_bounds = array<i64: 2, 2048>}, {transform_indices = @transform_1, window_bounds = array<i64: 2048, 512>}, {pipeline_mode = #tpu.pipeline_mode<synchronous>, transform_indices = @transform_2, window_bounds = array<i64: 1, 512>}, {pipeline_mode = #tpu.pipeline_mode<synchronous>, transform_indices = @transform_3, window_bounds = array<i64: 512, 128>}, {pipeline_mode = #tpu.pipeline_mode<synchronous>, transform_indices = @transform_4, window_bounds = array<i64: 1, 128>}, {transform_indices = @transform_5, window_bounds = array<i64: 2, 128>}]} {
    %c0_i32 = arith.constant 0 : i32
    %0 = arith.cmpi eq, %arg1, %c0_i32 : i32
    %1 = arith.extui %0 : i1 to i32
    %c0_i32_0 = arith.constant 0 : i32
    %2 = arith.cmpi ne, %1, %c0_i32_0 : i32
    scf.if %2 {
      %cst_9 = arith.constant 0.000000e+00 : f32
      %12 = vector.broadcast %cst_9 : f32 to vector<2x512xf32>
      %c0_10 = arith.constant 0 : index
      %c0_11 = arith.constant 0 : index
      %13 = vector.load %arg8[%c0_10, %c0_11] : memref<2x512xf32, #tpu.memory_space<vmem>>, vector<2x512xf32>
      tpu.vector_store %arg8[%c0_10, %c0_11], %12 {strides = array<i32>} : memref<2x512xf32, #tpu.memory_space<vmem>>, vector<2x512xf32>,
    } else {
    }
    %c0 = arith.constant 0 : index
    %c0_1 = arith.constant 0 : index
    %3 = vector.load %arg8[%c0, %c0_1] : memref<2x512xf32, #tpu.memory_space<vmem>>, vector<2x512xf32>
    %c0_2 = arith.constant 0 : index
    %c0_3 = arith.constant 0 : index
    %4 = vector.load %arg2[%c0_2, %c0_3] : memref<2x2048xbf16, #tpu.memory_space<vmem>>, vector<2x2048xbf16>
    %c0_4 = arith.constant 0 : index
    %c0_5 = arith.constant 0 : index
    %5 = vector.load %arg3[%c0_4, %c0_5] : memref<2048x512xbf16, #tpu.memory_space<vmem>>, vector<2048x512xbf16>
    %cst = arith.constant dense<0.000000e+00> : vector<2x512xf32>
    %6 = tpu.matmul %4, %5, %cst {dimension_numbers = #tpu.dot_dimension_numbers<[1], [0], [0], [1], [0, 0, 1, 1], [], []>} : vector<2x2048xbf16>, vector<2048x512xbf16>, vector<2x512xf32> -> vector<2x512xf32>
    %7 = arith.addf %3, %6 : vector<2x512xf32>
    %c0_6 = arith.constant 0 : index
    %c0_7 = arith.constant 0 : index
    %8 = vector.load %arg8[%c0_6, %c0_7] : memref<2x512xf32, #tpu.memory_space<vmem>>, vector<2x512xf32>
    tpu.vector_store %arg8[%c0_6, %c0_7], %7 {strides = array<i32>} : memref<2x512xf32, #tpu.memory_space<vmem>>, vector<2x512xf32>,
    %c7_i32 = arith.constant 7 : i32
    %9 = arith.cmpi eq, %arg1, %c7_i32 : i32
    %10 = arith.extui %9 : i1 to i32
    %c0_i32_8 = arith.constant 0 : i32
    %11 = arith.cmpi ne, %10, %c0_i32_8 : i32
    scf.if %11 {
      %c0_9 = arith.constant 0 : index
      %c0_10 = arith.constant 0 : index
      %12 = vector.load %arg8[%c0_9, %c0_10] : memref<2x512xf32, #tpu.memory_space<vmem>>, vector<2x512xf32>
      %c0_11 = arith.constant 0 : index
      %c0_12 = arith.constant 0 : index
      %13 = vector.load %arg4[%c0_11, %c0_12] : memref<1x512xf32, #tpu.memory_space<vmem>>, vector<1x512xf32>
      %14 = vector.broadcast %13 : vector<1x512xf32> to vector<2x512xf32>
      %15 = arith.addf %12, %14 : vector<2x512xf32>
      %cst_13 = arith.constant 0.000000e+00 : f32
      %16 = vector.broadcast %cst_13 : f32 to vector<2x512xf32>
      %17 = arith.maximumf %15, %16 : vector<2x512xf32>
      %c0_14 = arith.constant 0 : index
      %c0_15 = arith.constant 0 : index
      %18 = vector.load %arg5[%c0_14, %c0_15] : memref<512x128xf32, #tpu.memory_space<vmem>>, vector<512x128xf32>
      %cst_16 = arith.constant dense<0.000000e+00> : vector<2x128xf32>
      %19 = tpu.matmul %17, %18, %cst_16 {dimension_numbers = #tpu.dot_dimension_numbers<[1], [0], [0], [1], [0, 0, 1, 1], [], []>} : vector<2x512xf32>, vector<512x128xf32>, vector<2x128xf32> -> vector<2x128xf32>
      %c0_17 = arith.constant 0 : index
      %c0_18 = arith.constant 0 : index
      %20 = vector.load %arg6[%c0_17, %c0_18] : memref<1x128xf32, #tpu.memory_space<vmem>>, vector<1x128xf32>
      %21 = vector.broadcast %20 : vector<1x128xf32> to vector<2x128xf32>
      %22 = arith.addf %19, %21 : vector<2x128xf32>
      %c0_19 = arith.constant 0 : index
      %c0_20 = arith.constant 0 : index
      %23 = vector.load %arg7[%c0_19, %c0_20] : memref<2x128xf32, #tpu.memory_space<vmem>>, vector<2x128xf32>
      tpu.vector_store %arg7[%c0_19, %c0_20], %22 {strides = array<i32>} : memref<2x128xf32, #tpu.memory_space<vmem>>, vector<2x128xf32>,
    } else {
    }
    return
  }
  func.func @transform_0(%arg0: i32, %arg1: i32) -> (i32, i32) {
    %c0_i32 = arith.constant 0 : i32
    return %arg0, %arg1 : i32, i32
  }
  func.func @transform_1(%arg0: i32, %arg1: i32) -> (i32, i32) {
    %c0_i32 = arith.constant 0 : i32
    %c0_i32_0 = arith.constant 0 : i32
    return %arg1, %c0_i32 : i32, i32
  }
  func.func @transform_2(%arg0: i32, %arg1: i32) -> (i32, i32) {
    %c0_i32 = arith.constant 0 : i32
    %c0_i32_0 = arith.constant 0 : i32
    %c0_i32_1 = arith.constant 0 : i32
    return %c0_i32, %c0_i32_0 : i32, i32
  }
  func.func @transform_3(%arg0: i32, %arg1: i32) -> (i32, i32) {
    %c0_i32 = arith.constant 0 : i32
    %c0_i32_0 = arith.constant 0 : i32
    %c0_i32_1 = arith.constant 0 : i32
    return %c0_i32, %c0_i32_0 : i32, i32
  }
  func.func @transform_4(%arg0: i32, %arg1: i32) -> (i32, i32) {
    %c0_i32 = arith.constant 0 : i32
    %c0_i32_0 = arith.constant 0 : i32
    %c0_i32_1 = arith.constant 0 : i32
    return %c0_i32, %c0_i32_0 : i32, i32
  }
  func.func @transform_5(%arg0: i32, %arg1: i32) -> (i32, i32) {
    %c0_i32 = arith.constant 0 : i32
    %c0_i32_0 = arith.constant 0 : i32
    return %arg0, %c0_i32 : i32, i32
  }
}

</mosaic_0001>

<bundles_post_ra>
// kernel: _lambda_.4
= control target key start
LH: loop header
LB: loop body
LE: loop exit
PB: predicated region body
PF: predicated region fallthrough
CT: control target
= control target key end

     0   :  { %s1269_s12 = smov 0   ;;  %s1475_s0 = inlined_call_operand.vmem [shape: bf16[512,256], index: 0, kind: input, shape index: {}]   ;;  %s1476_s1 = inlined_call_operand.vmem [shape: bf16[256,32], index: 1, kind: input, shape index: {}]   ;;  %s1477_s2 = inlined_call_operand.vmem [shape: f32[1,32], index: 2, kind: input, shape index: {}]   ;;  %s1478_s3 = inlined_call_operand.vmem [shape: bf16[512,32], index: 3, kind: output, shape index: {}]  }
   0x1 LB: > { %s915_s13 = sadd.s32 4294967295, %s1247_s12   ;;  %p919_p0 = scmp.ge.s32.totalorder %s1247_s12, 1  ;;  %s1247_s12 = sphi %s1269_s12, %s13_s12  }
   0x2   : > { %p139_p1 = scmp.lt.s32.totalorder %s1247_s12, 3 }
   0x4   : > { %p140_p2 = pnand %p919_p0, %p139_p1 }
   0x5   : > { %v1177_v0 = vld [vmem:[%s1476_s1 + $0x40] sm:$0xff] (!%p140_p2)   ;;  %s920_s16 = sshll.u32 (!%p140_p2), %s915_s13, 5  ;;  %v1179_v2 = vld [vmem:[%s1476_s1 + $0x48] sm:$0xff] (!%p140_p2)   ;;  %v1181_v4 = vld [vmem:[%s1476_s1 + $0x50] sm:$0xff] (!%p140_p2)   ;;  %vm826_vm0 = vcmask (!%p140_p2), 257024  }
   0x6   : > { %143 = sbr.rel (%p140_p2) target bundleno = 318 (0x13e), region = 32  ;;  %v1178_v1 = vld [vmem:[%s1476_s1] sm:$0xff] (!%p140_p2)   ;;  %1041 = vmatprep.subr.bf16.mxu0 (!%p140_p2), %v1177_v0  ;;  %1153 = vmatprep.subr.bf16.mxu1 (!%p140_p2), %v1177_v0  ;;  %v1180_v3 = vld [vmem:[%s1476_s1 + $0x8] sm:$0xff] (!%p140_p2)   ;;  %p165_p3 = scmp.lt.s32.totalorder (!%p140_p2), %s920_s16, 63  ;;  %v1182_v5 = vld [vmem:[%s1476_s1 + $0x10] sm:$0xff] (!%p140_p2)  }
   0x7   : > { %1042 = vmatpush3.bf16.msra.mxu0 (!%p140_p2), %v1178_v1  ;;  %1161 = vmatpush3.bf16.msra.mxu1 (!%p140_p2), %v1178_v1  ;;  %v1183_v6 = vld [vmem:[%s1476_s1 + $0x58] sm:$0xff] (!%p140_p2)   ;;  %v1185_v8 = vld [vmem:[%s1476_s1 + $0x60] sm:$0xff] (!%p140_p2)   ;;  %v1187_v10 = vld [vmem:[%s1476_s1 + $0x68] sm:$0xff] (!%p140_p2)  }
   0x8   : > { %1043 = vmatprep.subr.bf16.mxu0 (!%p140_p2), %v1179_v2  ;;  %1154 = vmatprep.subr.bf16.mxu1 (!%p140_p2), %v1179_v2  ;;  %v1184_v7 = vld [vmem:[%s1476_s1 + $0x18] sm:$0xff] (!%p140_p2)   ;;  %v1186_v9 = vld [vmem:[%s1476_s1 + $0x20] sm:$0xff] (!%p140_p2)   ;;  %v1188_v13 = vld [vmem:[%s1476_s1 + $0x28] sm:$0xff] (!%p140_p2)  }
   0x9   : > { %v1189_v14 = vld [vmem:[%s1476_s1 + $0x70] sm:$0xff] (!%p140_p2)   ;;  %v1191_v16 = vld [vmem:[%s1476_s1 + $0x78] sm:$0xff] (!%p140_p2)   ;;  %v1368_v50 = vld [vmem:[%s1477_s2] ss:$0 sm:$0xff] (!%p140_p2) }
   0xa   : > { %v1190_v15 = vld [vmem:[%s1476_s1 + $0x30] sm:$0xff] (!%p140_p2)   ;;  %v1192_v17 = vld [vmem:[%s1476_s1 + $0x38] sm:$0xff] (!%p140_p2)  }
   0xb   : > { %1044 = vmatpush3.bf16.msra.mxu0 (!%p140_p2), %v1180_v3  ;;  %1162 = vmatpush3.bf16.msra.mxu1 (!%p140_p2), %v1180_v3 }
   0xc   : > { %1045 = vmatprep.subr.bf16.mxu0 (!%p140_p2), %v1181_v4  ;;  %1155 = vmatprep.subr.bf16.mxu1 (!%p140_p2), %v1181_v4 }
   0xd   : > { %s1480_s16 = smov (!%p165_p3, %s920_s16), 63 }
   0xe   : > { %s1008_s4 = sshll.u32 %s1480_s16, 3  ;;  %s924_s28 = sshll.u32 %s1480_s16, 2 }
   0xf   : > { %1046 = vmatpush3.bf16.msra.mxu0 %v1182_v5  ;;  %1163 = vmatpush3.bf16.msra.mxu1 %v1182_v5  ;;  %s1310_s9 = scalar_lea.vmem %s1475_s0, %s1008_s4  ;;  %s1378_s4 = scalar_lea.vmem %s1478_s3, %s924_s28 }
  0x10   : > { %1047 = vmatprep.subr.bf16.mxu0 %v1183_v6  ;;  %1156 = vmatprep.subr.bf16.mxu1 %v1183_v6  ;;  %v1195_v11 = vld [vmem:[%s1310_s9 + $0x4] ss:$8 sps:$4 sm:$0xff]   ;;  %v1193_v18 = vld [vmem:[%s1310_s9] ss:$8 sps:$4 sm:$0xff]   ;;  %v1199_v20 = vld [vmem:[%s1310_s9 + $0x14] ss:$8 sps:$4 sm:$0xff]  }
  0x11   : > { %v1198_v12 = vld [vmem:[%s1310_s9 + $0x84] ss:$8 sps:$4 sm:$0xff]   ;;  %537 = vmatprep.mubr.bf16.mxu0 %v1195_v11  ;;  %v1196_v19 = vld [vmem:[%s1310_s9 + $0x80] ss:$8 sps:$4 sm:$0xff]   ;;  %v1201_v21 = vld [vmem:[%s1310_s9 + $0x94] ss:$8 sps:$4 sm:$0xff]  }
  0x12   : > { %601 = vmatprep.mubr.bf16.mxu1 %v1198_v12  ;;  %v1203_v22 = vld [vmem:[%s1310_s9 + $0x10] ss:$8 sps:$4 sm:$0xff]   ;;  %v1205_v24 = vld [vmem:[%s1310_s9 + $0x24] ss:$8 sps:$4 sm:$0xff]   ;;  %v1209_v26 = vld [vmem:[%s1310_s9 + $0x20] ss:$8 sps:$4 sm:$0xff]  }
  0x13   : > { %1048 = vmatpush3.bf16.msra.mxu0 %v1184_v7  ;;  %1164 = vmatpush3.bf16.msra.mxu1 %v1184_v7  ;;  %v1204_v23 = vld [vmem:[%s1310_s9 + $0x90] ss:$8 sps:$4 sm:$0xff]   ;;  %v1207_v25 = vld [vmem:[%s1310_s9 + $0xa4] ss:$8 sps:$4 sm:$0xff]   ;;  %v1210_v27 = vld [vmem:[%s1310_s9 + $0xa0] ss:$8 sps:$4 sm:$0xff]  }
  0x14   : > { %1049 = vmatprep.subr.bf16.mxu0 %v1185_v8  ;;  %1157 = vmatprep.subr.bf16.mxu1 %v1185_v8  ;;  %v1211_v28 = vld [vmem:[%s1310_s9 + $0x34] ss:$8 sps:$4 sm:$0xff]   ;;  %v1215_v30 = vld [vmem:[%s1310_s9 + $0x30] ss:$8 sps:$4 sm:$0xff]   ;;  %v1217_v32 = vld [vmem:[%s1310_s9 + $0x44] ss:$8 sps:$4 sm:$0xff]  }
  0x15   : > { %v1213_v29 = vld [vmem:[%s1310_s9 + $0xb4] ss:$8 sps:$4 sm:$0xff]   ;;  %v1216_v31 = vld [vmem:[%s1310_s9 + $0xb0] ss:$8 sps:$4 sm:$0xff]   ;;  %v1219_v33 = vld [vmem:[%s1310_s9 + $0xc4] ss:$8 sps:$4 sm:$0xff]  }
  0x16   : > { %v1221_v34 = vld [vmem:[%s1310_s9 + $0x40] ss:$8 sps:$4 sm:$0xff]   ;;  %v1223_v36 = vld [vmem:[%s1310_s9 + $0x54] ss:$8 sps:$4 sm:$0xff]   ;;  %v1227_v38 = vld [vmem:[%s1310_s9 + $0x50] ss:$8 sps:$4 sm:$0xff]  }
  0x17   : > { %1050 = vmatpush3.bf16.msra.mxu0 %v1186_v9  ;;  %1165 = vmatpush3.bf16.msra.mxu1 %v1186_v9  ;;  %v1222_v35 = vld [vmem:[%s1310_s9 + $0xc0] ss:$8 sps:$4 sm:$0xff]   ;;  %v1225_v37 = vld [vmem:[%s1310_s9 + $0xd4] ss:$8 sps:$4 sm:$0xff]   ;;  %v1228_v39 = vld [vmem:[%s1310_s9 + $0xd0] ss:$8 sps:$4 sm:$0xff]  }
  0x18   : > { %1051 = vmatprep.subr.bf16.mxu0 %v1187_v10  ;;  %1158 = vmatprep.subr.bf16.mxu1 %v1187_v10  ;;  %v1229_v40 = vld [vmem:[%s1310_s9 + $0x64] ss:$8 sps:$4 sm:$0xff]   ;;  %v1233_v42 = vld [vmem:[%s1310_s9 + $0x60] ss:$8 sps:$4 sm:$0xff]   ;;  %v1235_v44 = vld [vmem:[%s1310_s9 + $0x74] ss:$8 sps:$4 sm:$0xff]  }
  0x19   : > { %v1231_v41 = vld [vmem:[%s1310_s9 + $0xe4] ss:$8 sps:$4 sm:$0xff]   ;;  %v1234_v43 = vld [vmem:[%s1310_s9 + $0xe0] ss:$8 sps:$4 sm:$0xff]   ;;  %v1237_v45 = vld [vmem:[%s1310_s9 + $0xf4] ss:$8 sps:$4 sm:$0xff]  }
  0x1a   : > { %v1239_v46 = vld [vmem:[%s1310_s9 + $0x70] ss:$8 sps:$4 sm:$0xff]  }
  0x1b   : > { %1052 = vmatpush3.bf16.msra.mxu0 %v1188_v13  ;;  %1166 = vmatpush3.bf16.msra.mxu1 %v1188_v13  ;;  %v1240_v47 = vld [vmem:[%s1310_s9 + $0xf0] ss:$8 sps:$4 sm:$0xff]  }
  0x1c   : > { %1053 = vmatprep.subr.bf16.mxu0 %v1189_v14  ;;  %1159 = vmatprep.subr.bf16.mxu1 %v1189_v14 }
  0x1f   : > { %1054 = vmatpush3.bf16.msra.mxu0 %v1190_v15  ;;  %1167 = vmatpush3.bf16.msra.mxu1 %v1190_v15 }
  0x20   : > { %1055 = vmatprep.subr.bf16.mxu0 %v1191_v16  ;;  %1160 = vmatprep.subr.bf16.mxu1 %v1191_v16 }
  0x23   : > { %1056 = vmatpush3.bf16.msra.mxu0 %v1192_v17  ;;  %1168 = vmatpush3.bf16.msra.mxu1 %v1192_v17 }
  0x26   : > { %538 = vmatmul.mubr.bf16.vlgmr.msra.gmra.mrb[0].mxu0 %v1193_v18  ;;  %602 = vmatmul.mubr.bf16.vlgmr.msra.gmra.mrb[0].mxu1 %v1196_v19 }
  0x27   : > { %545 = vmatprep.mubr.bf16.mxu0 %v1199_v20  ;;  %609 = vmatprep.mubr.bf16.mxu1 %v1201_v21 }
  0x2e   : > { %546 = vmatmul.mubr.bf16.gmra.mrb[4].mxu0 %v1203_v22  ;;  %610 = vmatmul.mubr.bf16.gmra.mrb[4].mxu1 %v1204_v23 }
  0x2f   : > { %553 = vmatprep.mubr.bf16.mxu0 %v1205_v24  ;;  %617 = vmatprep.mubr.bf16.mxu1 %v1207_v25 }
  0x36   : > { %554 = vmatmul.mubr.bf16.gmra.mrb[8].mxu0 %v1209_v26  ;;  %618 = vmatmul.mubr.bf16.gmra.mrb[8].mxu1 %v1210_v27 }
  0x37   : > { %561 = vmatprep.mubr.bf16.mxu0 %v1211_v28  ;;  %625 = vmatprep.mubr.bf16.mxu1 %v1213_v29 }
  0x3e   : > { %562 = vmatmul.mubr.bf16.gmra.mrb[12].mxu0 %v1215_v30  ;;  %626 = vmatmul.mubr.bf16.gmra.mrb[12].mxu1 %v1216_v31 }
  0x3f   : > { %569 = vmatprep.mubr.bf16.mxu0 %v1217_v32  ;;  %633 = vmatprep.mubr.bf16.mxu1 %v1219_v33 }
  0x46   : > { %570 = vmatmul.mubr.bf16.gmra.mrb[16].mxu0 %v1221_v34  ;;  %634 = vmatmul.mubr.bf16.gmra.mrb[16].mxu1 %v1222_v35 }
  0x47   : > { %577 = vmatprep.mubr.bf16.mxu0 %v1223_v36  ;;  %641 = vmatprep.mubr.bf16.mxu1 %v1225_v37 }
  0x4e   : > { %578 = vmatmul.mubr.bf16.gmra.mrb[20].mxu0 %v1227_v38  ;;  %642 = vmatmul.mubr.bf16.gmra.mrb[20].mxu1 %v1228_v39 }
  0x4f   : > { %585 = vmatprep.mubr.bf16.mxu0 %v1229_v40  ;;  %649 = vmatprep.mubr.bf16.mxu1 %v1231_v41 }
  0x56   : > { %586 = vmatmul.mubr.bf16.gmra.mrb[24].mxu0 %v1233_v42  ;;  %650 = vmatmul.mubr.bf16.gmra.mrb[24].mxu1 %v1234_v43 }
  0x57   : > { %593 = vmatprep.mubr.bf16.mxu0 %v1235_v44  ;;  %657 = vmatprep.mubr.bf16.mxu1 %v1237_v45 }
  0x5e   : > { %594 = vmatmul.mubr.bf16.gmra.mrb[28].mxu0 %v1239_v46  ;;  %658 = vmatmul.mubr.bf16.gmra.mrb[28].mxu1 %v1240_v47 }
  0xf9   : > { %v1057_v48 = vpop.f32.mrb[0].mxu0  ;;  %v1105_v49 = vpop.f32.mrb[0].mxu1 }
  0xfa   : > { %v1058_v51 = vpop.f32.mrb[1].mxu0  ;;  %v1106_v52 = vpop.f32.mrb[1].mxu1 }
  0xfb   : > { %v1059_v53 = vadd.f32 %v1058_v51, %v1057_v48  ;;  %v1107_v54 = vadd.f32 %v1106_v52, %v1105_v49  ;;  %v1060_v55 = vpop.f32.mrb[2].mxu0  ;;  %v1108_v56 = vpop.f32.mrb[2].mxu1 }
  0xfc   : > { %v1061_v57 = vpop.f32.mrb[3].mxu0  ;;  %v1109_v58 = vpop.f32.mrb[3].mxu1 }
  0xfd   : > { %v540_v59 = vadd.f32 %v1059_v53, %v1368_v50  ;;  %v604_v60 = vadd.f32 %v1107_v54, %v1368_v50  ;;  %v1062_v61 = vadd.f32 %v1061_v57, %v1060_v55  ;;  %v1110_v62 = vadd.f32 %v1109_v58, %v1108_v56 }
  0xff   : > { %v666_v63 = vmax.f32 %v540_v59, 0.0  ;;  %v682_v0 = vmax.f32 %v604_v60, 0.0  ;;  %v543_v1 = vadd.f32 %v1062_v61, %v1368_v50  ;;  %v607_v2 = vadd.f32 %v1110_v62, %v1368_v50 }
 0x101   : > { %v1009_v3 = vpack.c.bf16 %v666_v63, %v666_v63  ;;  %v1025_v4 = vpack.c.bf16 %v682_v0, %v682_v0  ;;  %v667_v5 = vmax.f32 %v543_v1, 0.0  ;;  %v683_v6 = vmax.f32 %v607_v2, 0.0  ;;  %v1063_v7 = vpop.f32.mrb[4].mxu0  ;;  %v1111_v8 = vpop.f32.mrb[4].mxu1 }
 0x102   : > { %v1064_v9 = vpop.f32.mrb[5].mxu0  ;;  %v1112_v10 = vpop.f32.mrb[5].mxu1 }
 0x103   : > { %827 = vst.msk [vmem:[%s1378_s4] sm:$0xf] %vm826_vm0, %v1009_v3  ;;  %843 = vst.msk [vmem:[%s1378_s4 + $0x40] sm:$0xf] %vm826_vm0, %v1025_v4  ;;  %v1010_v11 = vpack.c.bf16 %v667_v5, %v667_v5  ;;  %v1026_v12 = vpack.c.bf16 %v683_v6, %v683_v6  ;;  %v1065_v13 = vadd.f32 %v1064_v9, %v1063_v7  ;;  %v1066_v15 = vpop.f32.mrb[6].mxu0  ;;  %v1114_v16 = vpop.f32.mrb[6].mxu1 }
 0x104   : > { %v1113_v14 = vadd.f32 %v1112_v10, %v1111_v8  ;;  %v1067_v17 = vpop.f32.mrb[7].mxu0  ;;  %v1115_v18 = vpop.f32.mrb[7].mxu1 }
 0x105   : > { %828 = vst.msk [vmem:[%s1378_s4 + $0x4] sm:$0xf] %vm826_vm0, %v1010_v11  ;;  %844 = vst.msk [vmem:[%s1378_s4 + $0x44] sm:$0xf] %vm826_vm0, %v1026_v12  ;;  %v548_v19 = vadd.f32 %v1065_v13, %v1368_v50  ;;  %v1068_v21 = vadd.f32 %v1067_v17, %v1066_v15  ;;  %v1116_v22 = vadd.f32 %v1115_v18, %v1114_v16 }
 0x106   : > { %v612_v20 = vadd.f32 %v1113_v14, %v1368_v50 }
 0x107   : > { %v668_v23 = vmax.f32 %v548_v19, 0.0  ;;  %v551_v25 = vadd.f32 %v1068_v21, %v1368_v50  ;;  %v615_v26 = vadd.f32 %v1116_v22, %v1368_v50 }
 0x108   : > { %v684_v24 = vmax.f32 %v612_v20, 0.0 }
 0x109   : > { %v1011_v27 = vpack.c.bf16 %v668_v23, %v668_v23  ;;  %v669_v29 = vmax.f32 %v551_v25, 0.0  ;;  %v685_v30 = vmax.f32 %v615_v26, 0.0  ;;  %v1069_v31 = vpop.f32.mrb[8].mxu0  ;;  %v1117_v32 = vpop.f32.mrb[8].mxu1 }
 0x10a   : > { %v1027_v28 = vpack.c.bf16 %v684_v24, %v684_v24  ;;  %v1070_v33 = vpop.f32.mrb[9].mxu0  ;;  %v1118_v34 = vpop.f32.mrb[9].mxu1 }
 0x10b   : > { %829 = vst.msk [vmem:[%s1378_s4 + $0x8] sm:$0xf] %vm826_vm0, %v1011_v27  ;;  %v1012_v35 = vpack.c.bf16 %v669_v29, %v669_v29  ;;  %v1028_v36 = vpack.c.bf16 %v685_v30, %v685_v30  ;;  %v1071_v37 = vadd.f32 %v1070_v33, %v1069_v31  ;;  %v1119_v38 = vadd.f32 %v1118_v34, %v1117_v32  ;;  %v1072_v39 = vpop.f32.mrb[10].mxu0  ;;  %v1120_v40 = vpop.f32.mrb[10].mxu1 }
 0x10c   : > { %845 = vst.msk [vmem:[%s1378_s4 + $0x48] sm:$0xf] %vm826_vm0, %v1027_v28  ;;  %v1073_v41 = vpop.f32.mrb[11].mxu0  ;;  %v1121_v42 = vpop.f32.mrb[11].mxu1 }
 0x10d   : > { %830 = vst.msk [vmem:[%s1378_s4 + $0xc] sm:$0xf] %vm826_vm0, %v1012_v35  ;;  %846 = vst.msk [vmem:[%s1378_s4 + $0x4c] sm:$0xf] %vm826_vm0, %v1028_v36  ;;  %v556_v43 = vadd.f32 %v1071_v37, %v1368_v50  ;;  %v620_v44 = vadd.f32 %v1119_v38, %v1368_v50  ;;  %v1074_v45 = vadd.f32 %v1073_v41, %v1072_v39 }
 0x10e   : > { %v1122_v46 = vadd.f32 %v1121_v42, %v1120_v40 }
 0x10f   : > { %v670_v47 = vmax.f32 %v556_v43, 0.0  ;;  %v686_v48 = vmax.f32 %v620_v44, 0.0  ;;  %v559_v49 = vadd.f32 %v1074_v45, %v1368_v50 }
 0x110   : > { %v623_v51 = vadd.f32 %v1122_v46, %v1368_v50 }
 0x111   : > { %v1013_v52 = vpack.c.bf16 %v670_v47, %v670_v47  ;;  %v1029_v53 = vpack.c.bf16 %v686_v48, %v686_v48  ;;  %v671_v54 = vmax.f32 %v559_v49, 0.0  ;;  %v1075_v56 = vpop.f32.mrb[12].mxu0  ;;  %v1123_v57 = vpop.f32.mrb[12].mxu1 }
 0x112   : > { %v687_v55 = vmax.f32 %v623_v51, 0.0  ;;  %v1076_v58 = vpop.f32.mrb[13].mxu0  ;;  %v1124_v59 = vpop.f32.mrb[13].mxu1 }
 0x113   : > { %831 = vst.msk [vmem:[%s1378_s4 + $0x10] sm:$0xf] %vm826_vm0, %v1013_v52  ;;  %847 = vst.msk [vmem:[%s1378_s4 + $0x50] sm:$0xf] %vm826_vm0, %v1029_v53  ;;  %v1014_v60 = vpack.c.bf16 %v671_v54, %v671_v54  ;;  %v1077_v62 = vadd.f32 %v1076_v58, %v1075_v56  ;;  %v1125_v63 = vadd.f32 %v1124_v59, %v1123_v57  ;;  %v1078_v0 = vpop.f32.mrb[14].mxu0  ;;  %v1126_v1 = vpop.f32.mrb[14].mxu1 }
 0x114   : > { %v1030_v61 = vpack.c.bf16 %v687_v55, %v687_v55  ;;  %v1079_v2 = vpop.f32.mrb[15].mxu0  ;;  %v1127_v3 = vpop.f32.mrb[15].mxu1 }
 0x115   : > { %832 = vst.msk [vmem:[%s1378_s4 + $0x14] sm:$0xf] %vm826_vm0, %v1014_v60  ;;  %v564_v4 = vadd.f32 %v1077_v62, %v1368_v50  ;;  %v628_v5 = vadd.f32 %v1125_v63, %v1368_v50  ;;  %v1080_v6 = vadd.f32 %v1079_v2, %v1078_v0  ;;  %v1128_v7 = vadd.f32 %v1127_v3, %v1126_v1 }
 0x116   : > { %848 = vst.msk [vmem:[%s1378_s4 + $0x54] sm:$0xf] %vm826_vm0, %v1030_v61 }
 0x117   : > { %v672_v8 = vmax.f32 %v564_v4, 0.0  ;;  %v688_v9 = vmax.f32 %v628_v5, 0.0  ;;  %v567_v10 = vadd.f32 %v1080_v6, %v1368_v50  ;;  %v631_v11 = vadd.f32 %v1128_v7, %v1368_v50 }
 0x119   : > { %v1015_v12 = vpack.c.bf16 %v672_v8, %v672_v8  ;;  %v1031_v13 = vpack.c.bf16 %v688_v9, %v688_v9  ;;  %v673_v14 = vmax.f32 %v567_v10, 0.0  ;;  %v689_v15 = vmax.f32 %v631_v11, 0.0  ;;  %v1081_v16 = vpop.f32.mrb[16].mxu0  ;;  %v1129_v17 = vpop.f32.mrb[16].mxu1 }
 0x11a   : > { %v1082_v18 = vpop.f32.mrb[17].mxu0  ;;  %v1130_v19 = vpop.f32.mrb[17].mxu1 }
 0x11b   : > { %833 = vst.msk [vmem:[%s1378_s4 + $0x18] sm:$0xf] %vm826_vm0, %v1015_v12  ;;  %849 = vst.msk [vmem:[%s1378_s4 + $0x58] sm:$0xf] %vm826_vm0, %v1031_v13  ;;  %v1016_v20 = vpack.c.bf16 %v673_v14, %v673_v14  ;;  %v1032_v21 = vpack.c.bf16 %v689_v15, %v689_v15  ;;  %v1083_v22 = vadd.f32 %v1082_v18, %v1081_v16  ;;  %v1084_v24 = vpop.f32.mrb[18].mxu0  ;;  %v1132_v25 = vpop.f32.mrb[18].mxu1 }
 0x11c   : > { %v1131_v23 = vadd.f32 %v1130_v19, %v1129_v17  ;;  %v1085_v26 = vpop.f32.mrb[19].mxu0  ;;  %v1133_v27 = vpop.f32.mrb[19].mxu1 }
 0x11d   : > { %834 = vst.msk [vmem:[%s1378_s4 + $0x1c] sm:$0xf] %vm826_vm0, %v1016_v20  ;;  %850 = vst.msk [vmem:[%s1378_s4 + $0x5c] sm:$0xf] %vm826_vm0, %v1032_v21  ;;  %v572_v28 = vadd.f32 %v1083_v22, %v1368_v50  ;;  %v1086_v30 = vadd.f32 %v1085_v26, %v1084_v24  ;;  %v1134_v31 = vadd.f32 %v1133_v27, %v1132_v25 }
 0x11e   : > { %v636_v29 = vadd.f32 %v1131_v23, %v1368_v50 }
 0x11f   : > { %v674_v32 = vmax.f32 %v572_v28, 0.0  ;;  %v575_v34 = vadd.f32 %v1086_v30, %v1368_v50  ;;  %v639_v35 = vadd.f32 %v1134_v31, %v1368_v50 }
 0x120   : > { %v690_v33 = vmax.f32 %v636_v29, 0.0 }
 0x121   : > { %v1017_v36 = vpack.c.bf16 %v674_v32, %v674_v32  ;;  %v675_v38 = vmax.f32 %v575_v34, 0.0  ;;  %v691_v39 = vmax.f32 %v639_v35, 0.0  ;;  %v1087_v40 = vpop.f32.mrb[20].mxu0  ;;  %v1135_v41 = vpop.f32.mrb[20].mxu1 }
 0x122   : > { %v1033_v37 = vpack.c.bf16 %v690_v33, %v690_v33  ;;  %v1088_v42 = vpop.f32.mrb[21].mxu0  ;;  %v1136_v43 = vpop.f32.mrb[21].mxu1 }
 0x123   : > { %835 = vst.msk [vmem:[%s1378_s4 + $0x20] sm:$0xf] %vm826_vm0, %v1017_v36  ;;  %v1018_v44 = vpack.c.bf16 %v675_v38, %v675_v38  ;;  %v1034_v45 = vpack.c.bf16 %v691_v39, %v691_v39  ;;  %v1089_v46 = vadd.f32 %v1088_v42, %v1087_v40  ;;  %v1137_v47 = vadd.f32 %v1136_v43, %v1135_v41  ;;  %v1090_v48 = vpop.f32.mrb[22].mxu0  ;;  %v1138_v49 = vpop.f32.mrb[22].mxu1 }
 0x124   : > { %851 = vst.msk [vmem:[%s1378_s4 + $0x60] sm:$0xf] %vm826_vm0, %v1033_v37  ;;  %v1091_v51 = vpop.f32.mrb[23].mxu0  ;;  %v1139_v52 = vpop.f32.mrb[23].mxu1 }
 0x125   : > { %836 = vst.msk [vmem:[%s1378_s4 + $0x24] sm:$0xf] %vm826_vm0, %v1018_v44  ;;  %852 = vst.msk [vmem:[%s1378_s4 + $0x64] sm:$0xf] %vm826_vm0, %v1034_v45  ;;  %v580_v53 = vadd.f32 %v1089_v46, %v1368_v50  ;;  %v644_v54 = vadd.f32 %v1137_v47, %v1368_v50  ;;  %v1092_v55 = vadd.f32 %v1091_v51, %v1090_v48 }
 0x126   : > { %v1140_v56 = vadd.f32 %v1139_v52, %v1138_v49 }
 0x127   : > { %v676_v57 = vmax.f32 %v580_v53, 0.0  ;;  %v692_v58 = vmax.f32 %v644_v54, 0.0  ;;  %v583_v59 = vadd.f32 %v1092_v55, %v1368_v50 }
 0x128   : > { %v647_v60 = vadd.f32 %v1140_v56, %v1368_v50 }
 0x129   : > { %v1019_v61 = vpack.c.bf16 %v676_v57, %v676_v57  ;;  %v1035_v62 = vpack.c.bf16 %v692_v58, %v692_v58  ;;  %v677_v63 = vmax.f32 %v583_v59, 0.0  ;;  %v1093_v1 = vpop.f32.mrb[24].mxu0  ;;  %v1141_v2 = vpop.f32.mrb[24].mxu1 }
 0x12a   : > { %v693_v0 = vmax.f32 %v647_v60, 0.0  ;;  %v1094_v3 = vpop.f32.mrb[25].mxu0  ;;  %v1142_v4 = vpop.f32.mrb[25].mxu1 }
 0x12b   : > { %837 = vst.msk [vmem:[%s1378_s4 + $0x28] sm:$0xf] %vm826_vm0, %v1019_v61  ;;  %853 = vst.msk [vmem:[%s1378_s4 + $0x68] sm:$0xf] %vm826_vm0, %v1035_v62  ;;  %v1020_v5 = vpack.c.bf16 %v677_v63, %v677_v63  ;;  %v1095_v7 = vadd.f32 %v1094_v3, %v1093_v1  ;;  %v1143_v8 = vadd.f32 %v1142_v4, %v1141_v2  ;;  %v1096_v9 = vpop.f32.mrb[26].mxu0  ;;  %v1144_v10 = vpop.f32.mrb[26].mxu1 }
 0x12c   : > { %v1036_v6 = vpack.c.bf16 %v693_v0, %v693_v0  ;;  %v1097_v11 = vpop.f32.mrb[27].mxu0  ;;  %v1145_v12 = vpop.f32.mrb[27].mxu1 }
 0x12d   : > { %838 = vst.msk [vmem:[%s1378_s4 + $0x2c] sm:$0xf] %vm826_vm0, %v1020_v5  ;;  %v588_v13 = vadd.f32 %v1095_v7, %v1368_v50  ;;  %v652_v14 = vadd.f32 %v1143_v8, %v1368_v50  ;;  %v1098_v15 = vadd.f32 %v1097_v11, %v1096_v9  ;;  %v1146_v16 = vadd.f32 %v1145_v12, %v1144_v10 }
 0x12e   : > { %854 = vst.msk [vmem:[%s1378_s4 + $0x6c] sm:$0xf] %vm826_vm0, %v1036_v6 }
 0x12f   : > { %v678_v17 = vmax.f32 %v588_v13, 0.0  ;;  %v694_v18 = vmax.f32 %v652_v14, 0.0  ;;  %v591_v19 = vadd.f32 %v1098_v15, %v1368_v50  ;;  %v655_v20 = vadd.f32 %v1146_v16, %v1368_v50 }
 0x131   : > { %v1021_v21 = vpack.c.bf16 %v678_v17, %v678_v17  ;;  %v1037_v22 = vpack.c.bf16 %v694_v18, %v694_v18  ;;  %v679_v23 = vmax.f32 %v591_v19, 0.0  ;;  %v695_v24 = vmax.f32 %v655_v20, 0.0  ;;  %v1099_v25 = vpop.f32.mrb[28].mxu0  ;;  %v1147_v26 = vpop.f32.mrb[28].mxu1 }
 0x132   : > { %v1100_v27 = vpop.f32.mrb[29].mxu0  ;;  %v1148_v28 = vpop.f32.mrb[29].mxu1 }
 0x133   : > { %839 = vst.msk [vmem:[%s1378_s4 + $0x30] sm:$0xf] %vm826_vm0, %v1021_v21  ;;  %855 = vst.msk [vmem:[%s1378_s4 + $0x70] sm:$0xf] %vm826_vm0, %v1037_v22  ;;  %v1022_v29 = vpack.c.bf16 %v679_v23, %v679_v23  ;;  %v1038_v30 = vpack.c.bf16 %v695_v24, %v695_v24  ;;  %v1101_v31 = vadd.f32 %v1100_v27, %v1099_v25  ;;  %v1102_v33 = vpop.f32.mrb[30].mxu0  ;;  %v1150_v34 = vpop.f32.mrb[30].mxu1 }
 0x134   : > { %v1149_v32 = vadd.f32 %v1148_v28, %v1147_v26  ;;  %v1103_v35 = vpop.f32.mrb[31].mxu0  ;;  %v1151_v36 = vpop.f32.mrb[31].mxu1 }
 0x135   : > { %840 = vst.msk [vmem:[%s1378_s4 + $0x34] sm:$0xf] %vm826_vm0, %v1022_v29  ;;  %856 = vst.msk [vmem:[%s1378_s4 + $0x74] sm:$0xf] %vm826_vm0, %v1038_v30  ;;  %v596_v37 = vadd.f32 %v1101_v31, %v1368_v50  ;;  %v1104_v39 = vadd.f32 %v1103_v35, %v1102_v33  ;;  %v1152_v40 = vadd.f32 %v1151_v36, %v1150_v34 }
 0x136   : > { %v660_v38 = vadd.f32 %v1149_v32, %v1368_v50 }
 0x137   : > { %v680_v41 = vmax.f32 %v596_v37, 0.0  ;;  %v599_v43 = vadd.f32 %v1104_v39, %v1368_v50  ;;  %v663_v44 = vadd.f32 %v1152_v40, %v1368_v50 }
 0x138   : > { %v696_v42 = vmax.f32 %v660_v38, 0.0 }
 0x139   : > { %v1023_v45 = vpack.c.bf16 %v680_v41, %v680_v41  ;;  %v681_v47 = vmax.f32 %v599_v43, 0.0  ;;  %v697_v48 = vmax.f32 %v663_v44, 0.0 }
 0x13a   : > { %v1039_v46 = vpack.c.bf16 %v696_v42, %v696_v42 }
 0x13b   : > { %841 = vst.msk [vmem:[%s1378_s4 + $0x38] sm:$0xf] %vm826_vm0, %v1023_v45  ;;  %v1024_v49 = vpack.c.bf16 %v681_v47, %v681_v47  ;;  %v1040_v51 = vpack.c.bf16 %v697_v48, %v697_v48 }
 0x13c   : > { %857 = vst.msk [vmem:[%s1378_s4 + $0x78] sm:$0xf] %vm826_vm0, %v1039_v46 }
 0x13d   : > { %842 = vst.msk [vmem:[%s1378_s4 + $0x3c] sm:$0xf] %vm826_vm0, %v1024_v49  ;;  %858 = vst.msk [vmem:[%s1378_s4 + $0x7c] sm:$0xf] %vm826_vm0, %v1040_v51 }
 0x13e PF: > { %s13_s12 = sadd.s32 1, %s1247_s12  }
 0x13f   : > { %p10_p4 = scmp.ge.s32.totalorder %s13_s12, 4  }
 0x141   :  { %12 = sbr.rel (!%p10_p4) target bundleno = 1 (0x1), region = 62 }

// kernel: _lambda_.5
= control target key start
LH: loop header
LB: loop body
LE: loop exit
PB: predicated region body
PF: predicated region fallthrough
CT: control target
= control target key end

     0   :  { %s1958_s12 = smov 0   ;;  %s2246_s0 = inlined_call_operand.vmem [shape: bf16[512,512], index: 0, kind: input, shape index: {}]   ;;  %s2247_s1 = inlined_call_operand.vmem [shape: bf16[512,64], index: 1, kind: input, shape index: {}]   ;;  %s2248_s2 = inlined_call_operand.vmem [shape: f32[1,64], index: 2, kind: input, shape index: {}]   ;;  %s2249_s3 = inlined_call_operand.vmem [shape: bf16[512,64], index: 3, kind: output, shape index: {}]  }
   0x1 LB: > { %s1396_s13 = sadd.s32 4294967295, %s1936_s12   ;;  %p1400_p0 = scmp.ge.s32.totalorder %s1936_s12, 1  ;;  %s1936_s12 = sphi %s1958_s12, %s13_s12  }
   0x2   : > { %p139_p1 = scmp.lt.s32.totalorder %s1936_s12, 3 }
   0x4   : > { %p140_p2 = pnand %p1400_p0, %p139_p1 }
   0x5   : > { %v1802_v0 = vld [vmem:[%s2247_s1 + $0x40] sm:$0xff] (!%p140_p2)   ;;  %v1806_v4 = vld [vmem:[%s2247_s1 + $0x48] sm:$0xff] (!%p140_p2)   ;;  %v1810_v8 = vld [vmem:[%s2247_s1 + $0x50] sm:$0xff] (!%p140_p2)   ;;  %s1401_s21 = sshll.u32 (!%p140_p2), %s1396_s13, 5  ;;  %vm1307_vm0 = vcmask (!%p140_p2), 519168  }
   0x6   : > { %143 = sbr.rel (%p140_p2) target bundleno = 385 (0x181), region = 32  ;;  %v1803_v1 = vld [vmem:[%s2247_s1 + $0xc0] sm:$0xff] (!%p140_p2)   ;;  %1570 = vmatprep.subr.bf16.mxu0 (!%p140_p2), %v1802_v0  ;;  %v1807_v5 = vld [vmem:[%s2247_s1 + $0xc8] sm:$0xff] (!%p140_p2)   ;;  %v1811_v9 = vld [vmem:[%s2247_s1 + $0xd0] sm:$0xff] (!%p140_p2)   ;;  %p165_p3 = scmp.lt.s32.totalorder (!%p140_p2), %s1401_s21, 63 }
   0x7   : > { %v1804_v2 = vld [vmem:[%s2247_s1] sm:$0xff] (!%p140_p2)   ;;  %1682 = vmatprep.subr.bf16.mxu1 (!%p140_p2), %v1803_v1  ;;  %v1808_v6 = vld [vmem:[%s2247_s1 + $0x8] sm:$0xff] (!%p140_p2)   ;;  %v1812_v10 = vld [vmem:[%s2247_s1 + $0x10] sm:$0xff] (!%p140_p2)  }
   0x8   : > { %v1805_v3 = vld [vmem:[%s2247_s1 + $0x80] sm:$0xff] (!%p140_p2)   ;;  %1571 = vmatpush3.bf16.msra.mxu0 (!%p140_p2), %v1804_v2  ;;  %v1809_v7 = vld [vmem:[%s2247_s1 + $0x88] sm:$0xff] (!%p140_p2)   ;;  %v1813_v11 = vld [vmem:[%s2247_s1 + $0x90] sm:$0xff] (!%p140_p2)  }
   0x9   : > { %1683 = vmatpush3.bf16.msra.mxu1 (!%p140_p2), %v1805_v3  ;;  %1572 = vmatprep.subr.bf16.mxu0 (!%p140_p2), %v1806_v4  ;;  %v1814_v12 = vld [vmem:[%s2247_s1 + $0x58] sm:$0xff] (!%p140_p2)   ;;  %v1818_v16 = vld [vmem:[%s2247_s1 + $0x60] sm:$0xff] (!%p140_p2)   ;;  %v1822_v20 = vld [vmem:[%s2247_s1 + $0x68] sm:$0xff] (!%p140_p2)  }
   0xa   : > { %1684 = vmatprep.subr.bf16.mxu1 (!%p140_p2), %v1807_v5  ;;  %v1815_v13 = vld [vmem:[%s2247_s1 + $0xd8] sm:$0xff] (!%p140_p2)   ;;  %v1819_v17 = vld [vmem:[%s2247_s1 + $0xe0] sm:$0xff] (!%p140_p2)   ;;  %v1823_v21 = vld [vmem:[%s2247_s1 + $0xe8] sm:$0xff] (!%p140_p2)  }
   0xb   : > { %v1816_v14 = vld [vmem:[%s2247_s1 + $0x18] sm:$0xff] (!%p140_p2)   ;;  %v1820_v18 = vld [vmem:[%s2247_s1 + $0x20] sm:$0xff] (!%p140_p2)   ;;  %v1824_v22 = vld [vmem:[%s2247_s1 + $0x28] sm:$0xff] (!%p140_p2)  }
   0xc   : > { %1573 = vmatpush3.bf16.msra.mxu0 (!%p140_p2), %v1808_v6  ;;  %v1817_v15 = vld [vmem:[%s2247_s1 + $0x98] sm:$0xff] (!%p140_p2)   ;;  %v1821_v19 = vld [vmem:[%s2247_s1 + $0xa0] sm:$0xff] (!%p140_p2)   ;;  %v1825_v23 = vld [vmem:[%s2247_s1 + $0xa8] sm:$0xff] (!%p140_p2)  }
   0xd   : > { %1685 = vmatpush3.bf16.msra.mxu1 %v1809_v7  ;;  %1574 = vmatprep.subr.bf16.mxu0 %v1810_v8  ;;  %s2251_s21 = smov (!%p165_p3, %s1401_s21), 63  ;;  %v1826_v24 = vld [vmem:[%s2247_s1 + $0x70] sm:$0xff]   ;;  %v1830_v28 = vld [vmem:[%s2247_s1 + $0x78] sm:$0xff]  }
   0xe   : > { %1686 = vmatprep.subr.bf16.mxu1 %v1811_v9  ;;  %v1827_v25 = vld [vmem:[%s2247_s1 + $0xf0] sm:$0xff]   ;;  %s1537_s18 = sshll.u32 %s2251_s21, 4  ;;  %v1831_v29 = vld [vmem:[%s2247_s1 + $0xf8] sm:$0xff]   ;;  %s1405_s7 = sshll.u32 %s2251_s21, 2 }
   0xf   : > { %v1828_v26 = vld [vmem:[%s2247_s1 + $0x30] sm:$0xff]   ;;  %s2064_s28 = scalar_lea.vmem %s2246_s0, %s1537_s18  ;;  %v1832_v30 = vld [vmem:[%s2247_s1 + $0x38] sm:$0xff]   ;;  %s2147_s10 = scalar_lea.vmem %s2249_s3, %s1405_s7 }
  0x10   : > { %1575 = vmatpush3.bf16.msra.mxu0 %v1812_v10  ;;  %v1829_v27 = vld [vmem:[%s2247_s1 + $0xb0] sm:$0xff]   ;;  %v1833_v31 = vld [vmem:[%s2247_s1 + $0xb8] sm:$0xff]  }
  0x11   : > { %1687 = vmatpush3.bf16.msra.mxu1 %v1813_v11  ;;  %1576 = vmatprep.subr.bf16.mxu0 %v1814_v12  ;;  %v1834_v32 = vld [vmem:[%s2064_s28] ss:$16 sps:$4 sm:$0xff]   ;;  %v1836_v33 = vld [vmem:[%s2064_s28 + $0x4] ss:$16 sps:$4 sm:$0xff]   ;;  %v1837_v34 = vld [vmem:[%s2064_s28 + $0x8] ss:$16 sps:$4 sm:$0xff]  }
  0x12   : > { %1688 = vmatprep.subr.bf16.mxu1 %v1815_v13  ;;  %v1839_v35 = vld [vmem:[%s2064_s28 + $0xc] ss:$16 sps:$4 sm:$0xff]   ;;  %857 = vmatprep.mubr.bf16.mxu0 %v1836_v33  ;;  %v1840_v36 = vld [vmem:[%s2064_s28 + $0x24] ss:$16 sps:$4 sm:$0xff]   ;;  %v1844_v38 = vld [vmem:[%s2064_s28 + $0x20] ss:$16 sps:$4 sm:$0xff]  }
  0x13   : > { %1018 = vmatprep.mubr.bf16.mxu1 %v1839_v35  ;;  %v1842_v37 = vld [vmem:[%s2064_s28 + $0x2c] ss:$16 sps:$4 sm:$0xff]   ;;  %v1845_v39 = vld [vmem:[%s2064_s28 + $0x28] ss:$16 sps:$4 sm:$0xff]   ;;  %v1846_v40 = vld [vmem:[%s2064_s28 + $0x44] ss:$16 sps:$4 sm:$0xff]  }
  0x14   : > { %1577 = vmatpush3.bf16.msra.mxu0 %v1816_v14  ;;  %v1848_v41 = vld [vmem:[%s2064_s28 + $0x4c] ss:$16 sps:$4 sm:$0xff]   ;;  %v1850_v42 = vld [vmem:[%s2064_s28 + $0x40] ss:$16 sps:$4 sm:$0xff]   ;;  %v1851_v43 = vld [vmem:[%s2064_s28 + $0x48] ss:$16 sps:$4 sm:$0xff]  }
  0x15   : > { %1689 = vmatpush3.bf16.msra.mxu1 %v1817_v15  ;;  %1578 = vmatprep.subr.bf16.mxu0 %v1818_v16  ;;  %v1852_v44 = vld [vmem:[%s2064_s28 + $0x64] ss:$16 sps:$4 sm:$0xff]   ;;  %v1854_v45 = vld [vmem:[%s2064_s28 + $0x6c] ss:$16 sps:$4 sm:$0xff]   ;;  %v1856_v46 = vld [vmem:[%s2064_s28 + $0x60] ss:$16 sps:$4 sm:$0xff]  }
  0x16   : > { %1690 = vmatprep.subr.bf16.mxu1 %v1819_v17  ;;  %v1857_v47 = vld [vmem:[%s2064_s28 + $0x68] ss:$16 sps:$4 sm:$0xff]   ;;  %v1858_v48 = vld [vmem:[%s2064_s28 + $0x84] ss:$16 sps:$4 sm:$0xff]   ;;  %v1860_v49 = vld [vmem:[%s2064_s28 + $0x8c] ss:$16 sps:$4 sm:$0xff]  }
  0x17   : > { %v1862_v50 = vld [vmem:[%s2064_s28 + $0x80] ss:$16 sps:$4 sm:$0xff]   ;;  %v1863_v51 = vld [vmem:[%s2064_s28 + $0x88] ss:$16 sps:$4 sm:$0xff]   ;;  %v1864_v52 = vld [vmem:[%s2064_s28 + $0xa4] ss:$16 sps:$4 sm:$0xff]  }
  0x18   : > { %1579 = vmatpush3.bf16.msra.mxu0 %v1820_v18  ;;  %v1866_v53 = vld [vmem:[%s2064_s28 + $0xac] ss:$16 sps:$4 sm:$0xff]   ;;  %v1868_v54 = vld [vmem:[%s2064_s28 + $0xa0] ss:$16 sps:$4 sm:$0xff]   ;;  %v1869_v55 = vld [vmem:[%s2064_s28 + $0xa8] ss:$16 sps:$4 sm:$0xff]  }
  0x19   : > { %1691 = vmatpush3.bf16.msra.mxu1 %v1821_v19  ;;  %1580 = vmatprep.subr.bf16.mxu0 %v1822_v20  ;;  %v1870_v56 = vld [vmem:[%s2064_s28 + $0xc4] ss:$16 sps:$4 sm:$0xff]   ;;  %v1872_v57 = vld [vmem:[%s2064_s28 + $0xcc] ss:$16 sps:$4 sm:$0xff]   ;;  %v1874_v58 = vld [vmem:[%s2064_s28 + $0xc0] ss:$16 sps:$4 sm:$0xff]  }
  0x1a   : > { %1692 = vmatprep.subr.bf16.mxu1 %v1823_v21  ;;  %v1875_v59 = vld [vmem:[%s2064_s28 + $0xc8] ss:$16 sps:$4 sm:$0xff]   ;;  %v1876_v60 = vld [vmem:[%s2064_s28 + $0xe4] ss:$16 sps:$4 sm:$0xff]   ;;  %v1878_v61 = vld [vmem:[%s2064_s28 + $0xec] ss:$16 sps:$4 sm:$0xff]  }
  0x1b   : > { %v1880_v62 = vld [vmem:[%s2064_s28 + $0xe0] ss:$16 sps:$4 sm:$0xff]   ;;  %v1881_v63 = vld [vmem:[%s2064_s28 + $0xe8] ss:$16 sps:$4 sm:$0xff]   ;;  %v1882_v0 = vld [vmem:[%s2064_s28 + $0x104] ss:$16 sps:$4 sm:$0xff]  }
  0x1c   : > { %1581 = vmatpush3.bf16.msra.mxu0 %v1824_v22  ;;  %v1884_v1 = vld [vmem:[%s2064_s28 + $0x10c] ss:$16 sps:$4 sm:$0xff]   ;;  %v1886_v2 = vld [vmem:[%s2064_s28 + $0x100] ss:$16 sps:$4 sm:$0xff]   ;;  %v1887_v3 = vld [vmem:[%s2064_s28 + $0x108] ss:$16 sps:$4 sm:$0xff]  }
  0x1d   : > { %1693 = vmatpush3.bf16.msra.mxu1 %v1825_v23  ;;  %1582 = vmatprep.subr.bf16.mxu0 %v1826_v24  ;;  %v1888_v4 = vld [vmem:[%s2064_s28 + $0x124] ss:$16 sps:$4 sm:$0xff]   ;;  %v1890_v5 = vld [vmem:[%s2064_s28 + $0x12c] ss:$16 sps:$4 sm:$0xff]   ;;  %v1892_v6 = vld [vmem:[%s2064_s28 + $0x120] ss:$16 sps:$4 sm:$0xff]  }
  0x1e   : > { %1694 = vmatprep.subr.bf16.mxu1 %v1827_v25  ;;  %v1893_v7 = vld [vmem:[%s2064_s28 + $0x128] ss:$16 sps:$4 sm:$0xff]   ;;  %v1894_v8 = vld [vmem:[%s2064_s28 + $0x144] ss:$16 sps:$4 sm:$0xff]   ;;  %v1896_v9 = vld [vmem:[%s2064_s28 + $0x14c] ss:$16 sps:$4 sm:$0xff]  }
  0x1f   : > { %v1898_v10 = vld [vmem:[%s2064_s28 + $0x140] ss:$16 sps:$4 sm:$0xff]   ;;  %v1899_v11 = vld [vmem:[%s2064_s28 + $0x148] ss:$16 sps:$4 sm:$0xff]   ;;  %v1900_v12 = vld [vmem:[%s2064_s28 + $0x164] ss:$16 sps:$4 sm:$0xff]  }
  0x20   : > { %1583 = vmatpush3.bf16.msra.mxu0 %v1828_v26  ;;  %v1902_v13 = vld [vmem:[%s2064_s28 + $0x16c] ss:$16 sps:$4 sm:$0xff]   ;;  %v1904_v14 = vld [vmem:[%s2064_s28 + $0x160] ss:$16 sps:$4 sm:$0xff]   ;;  %v1905_v15 = vld [vmem:[%s2064_s28 + $0x168] ss:$16 sps:$4 sm:$0xff]  }
  0x21   : > { %1695 = vmatpush3.bf16.msra.mxu1 %v1829_v27  ;;  %1584 = vmatprep.subr.bf16.mxu0 %v1830_v28  ;;  %v1906_v16 = vld [vmem:[%s2064_s28 + $0x184] ss:$16 sps:$4 sm:$0xff]   ;;  %v1908_v17 = vld [vmem:[%s2064_s28 + $0x18c] ss:$16 sps:$4 sm:$0xff]   ;;  %v1910_v18 = vld [vmem:[%s2064_s28 + $0x180] ss:$16 sps:$4 sm:$0xff]  }
  0x22   : > { %1696 = vmatprep.subr.bf16.mxu1 %v1831_v29  ;;  %v1911_v19 = vld [vmem:[%s2064_s28 + $0x188] ss:$16 sps:$4 sm:$0xff]   ;;  %v1912_v20 = vld [vmem:[%s2064_s28 + $0x1a4] ss:$16 sps:$4 sm:$0xff]   ;;  %v1914_v21 = vld [vmem:[%s2064_s28 + $0x1ac] ss:$16 sps:$4 sm:$0xff]  }
  0x23   : > { %v1916_v22 = vld [vmem:[%s2064_s28 + $0x1a0] ss:$16 sps:$4 sm:$0xff]   ;;  %v1917_v23 = vld [vmem:[%s2064_s28 + $0x1a8] ss:$16 sps:$4 sm:$0xff]   ;;  %v1918_v24 = vld [vmem:[%s2064_s28 + $0x1c4] ss:$16 sps:$4 sm:$0xff]  }
  0x24   : > { %1585 = vmatpush3.bf16.msra.mxu0 %v1832_v30  ;;  %v1920_v25 = vld [vmem:[%s2064_s28 + $0x1cc] ss:$16 sps:$4 sm:$0xff]   ;;  %v1922_v26 = vld [vmem:[%s2064_s28 + $0x1c0] ss:$16 sps:$4 sm:$0xff]   ;;  %v1923_v27 = vld [vmem:[%s2064_s28 + $0x1c8] ss:$16 sps:$4 sm:$0xff]  }
  0x25   : > { %1697 = vmatpush3.bf16.msra.mxu1 %v1833_v31  ;;  %v1924_v28 = vld [vmem:[%s2064_s28 + $0x1e4] ss:$16 sps:$4 sm:$0xff]   ;;  %v1926_v29 = vld [vmem:[%s2064_s28 + $0x1ec] ss:$16 sps:$4 sm:$0xff]   ;;  %v1928_v30 = vld [vmem:[%s2064_s28 + $0x1e0] ss:$16 sps:$4 sm:$0xff]  }
  0x26   : > { %v1929_v31 = vld [vmem:[%s2064_s28 + $0x1e8] ss:$16 sps:$4 sm:$0xff]  }
  0x27   : > { %858 = vmatmul.mubr.bf16.vlgmr.msra.gmra.mrb[0].mxu0 %v1834_v32 }
  0x28   : > { %1019 = vmatmul.mubr.bf16.vlgmr.msra.gmra.mrb[0].mxu1 %v1837_v34  ;;  %865 = vmatprep.mubr.bf16.mxu0 %v1840_v36  ;;  %v2139_v34 = vld [vmem:[%s2248_s2] ss:$0 sm:$0xff] }
  0x29   : > { %1026 = vmatprep.mubr.bf16.mxu1 %v1842_v37 }
  0x2f   : > { %866 = vmatmul.mubr.bf16.gmra.mrb[4].mxu0 %v1844_v38 }
  0x30   : > { %1027 = vmatmul.mubr.bf16.gmra.mrb[4].mxu1 %v1845_v39  ;;  %873 = vmatprep.mubr.bf16.mxu0 %v1846_v40 }
  0x31   : > { %1034 = vmatprep.mubr.bf16.mxu1 %v1848_v41 }
  0x37   : > { %874 = vmatmul.mubr.bf16.gmra.mrb[8].mxu0 %v1850_v42 }
  0x38   : > { %1035 = vmatmul.mubr.bf16.gmra.mrb[8].mxu1 %v1851_v43  ;;  %881 = vmatprep.mubr.bf16.mxu0 %v1852_v44 }
  0x39   : > { %1042 = vmatprep.mubr.bf16.mxu1 %v1854_v45 }
  0x3f   : > { %882 = vmatmul.mubr.bf16.gmra.mrb[12].mxu0 %v1856_v46 }
  0x40   : > { %1043 = vmatmul.mubr.bf16.gmra.mrb[12].mxu1 %v1857_v47  ;;  %889 = vmatprep.mubr.bf16.mxu0 %v1858_v48 }
  0x41   : > { %1050 = vmatprep.mubr.bf16.mxu1 %v1860_v49 }
  0x47   : > { %890 = vmatmul.mubr.bf16.gmra.mrb[16].mxu0 %v1862_v50 }
  0x48   : > { %1051 = vmatmul.mubr.bf16.gmra.mrb[16].mxu1 %v1863_v51  ;;  %897 = vmatprep.mubr.bf16.mxu0 %v1864_v52 }
  0x49   : > { %1058 = vmatprep.mubr.bf16.mxu1 %v1866_v53 }
  0x4f   : > { %898 = vmatmul.mubr.bf16.gmra.mrb[20].mxu0 %v1868_v54 }
  0x50   : > { %1059 = vmatmul.mubr.bf16.gmra.mrb[20].mxu1 %v1869_v55  ;;  %905 = vmatprep.mubr.bf16.mxu0 %v1870_v56 }
  0x51   : > { %1066 = vmatprep.mubr.bf16.mxu1 %v1872_v57 }
  0x57   : > { %906 = vmatmul.mubr.bf16.gmra.mrb[24].mxu0 %v1874_v58 }
  0x58   : > { %1067 = vmatmul.mubr.bf16.gmra.mrb[24].mxu1 %v1875_v59  ;;  %913 = vmatprep.mubr.bf16.mxu0 %v1876_v60 }
  0x59   : > { %1074 = vmatprep.mubr.bf16.mxu1 %v1878_v61 }
  0x5f   : > { %914 = vmatmul.mubr.bf16.gmra.mrb[28].mxu0 %v1880_v62 }
  0x60   : > { %1075 = vmatmul.mubr.bf16.gmra.mrb[28].mxu1 %v1881_v63  ;;  %921 = vmatprep.mubr.bf16.mxu0 %v1882_v0 }
  0x61   : > { %1082 = vmatprep.mubr.bf16.mxu1 %v1884_v1 }
  0x67   : > { %922 = vmatmul.mubr.bf16.gmra.mrb[32].mxu0 %v1886_v2 }
  0x68   : > { %1083 = vmatmul.mubr.bf16.gmra.mrb[32].mxu1 %v1887_v3  ;;  %929 = vmatprep.mubr.bf16.mxu0 %v1888_v4 }
  0x69   : > { %1090 = vmatprep.mubr.bf16.mxu1 %v1890_v5 }
  0x6f   : > { %930 = vmatmul.mubr.bf16.gmra.mrb[36].mxu0 %v1892_v6 }
  0x70   : > { %1091 = vmatmul.mubr.bf16.gmra.mrb[36].mxu1 %v1893_v7  ;;  %937 = vmatprep.mubr.bf16.mxu0 %v1894_v8 }
  0x71   : > { %1098 = vmatprep.mubr.bf16.mxu1 %v1896_v9 }
  0x77   : > { %938 = vmatmul.mubr.bf16.gmra.mrb[40].mxu0 %v1898_v10 }
  0x78   : > { %1099 = vmatmul.mubr.bf16.gmra.mrb[40].mxu1 %v1899_v11  ;;  %945 = vmatprep.mubr.bf16.mxu0 %v1900_v12 }
  0x79   : > { %1106 = vmatprep.mubr.bf16.mxu1 %v1902_v13 }
  0x7f   : > { %946 = vmatmul.mubr.bf16.gmra.mrb[44].mxu0 %v1904_v14 }
  0x80   : > { %1107 = vmatmul.mubr.bf16.gmra.mrb[44].mxu1 %v1905_v15  ;;  %953 = vmatprep.mubr.bf16.mxu0 %v1906_v16 }
  0x81   : > { %1114 = vmatprep.mubr.bf16.mxu1 %v1908_v17 }
  0x87   : > { %954 = vmatmul.mubr.bf16.gmra.mrb[48].mxu0 %v1910_v18 }
  0x88   : > { %1115 = vmatmul.mubr.bf16.gmra.mrb[48].mxu1 %v1911_v19  ;;  %961 = vmatprep.mubr.bf16.mxu0 %v1912_v20 }
  0x89   : > { %1122 = vmatprep.mubr.bf16.mxu1 %v1914_v21 }
  0x8f   : > { %962 = vmatmul.mubr.bf16.gmra.mrb[52].mxu0 %v1916_v22 }
  0x90   : > { %1123 = vmatmul.mubr.bf16.gmra.mrb[52].mxu1 %v1917_v23  ;;  %969 = vmatprep.mubr.bf16.mxu0 %v1918_v24 }
  0x91   : > { %1130 = vmatprep.mubr.bf16.mxu1 %v1920_v25 }
  0x97   : > { %970 = vmatmul.mubr.bf16.gmra.mrb[56].mxu0 %v1922_v26 }
  0x98   : > { %1131 = vmatmul.mubr.bf16.gmra.mrb[56].mxu1 %v1923_v27  ;;  %977 = vmatprep.mubr.bf16.mxu0 %v1924_v28 }
  0x99   : > { %1138 = vmatprep.mubr.bf16.mxu1 %v1926_v29 }
  0x9f   : > { %978 = vmatmul.mubr.bf16.gmra.mrb[60].mxu0 %v1928_v30 }
  0xa0   : > { %1139 = vmatmul.mubr.bf16.gmra.mrb[60].mxu1 %v1929_v31 }
  0xfa   : > { %v1586_v32 = vpop.f32.mrb[0].mxu0 }
  0xfb   : > { %v1698_v33 = vpop.f32.mrb[0].mxu1  ;;  %v1587_v35 = vpop.f32.mrb[1].mxu0 }
  0xfc   : > { %v1588_v36 = vadd.f32 %v1587_v35, %v1586_v32  ;;  %v1699_v37 = vpop.f32.mrb[1].mxu1  ;;  %v1589_v38 = vpop.f32.mrb[2].mxu0 }
  0xfd   : > { %v1700_v39 = vadd.f32 %v1699_v37, %v1698_v33  ;;  %v1701_v40 = vpop.f32.mrb[2].mxu1  ;;  %v1590_v41 = vpop.f32.mrb[3].mxu0 }
  0xfe   : > { %v860_v42 = vadd.f32 %v1588_v36, %v2139_v34  ;;  %v1591_v43 = vadd.f32 %v1590_v41, %v1589_v38  ;;  %v1702_v44 = vpop.f32.mrb[3].mxu1 }
  0xff   : > { %v1703_v45 = vadd.f32 %v1702_v44, %v1701_v40 }
 0x100   : > { %v1021_v46 = vadd.f32 %v1700_v39, %v860_v42  ;;  %v863_v47 = vadd.f32 %v1591_v43, %v2139_v34 }
 0x102   : > { %v1147_v48 = vmax.f32 %v1021_v46, 0.0  ;;  %v1024_v49 = vadd.f32 %v1703_v45, %v863_v47  ;;  %v1592_v50 = vpop.f32.mrb[4].mxu0 }
 0x103   : > { %v1704_v51 = vpop.f32.mrb[4].mxu1  ;;  %v1593_v52 = vpop.f32.mrb[5].mxu0 }
 0x104   : > { %v1538_v53 = vpack.c.bf16 %v1147_v48, %v1147_v48  ;;  %v1148_v54 = vmax.f32 %v1024_v49, 0.0  ;;  %v1594_v55 = vadd.f32 %v1593_v52, %v1592_v50  ;;  %v1705_v56 = vpop.f32.mrb[5].mxu1  ;;  %v1595_v57 = vpop.f32.mrb[6].mxu0 }
 0x105   : > { %v1706_v58 = vadd.f32 %v1705_v56, %v1704_v51  ;;  %v1707_v59 = vpop.f32.mrb[6].mxu1  ;;  %v1596_v60 = vpop.f32.mrb[7].mxu0 }
 0x106   : > { %1308 = vst.msk [vmem:[%s2147_s10] sm:$0xf] %vm1307_vm0, %v1538_v53  ;;  %v1539_v61 = vpack.c.bf16 %v1148_v54, %v1148_v54  ;;  %v868_v62 = vadd.f32 %v1594_v55, %v2139_v34  ;;  %v1597_v63 = vadd.f32 %v1596_v60, %v1595_v57  ;;  %v1708_v0 = vpop.f32.mrb[7].mxu1 }
 0x107   : > { %v1709_v1 = vadd.f32 %v1708_v0, %v1707_v59 }
 0x108   : > { %1309 = vst.msk [vmem:[%s2147_s10 + $0x4] sm:$0xf] %vm1307_vm0, %v1539_v61  ;;  %v1029_v2 = vadd.f32 %v1706_v58, %v868_v62  ;;  %v871_v3 = vadd.f32 %v1597_v63, %v2139_v34 }
 0x10a   : > { %v1149_v4 = vmax.f32 %v1029_v2, 0.0  ;;  %v1032_v5 = vadd.f32 %v1709_v1, %v871_v3  ;;  %v1598_v6 = vpop.f32.mrb[8].mxu0 }
 0x10b   : > { %v1710_v7 = vpop.f32.mrb[8].mxu1  ;;  %v1599_v8 = vpop.f32.mrb[9].mxu0 }
 0x10c   : > { %v1540_v9 = vpack.c.bf16 %v1149_v4, %v1149_v4  ;;  %v1150_v10 = vmax.f32 %v1032_v5, 0.0  ;;  %v1600_v11 = vadd.f32 %v1599_v8, %v1598_v6  ;;  %v1711_v12 = vpop.f32.mrb[9].mxu1  ;;  %v1601_v13 = vpop.f32.mrb[10].mxu0 }
 0x10d   : > { %v1712_v14 = vadd.f32 %v1711_v12, %v1710_v7  ;;  %v1713_v15 = vpop.f32.mrb[10].mxu1  ;;  %v1602_v16 = vpop.f32.mrb[11].mxu0 }
 0x10e   : > { %1310 = vst.msk [vmem:[%s2147_s10 + $0x8] sm:$0xf] %vm1307_vm0, %v1540_v9  ;;  %v1541_v17 = vpack.c.bf16 %v1150_v10, %v1150_v10  ;;  %v876_v18 = vadd.f32 %v1600_v11, %v2139_v34  ;;  %v1603_v19 = vadd.f32 %v1602_v16, %v1601_v13  ;;  %v1714_v20 = vpop.f32.mrb[11].mxu1 }
 0x10f   : > { %v1715_v21 = vadd.f32 %v1714_v20, %v1713_v15 }
 0x110   : > { %1311 = vst.msk [vmem:[%s2147_s10 + $0xc] sm:$0xf] %vm1307_vm0, %v1541_v17  ;;  %v1037_v22 = vadd.f32 %v1712_v14, %v876_v18  ;;  %v879_v23 = vadd.f32 %v1603_v19, %v2139_v34 }
 0x112   : > { %v1151_v24 = vmax.f32 %v1037_v22, 0.0  ;;  %v1040_v25 = vadd.f32 %v1715_v21, %v879_v23  ;;  %v1604_v26 = vpop.f32.mrb[12].mxu0 }
 0x113   : > { %v1716_v27 = vpop.f32.mrb[12].mxu1  ;;  %v1605_v28 = vpop.f32.mrb[13].mxu0 }
 0x114   : > { %v1542_v29 = vpack.c.bf16 %v1151_v24, %v1151_v24  ;;  %v1152_v30 = vmax.f32 %v1040_v25, 0.0  ;;  %v1606_v31 = vadd.f32 %v1605_v28, %v1604_v26  ;;  %v1717_v32 = vpop.f32.mrb[13].mxu1  ;;  %v1607_v33 = vpop.f32.mrb[14].mxu0 }
 0x115   : > { %v1718_v35 = vadd.f32 %v1717_v32, %v1716_v27  ;;  %v1719_v36 = vpop.f32.mrb[14].mxu1  ;;  %v1608_v37 = vpop.f32.mrb[15].mxu0 }
 0x116   : > { %1312 = vst.msk [vmem:[%s2147_s10 + $0x10] sm:$0xf] %vm1307_vm0, %v1542_v29  ;;  %v1543_v38 = vpack.c.bf16 %v1152_v30, %v1152_v30  ;;  %v884_v39 = vadd.f32 %v1606_v31, %v2139_v34  ;;  %v1609_v40 = vadd.f32 %v1608_v37, %v1607_v33  ;;  %v1720_v41 = vpop.f32.mrb[15].mxu1 }
 0x117   : > { %v1721_v42 = vadd.f32 %v1720_v41, %v1719_v36 }
 0x118   : > { %1313 = vst.msk [vmem:[%s2147_s10 + $0x14] sm:$0xf] %vm1307_vm0, %v1543_v38  ;;  %v1045_v43 = vadd.f32 %v1718_v35, %v884_v39  ;;  %v887_v44 = vadd.f32 %v1609_v40, %v2139_v34 }
 0x11a   : > { %v1153_v45 = vmax.f32 %v1045_v43, 0.0  ;;  %v1048_v46 = vadd.f32 %v1721_v42, %v887_v44  ;;  %v1610_v47 = vpop.f32.mrb[16].mxu0 }
 0x11b   : > { %v1722_v48 = vpop.f32.mrb[16].mxu1  ;;  %v1611_v49 = vpop.f32.mrb[17].mxu0 }
 0x11c   : > { %v1544_v50 = vpack.c.bf16 %v1153_v45, %v1153_v45  ;;  %v1154_v51 = vmax.f32 %v1048_v46, 0.0  ;;  %v1612_v52 = vadd.f32 %v1611_v49, %v1610_v47  ;;  %v1723_v53 = vpop.f32.mrb[17].mxu1  ;;  %v1613_v54 = vpop.f32.mrb[18].mxu0 }
 0x11d   : > { %v1724_v55 = vadd.f32 %v1723_v53, %v1722_v48  ;;  %v1725_v56 = vpop.f32.mrb[18].mxu1  ;;  %v1614_v57 = vpop.f32.mrb[19].mxu0 }
 0x11e   : > { %1314 = vst.msk [vmem:[%s2147_s10 + $0x18] sm:$0xf] %vm1307_vm0, %v1544_v50  ;;  %v1545_v58 = vpack.c.bf16 %v1154_v51, %v1154_v51  ;;  %v892_v59 = vadd.f32 %v1612_v52, %v2139_v34  ;;  %v1615_v60 = vadd.f32 %v1614_v57, %v1613_v54  ;;  %v1726_v61 = vpop.f32.mrb[19].mxu1 }
 0x11f   : > { %v1727_v62 = vadd.f32 %v1726_v61, %v1725_v56 }
 0x120   : > { %1315 = vst.msk [vmem:[%s2147_s10 + $0x1c] sm:$0xf] %vm1307_vm0, %v1545_v58  ;;  %v1053_v63 = vadd.f32 %v1724_v55, %v892_v59  ;;  %v895_v0 = vadd.f32 %v1615_v60, %v2139_v34 }
 0x122   : > { %v1155_v1 = vmax.f32 %v1053_v63, 0.0  ;;  %v1056_v2 = vadd.f32 %v1727_v62, %v895_v0  ;;  %v1616_v3 = vpop.f32.mrb[20].mxu0 }
 0x123   : > { %v1728_v4 = vpop.f32.mrb[20].mxu1  ;;  %v1617_v5 = vpop.f32.mrb[21].mxu0 }
 0x124   : > { %v1546_v6 = vpack.c.bf16 %v1155_v1, %v1155_v1  ;;  %v1156_v7 = vmax.f32 %v1056_v2, 0.0  ;;  %v1618_v8 = vadd.f32 %v1617_v5, %v1616_v3  ;;  %v1729_v9 = vpop.f32.mrb[21].mxu1  ;;  %v1619_v10 = vpop.f32.mrb[22].mxu0 }
 0x125   : > { %v1730_v11 = vadd.f32 %v1729_v9, %v1728_v4  ;;  %v1731_v12 = vpop.f32.mrb[22].mxu1  ;;  %v1620_v13 = vpop.f32.mrb[23].mxu0 }
 0x126   : > { %1316 = vst.msk [vmem:[%s2147_s10 + $0x20] sm:$0xf] %vm1307_vm0, %v1546_v6  ;;  %v1547_v14 = vpack.c.bf16 %v1156_v7, %v1156_v7  ;;  %v900_v15 = vadd.f32 %v1618_v8, %v2139_v34  ;;  %v1621_v16 = vadd.f32 %v1620_v13, %v1619_v10  ;;  %v1732_v17 = vpop.f32.mrb[23].mxu1 }
 0x127   : > { %v1733_v18 = vadd.f32 %v1732_v17, %v1731_v12 }
 0x128   : > { %1317 = vst.msk [vmem:[%s2147_s10 + $0x24] sm:$0xf] %vm1307_vm0, %v1547_v14  ;;  %v1061_v19 = vadd.f32 %v1730_v11, %v900_v15  ;;  %v903_v20 = vadd.f32 %v1621_v16, %v2139_v34 }
 0x12a   : > { %v1157_v21 = vmax.f32 %v1061_v19, 0.0  ;;  %v1064_v22 = vadd.f32 %v1733_v18, %v903_v20  ;;  %v1622_v23 = vpop.f32.mrb[24].mxu0 }
 0x12b   : > { %v1734_v24 = vpop.f32.mrb[24].mxu1  ;;  %v1623_v25 = vpop.f32.mrb[25].mxu0 }
 0x12c   : > { %v1548_v26 = vpack.c.bf16 %v1157_v21, %v1157_v21  ;;  %v1158_v27 = vmax.f32 %v1064_v22, 0.0  ;;  %v1624_v28 = vadd.f32 %v1623_v25, %v1622_v23  ;;  %v1735_v29 = vpop.f32.mrb[25].mxu1  ;;  %v1625_v30 = vpop.f32.mrb[26].mxu0 }
 0x12d   : > { %v1736_v31 = vadd.f32 %v1735_v29, %v1734_v24  ;;  %v1737_v32 = vpop.f32.mrb[26].mxu1  ;;  %v1626_v33 = vpop.f32.mrb[27].mxu0 }
 0x12e   : > { %1318 = vst.msk [vmem:[%s2147_s10 + $0x28] sm:$0xf] %vm1307_vm0, %v1548_v26  ;;  %v1549_v35 = vpack.c.bf16 %v1158_v27, %v1158_v27  ;;  %v908_v36 = vadd.f32 %v1624_v28, %v2139_v34  ;;  %v1627_v37 = vadd.f32 %v1626_v33, %v1625_v30  ;;  %v1738_v38 = vpop.f32.mrb[27].mxu1 }
 0x12f   : > { %v1739_v39 = vadd.f32 %v1738_v38, %v1737_v32 }
 0x130   : > { %1319 = vst.msk [vmem:[%s2147_s10 + $0x2c] sm:$0xf] %vm1307_vm0, %v1549_v35  ;;  %v1069_v40 = vadd.f32 %v1736_v31, %v908_v36  ;;  %v911_v41 = vadd.f32 %v1627_v37, %v2139_v34 }
 0x132   : > { %v1159_v42 = vmax.f32 %v1069_v40, 0.0  ;;  %v1072_v43 = vadd.f32 %v1739_v39, %v911_v41  ;;  %v1628_v44 = vpop.f32.mrb[28].mxu0 }
 0x133   : > { %v1740_v45 = vpop.f32.mrb[28].mxu1  ;;  %v1629_v46 = vpop.f32.mrb[29].mxu0 }
 0x134   : > { %v1550_v47 = vpack.c.bf16 %v1159_v42, %v1159_v42  ;;  %v1160_v48 = vmax.f32 %v1072_v43, 0.0  ;;  %v1630_v49 = vadd.f32 %v1629_v46, %v1628_v44  ;;  %v1741_v50 = vpop.f32.mrb[29].mxu1  ;;  %v1631_v51 = vpop.f32.mrb[30].mxu0 }
 0x135   : > { %v1742_v52 = vadd.f32 %v1741_v50, %v1740_v45  ;;  %v1743_v53 = vpop.f32.mrb[30].mxu1  ;;  %v1632_v54 = vpop.f32.mrb[31].mxu0 }
 0x136   : > { %1320 = vst.msk [vmem:[%s2147_s10 + $0x30] sm:$0xf] %vm1307_vm0, %v1550_v47  ;;  %v1551_v55 = vpack.c.bf16 %v1160_v48, %v1160_v48  ;;  %v916_v56 = vadd.f32 %v1630_v49, %v2139_v34  ;;  %v1633_v57 = vadd.f32 %v1632_v54, %v1631_v51  ;;  %v1744_v58 = vpop.f32.mrb[31].mxu1 }
 0x137   : > { %v1745_v59 = vadd.f32 %v1744_v58, %v1743_v53 }
 0x138   : > { %1321 = vst.msk [vmem:[%s2147_s10 + $0x34] sm:$0xf] %vm1307_vm0, %v1551_v55  ;;  %v1077_v60 = vadd.f32 %v1742_v52, %v916_v56  ;;  %v919_v61 = vadd.f32 %v1633_v57, %v2139_v34 }
 0x13a   : > { %v1161_v62 = vmax.f32 %v1077_v60, 0.0  ;;  %v1080_v63 = vadd.f32 %v1745_v59, %v919_v61  ;;  %v1634_v0 = vpop.f32.mrb[32].mxu0 }
 0x13b   : > { %v1746_v1 = vpop.f32.mrb[32].mxu1  ;;  %v1635_v2 = vpop.f32.mrb[33].mxu0 }
 0x13c   : > { %v1552_v3 = vpack.c.bf16 %v1161_v62, %v1161_v62  ;;  %v1162_v4 = vmax.f32 %v1080_v63, 0.0  ;;  %v1636_v5 = vadd.f32 %v1635_v2, %v1634_v0  ;;  %v1747_v6 = vpop.f32.mrb[33].mxu1  ;;  %v1637_v7 = vpop.f32.mrb[34].mxu0 }
 0x13d   : > { %v1748_v8 = vadd.f32 %v1747_v6, %v1746_v1  ;;  %v1749_v9 = vpop.f32.mrb[34].mxu1  ;;  %v1638_v10 = vpop.f32.mrb[35].mxu0 }
 0x13e   : > { %1322 = vst.msk [vmem:[%s2147_s10 + $0x38] sm:$0xf] %vm1307_vm0, %v1552_v3  ;;  %v1553_v11 = vpack.c.bf16 %v1162_v4, %v1162_v4  ;;  %v924_v12 = vadd.f32 %v1636_v5, %v2139_v34  ;;  %v1639_v13 = vadd.f32 %v1638_v10, %v1637_v7  ;;  %v1750_v14 = vpop.f32.mrb[35].mxu1 }
 0x13f   : > { %v1751_v15 = vadd.f32 %v1750_v14, %v1749_v9 }
 0x140   : > { %1323 = vst.msk [vmem:[%s2147_s10 + $0x3c] sm:$0xf] %vm1307_vm0, %v1553_v11  ;;  %v1085_v16 = vadd.f32 %v1748_v8, %v924_v12  ;;  %v927_v17 = vadd.f32 %v1639_v13, %v2139_v34 }
 0x142   : > { %v1163_v18 = vmax.f32 %v1085_v16, 0.0  ;;  %v1088_v19 = vadd.f32 %v1751_v15, %v927_v17  ;;  %v1640_v20 = vpop.f32.mrb[36].mxu0 }
 0x143   : > { %v1752_v21 = vpop.f32.mrb[36].mxu1  ;;  %v1641_v22 = vpop.f32.mrb[37].mxu0 }
 0x144   : > { %v1554_v23 = vpack.c.bf16 %v1163_v18, %v1163_v18  ;;  %v1164_v24 = vmax.f32 %v1088_v19, 0.0  ;;  %v1642_v25 = vadd.f32 %v1641_v22, %v1640_v20  ;;  %v1753_v26 = vpop.f32.mrb[37].mxu1  ;;  %v1643_v27 = vpop.f32.mrb[38].mxu0 }
 0x145   : > { %v1754_v28 = vadd.f32 %v1753_v26, %v1752_v21  ;;  %v1755_v29 = vpop.f32.mrb[38].mxu1  ;;  %v1644_v30 = vpop.f32.mrb[39].mxu0 }
 0x146   : > { %1324 = vst.msk [vmem:[%s2147_s10 + $0x40] sm:$0xf] %vm1307_vm0, %v1554_v23  ;;  %v1555_v31 = vpack.c.bf16 %v1164_v24, %v1164_v24  ;;  %v932_v32 = vadd.f32 %v1642_v25, %v2139_v34  ;;  %v1645_v33 = vadd.f32 %v1644_v30, %v1643_v27  ;;  %v1756_v35 = vpop.f32.mrb[39].mxu1 }
 0x147   : > { %v1757_v36 = vadd.f32 %v1756_v35, %v1755_v29 }
 0x148   : > { %1325 = vst.msk [vmem:[%s2147_s10 + $0x44] sm:$0xf] %vm1307_vm0, %v1555_v31  ;;  %v1093_v37 = vadd.f32 %v1754_v28, %v932_v32  ;;  %v935_v38 = vadd.f32 %v1645_v33, %v2139_v34 }
 0x14a   : > { %v1165_v39 = vmax.f32 %v1093_v37, 0.0  ;;  %v1096_v40 = vadd.f32 %v1757_v36, %v935_v38  ;;  %v1646_v41 = vpop.f32.mrb[40].mxu0 }
 0x14b   : > { %v1758_v42 = vpop.f32.mrb[40].mxu1  ;;  %v1647_v43 = vpop.f32.mrb[41].mxu0 }
 0x14c   : > { %v1556_v44 = vpack.c.bf16 %v1165_v39, %v1165_v39  ;;  %v1166_v45 = vmax.f32 %v1096_v40, 0.0  ;;  %v1648_v46 = vadd.f32 %v1647_v43, %v1646_v41  ;;  %v1759_v47 = vpop.f32.mrb[41].mxu1  ;;  %v1649_v48 = vpop.f32.mrb[42].mxu0 }
 0x14d   : > { %v1760_v49 = vadd.f32 %v1759_v47, %v1758_v42  ;;  %v1761_v50 = vpop.f32.mrb[42].mxu1  ;;  %v1650_v51 = vpop.f32.mrb[43].mxu0 }
 0x14e   : > { %1326 = vst.msk [vmem:[%s2147_s10 + $0x48] sm:$0xf] %vm1307_vm0, %v1556_v44  ;;  %v1557_v52 = vpack.c.bf16 %v1166_v45, %v1166_v45  ;;  %v940_v53 = vadd.f32 %v1648_v46, %v2139_v34  ;;  %v1651_v54 = vadd.f32 %v1650_v51, %v1649_v48  ;;  %v1762_v55 = vpop.f32.mrb[43].mxu1 }
 0x14f   : > { %v1763_v56 = vadd.f32 %v1762_v55, %v1761_v50 }
 0x150   : > { %1327 = vst.msk [vmem:[%s2147_s10 + $0x4c] sm:$0xf] %vm1307_vm0, %v1557_v52  ;;  %v1101_v57 = vadd.f32 %v1760_v49, %v940_v53  ;;  %v943_v58 = vadd.f32 %v1651_v54, %v2139_v34 }
 0x152   : > { %v1167_v59 = vmax.f32 %v1101_v57, 0.0  ;;  %v1104_v60 = vadd.f32 %v1763_v56, %v943_v58  ;;  %v1652_v61 = vpop.f32.mrb[44].mxu0 }
 0x153   : > { %v1764_v62 = vpop.f32.mrb[44].mxu1  ;;  %v1653_v63 = vpop.f32.mrb[45].mxu0 }
 0x154   : > { %v1558_v0 = vpack.c.bf16 %v1167_v59, %v1167_v59  ;;  %v1168_v1 = vmax.f32 %v1104_v60, 0.0  ;;  %v1654_v2 = vadd.f32 %v1653_v63, %v1652_v61  ;;  %v1765_v3 = vpop.f32.mrb[45].mxu1  ;;  %v1655_v4 = vpop.f32.mrb[46].mxu0 }
 0x155   : > { %v1766_v5 = vadd.f32 %v1765_v3, %v1764_v62  ;;  %v1767_v6 = vpop.f32.mrb[46].mxu1  ;;  %v1656_v7 = vpop.f32.mrb[47].mxu0 }
 0x156   : > { %1328 = vst.msk [vmem:[%s2147_s10 + $0x50] sm:$0xf] %vm1307_vm0, %v1558_v0  ;;  %v1559_v8 = vpack.c.bf16 %v1168_v1, %v1168_v1  ;;  %v948_v9 = vadd.f32 %v1654_v2, %v2139_v34  ;;  %v1657_v10 = vadd.f32 %v1656_v7, %v1655_v4  ;;  %v1768_v11 = vpop.f32.mrb[47].mxu1 }
 0x157   : > { %v1769_v12 = vadd.f32 %v1768_v11, %v1767_v6 }
 0x158   : > { %1329 = vst.msk [vmem:[%s2147_s10 + $0x54] sm:$0xf] %vm1307_vm0, %v1559_v8  ;;  %v1109_v13 = vadd.f32 %v1766_v5, %v948_v9  ;;  %v951_v14 = vadd.f32 %v1657_v10, %v2139_v34 }
 0x15a   : > { %v1169_v15 = vmax.f32 %v1109_v13, 0.0  ;;  %v1112_v16 = vadd.f32 %v1769_v12, %v951_v14  ;;  %v1658_v17 = vpop.f32.mrb[48].mxu0 }
 0x15b   : > { %v1770_v18 = vpop.f32.mrb[48].mxu1  ;;  %v1659_v19 = vpop.f32.mrb[49].mxu0 }
 0x15c   : > { %v1560_v20 = vpack.c.bf16 %v1169_v15, %v1169_v15  ;;  %v1170_v21 = vmax.f32 %v1112_v16, 0.0  ;;  %v1660_v22 = vadd.f32 %v1659_v19, %v1658_v17  ;;  %v1771_v23 = vpop.f32.mrb[49].mxu1  ;;  %v1661_v24 = vpop.f32.mrb[50].mxu0 }
 0x15d   : > { %v1772_v25 = vadd.f32 %v1771_v23, %v1770_v18  ;;  %v1773_v26 = vpop.f32.mrb[50].mxu1  ;;  %v1662_v27 = vpop.f32.mrb[51].mxu0 }
 0x15e   : > { %1330 = vst.msk [vmem:[%s2147_s10 + $0x58] sm:$0xf] %vm1307_vm0, %v1560_v20  ;;  %v1561_v28 = vpack.c.bf16 %v1170_v21, %v1170_v21  ;;  %v956_v29 = vadd.f32 %v1660_v22, %v2139_v34  ;;  %v1663_v30 = vadd.f32 %v1662_v27, %v1661_v24  ;;  %v1774_v31 = vpop.f32.mrb[51].mxu1 }
 0x15f   : > { %v1775_v32 = vadd.f32 %v1774_v31, %v1773_v26 }
 0x160   : > { %1331 = vst.msk [vmem:[%s2147_s10 + $0x5c] sm:$0xf] %vm1307_vm0, %v1561_v28  ;;  %v1117_v33 = vadd.f32 %v1772_v25, %v956_v29  ;;  %v959_v35 = vadd.f32 %v1663_v30, %v2139_v34 }
 0x162   : > { %v1171_v36 = vmax.f32 %v1117_v33, 0.0  ;;  %v1120_v37 = vadd.f32 %v1775_v32, %v959_v35  ;;  %v1664_v38 = vpop.f32.mrb[52].mxu0 }
 0x163   : > { %v1776_v39 = vpop.f32.mrb[52].mxu1  ;;  %v1665_v40 = vpop.f32.mrb[53].mxu0 }
 0x164   : > { %v1562_v41 = vpack.c.bf16 %v1171_v36, %v1171_v36  ;;  %v1172_v42 = vmax.f32 %v1120_v37, 0.0  ;;  %v1666_v43 = vadd.f32 %v1665_v40, %v1664_v38  ;;  %v1777_v44 = vpop.f32.mrb[53].mxu1  ;;  %v1667_v45 = vpop.f32.mrb[54].mxu0 }
 0x165   : > { %v1778_v46 = vadd.f32 %v1777_v44, %v1776_v39  ;;  %v1779_v47 = vpop.f32.mrb[54].mxu1  ;;  %v1668_v48 = vpop.f32.mrb[55].mxu0 }
 0x166   : > { %1332 = vst.msk [vmem:[%s2147_s10 + $0x60] sm:$0xf] %vm1307_vm0, %v1562_v41  ;;  %v1563_v49 = vpack.c.bf16 %v1172_v42, %v1172_v42  ;;  %v964_v50 = vadd.f32 %v1666_v43, %v2139_v34  ;;  %v1669_v51 = vadd.f32 %v1668_v48, %v1667_v45  ;;  %v1780_v52 = vpop.f32.mrb[55].mxu1 }
 0x167   : > { %v1781_v53 = vadd.f32 %v1780_v52, %v1779_v47 }
 0x168   : > { %1333 = vst.msk [vmem:[%s2147_s10 + $0x64] sm:$0xf] %vm1307_vm0, %v1563_v49  ;;  %v1125_v54 = vadd.f32 %v1778_v46, %v964_v50  ;;  %v967_v55 = vadd.f32 %v1669_v51, %v2139_v34 }
 0x16a   : > { %v1173_v56 = vmax.f32 %v1125_v54, 0.0  ;;  %v1128_v57 = vadd.f32 %v1781_v53, %v967_v55  ;;  %v1670_v58 = vpop.f32.mrb[56].mxu0 }
 0x16b   : > { %v1782_v59 = vpop.f32.mrb[56].mxu1  ;;  %v1671_v60 = vpop.f32.mrb[57].mxu0 }
 0x16c   : > { %v1564_v61 = vpack.c.bf16 %v1173_v56, %v1173_v56  ;;  %v1174_v62 = vmax.f32 %v1128_v57, 0.0  ;;  %v1672_v63 = vadd.f32 %v1671_v60, %v1670_v58  ;;  %v1783_v0 = vpop.f32.mrb[57].mxu1  ;;  %v1673_v1 = vpop.f32.mrb[58].mxu0 }
 0x16d   : > { %v1784_v2 = vadd.f32 %v1783_v0, %v1782_v59  ;;  %v1785_v3 = vpop.f32.mrb[58].mxu1  ;;  %v1674_v4 = vpop.f32.mrb[59].mxu0 }
 0x16e   : > { %1334 = vst.msk [vmem:[%s2147_s10 + $0x68] sm:$0xf] %vm1307_vm0, %v1564_v61  ;;  %v1565_v5 = vpack.c.bf16 %v1174_v62, %v1174_v62  ;;  %v972_v6 = vadd.f32 %v1672_v63, %v2139_v34  ;;  %v1675_v7 = vadd.f32 %v1674_v4, %v1673_v1  ;;  %v1786_v8 = vpop.f32.mrb[59].mxu1 }
 0x16f   : > { %v1787_v9 = vadd.f32 %v1786_v8, %v1785_v3 }
 0x170   : > { %1335 = vst.msk [vmem:[%s2147_s10 + $0x6c] sm:$0xf] %vm1307_vm0, %v1565_v5  ;;  %v1133_v10 = vadd.f32 %v1784_v2, %v972_v6  ;;  %v975_v11 = vadd.f32 %v1675_v7, %v2139_v34 }
 0x172   : > { %v1175_v12 = vmax.f32 %v1133_v10, 0.0  ;;  %v1136_v13 = vadd.f32 %v1787_v9, %v975_v11  ;;  %v1676_v14 = vpop.f32.mrb[60].mxu0 }
 0x173   : > { %v1788_v15 = vpop.f32.mrb[60].mxu1  ;;  %v1677_v16 = vpop.f32.mrb[61].mxu0 }
 0x174   : > { %v1566_v17 = vpack.c.bf16 %v1175_v12, %v1175_v12  ;;  %v1176_v18 = vmax.f32 %v1136_v13, 0.0  ;;  %v1678_v19 = vadd.f32 %v1677_v16, %v1676_v14  ;;  %v1789_v20 = vpop.f32.mrb[61].mxu1  ;;  %v1679_v21 = vpop.f32.mrb[62].mxu0 }
 0x175   : > { %v1790_v22 = vadd.f32 %v1789_v20, %v1788_v15  ;;  %v1791_v23 = vpop.f32.mrb[62].mxu1  ;;  %v1680_v24 = vpop.f32.mrb[63].mxu0 }
 0x176   : > { %1336 = vst.msk [vmem:[%s2147_s10 + $0x70] sm:$0xf] %vm1307_vm0, %v1566_v17  ;;  %v1567_v25 = vpack.c.bf16 %v1176_v18, %v1176_v18  ;;  %v980_v26 = vadd.f32 %v1678_v19, %v2139_v34  ;;  %v1681_v27 = vadd.f32 %v1680_v24, %v1679_v21  ;;  %v1792_v28 = vpop.f32.mrb[63].mxu1 }
 0x177   : > { %v1793_v29 = vadd.f32 %v1792_v28, %v1791_v23 }
 0x178   : > { %1337 = vst.msk [vmem:[%s2147_s10 + $0x74] sm:$0xf] %vm1307_vm0, %v1567_v25  ;;  %v1141_v30 = vadd.f32 %v1790_v22, %v980_v26  ;;  %v983_v31 = vadd.f32 %v1681_v27, %v2139_v34 }
 0x17a   : > { %v1177_v32 = vmax.f32 %v1141_v30, 0.0  ;;  %v1144_v33 = vadd.f32 %v1793_v29, %v983_v31 }
 0x17c   : > { %v1568_v35 = vpack.c.bf16 %v1177_v32, %v1177_v32  ;;  %v1178_v36 = vmax.f32 %v1144_v33, 0.0 }
 0x17e   : > { %1338 = vst.msk [vmem:[%s2147_s10 + $0x78] sm:$0xf] %vm1307_vm0, %v1568_v35  ;;  %v1569_v37 = vpack.c.bf16 %v1178_v36, %v1178_v36 }
 0x180   : > { %1339 = vst.msk [vmem:[%s2147_s10 + $0x7c] sm:$0xf] %vm1307_vm0, %v1569_v37 }
 0x181 PF: > { %s13_s12 = sadd.s32 1, %s1936_s12  }
 0x182   : > { %p10_p4 = scmp.ge.s32.totalorder %s13_s12, 4  }
 0x184   :  { %12 = sbr.rel (!%p10_p4) target bundleno = 1 (0x1), region = 62 }

// kernel: _lambda_.6
= control target key start
LH: loop header
LB: loop body
LE: loop exit
PB: predicated region body
PF: predicated region fallthrough
CT: control target
= control target key end

     0   :  { %s2443_s12 = smov 0   ;;  %s2884_s0 = inlined_call_operand.vmem [shape: bf16[512,576], index: 0, kind: input, shape index: {}]   ;;  %s2885_s1 = inlined_call_operand.vmem [shape: bf16[576,64], index: 1, kind: input, shape index: {}]   ;;  %s2886_s2 = inlined_call_operand.vmem [shape: f32[1,64], index: 2, kind: input, shape index: {}]   ;;  %s2887_s3 = inlined_call_operand.vmem [shape: bf16[512,64], index: 3, kind: output, shape index: {}]  }
   0x1 LB: > { %s1750_s13 = sadd.s32 4294967295, %s2421_s12   ;;  %p1754_p0 = scmp.ge.s32.totalorder %s2421_s12, 1  ;;  %s2421_s12 = sphi %s2443_s12, %s13_s12  }
   0x2   : > { %p139_p1 = scmp.lt.s32.totalorder %s2421_s12, 3 }
   0x4   : > { %p140_p2 = pnand %p1754_p0, %p139_p1 }
   0x5   : > { %v2267_v0 = vld [vmem:[%s2885_s1 + $0x40] sm:$0xff] (!%p140_p2)   ;;  %s1755_s16 = sshll.u32 (!%p140_p2), %s1750_s13, 5  ;;  %v2269_v2 = vld [vmem:[%s2885_s1 + $0x48] sm:$0xff] (!%p140_p2)   ;;  %v2271_v4 = vld [vmem:[%s2885_s1 + $0x50] sm:$0xff] (!%p140_p2)   ;;  %vm969_vm0 = vcmask (!%p140_p2), 523264   ;;  %vm1661_vm1 = vcmask (!%p140_p2), 519168  }
   0x6   : > { %143 = sbr.rel (%p140_p2) target bundleno = 416 (0x1a0), region = 32  ;;  %v2268_v1 = vld [vmem:[%s2885_s1] sm:$0xff] (!%p140_p2)   ;;  %1958 = vmatprep.subr.bf16.mxu0 (!%p140_p2), %v2267_v0  ;;  %2242 = vmatprep.subr.bf16.mxu1 (!%p140_p2), %v2267_v0  ;;  %p165_p3 = scmp.lt.s32.totalorder (!%p140_p2), %s1755_s16, 63  ;;  %v2270_v3 = vld [vmem:[%s2885_s1 + $0x8] sm:$0xff] (!%p140_p2)   ;;  %v2272_v5 = vld [vmem:[%s2885_s1 + $0x10] sm:$0xff] (!%p140_p2)  }
   0x7   : > { %1959 = vmatpush3.bf16.msra.mxu0 (!%p140_p2), %v2268_v1  ;;  %2250 = vmatpush3.bf16.msra.mxu1 (!%p140_p2), %v2268_v1  ;;  %v2273_v6 = vld [vmem:[%s2885_s1 + $0x58] sm:$0xff] (!%p140_p2)   ;;  %v2275_v8 = vld [vmem:[%s2885_s1 + $0x60] sm:$0xff] (!%p140_p2)   ;;  %v2277_v10 = vld [vmem:[%s2885_s1 + $0x68] sm:$0xff] (!%p140_p2)  }
   0x8   : > { %1960 = vmatprep.subr.bf16.mxu0 (!%p140_p2), %v2269_v2  ;;  %2243 = vmatprep.subr.bf16.mxu1 (!%p140_p2), %v2269_v2  ;;  %v2274_v7 = vld [vmem:[%s2885_s1 + $0x18] sm:$0xff] (!%p140_p2)   ;;  %v2276_v9 = vld [vmem:[%s2885_s1 + $0x20] sm:$0xff] (!%p140_p2)   ;;  %v2278_v13 = vld [vmem:[%s2885_s1 + $0x28] sm:$0xff] (!%p140_p2)  }
   0x9   : > { %v2279_v14 = vld [vmem:[%s2885_s1 + $0x70] sm:$0xff] (!%p140_p2)   ;;  %v2281_v16 = vld [vmem:[%s2885_s1 + $0x78] sm:$0xff] (!%p140_p2)   ;;  %v2289_v18 = vld [vmem:[%s2885_s1 + $0xc0] sm:$0xff] (!%p140_p2)  }
   0xa   : > { %v2280_v15 = vld [vmem:[%s2885_s1 + $0x30] sm:$0xff] (!%p140_p2)   ;;  %v2282_v17 = vld [vmem:[%s2885_s1 + $0x38] sm:$0xff] (!%p140_p2)   ;;  %v2292_v19 = vld [vmem:[%s2885_s1 + $0x100] sm:$0xff] (!%p140_p2)  }
   0xb   : > { %1961 = vmatpush3.bf16.msra.mxu0 (!%p140_p2), %v2270_v3  ;;  %2251 = vmatpush3.bf16.msra.mxu1 (!%p140_p2), %v2270_v3  ;;  %v2290_v22 = vld [vmem:[%s2885_s1 + $0x80] sm:$0xff] (!%p140_p2)   ;;  %v2291_v23 = vld [vmem:[%s2885_s1 + $0xc8] sm:$0xff] (!%p140_p2)   ;;  %v2300_v28 = vld [vmem:[%s2885_s1 + $0xd0] sm:$0xff] (!%p140_p2)  }
   0xc   : > { %1962 = vmatprep.subr.bf16.mxu0 (!%p140_p2), %v2271_v4  ;;  %2244 = vmatprep.subr.bf16.mxu1 (!%p140_p2), %v2271_v4  ;;  %v2293_v26 = vld [vmem:[%s2885_s1 + $0x88] sm:$0xff] (!%p140_p2)   ;;  %v2301_v30 = vld [vmem:[%s2885_s1 + $0x90] sm:$0xff] (!%p140_p2)   ;;  %v2302_v31 = vld [vmem:[%s2885_s1 + $0xd8] sm:$0xff] (!%p140_p2)  }
   0xd   : > { %s2889_s16 = smov (!%p165_p3, %s1755_s16), 63  ;;  %v2303_v34 = vld [vmem:[%s2885_s1 + $0x98] sm:$0xff]   ;;  %v2323_v35 = vld [vmem:[%s2885_s1 + $0x108] sm:$0xff]   ;;  %v2310_v37 = vld [vmem:[%s2885_s1 + $0xe0] sm:$0xff]  }
   0xe   : > { %s2258_s29 = smul.u32 20, %s2889_s16  ;;  %v2311_v39 = vld [vmem:[%s2885_s1 + $0xa0] sm:$0xff]   ;;  %v2312_v40 = vld [vmem:[%s2885_s1 + $0xe8] sm:$0xff]   ;;  %v2320_v46 = vld [vmem:[%s2885_s1 + $0xf0] sm:$0xff]   ;;  %s1758_s19 = sshll.u32 %s2889_s16, 2 }
   0xf   : > { %1963 = vmatpush3.bf16.msra.mxu0 %v2272_v5  ;;  %2252 = vmatpush3.bf16.msra.mxu1 %v2272_v5  ;;  %v2313_v43 = vld [vmem:[%s2885_s1 + $0xa8] sm:$0xff]   ;;  %v2343_v47 = vld [vmem:[%s2885_s1 + $0x110] sm:$0xff]   ;;  %v2322_v49 = vld [vmem:[%s2885_s1 + $0xf8] sm:$0xff]   ;;  %s2756_s21 = scalar_lea.vmem %s2887_s3, %s1758_s19 }
  0x10   : > { %1964 = vmatprep.subr.bf16.mxu0 %v2273_v6  ;;  %2245 = vmatprep.subr.bf16.mxu1 %v2273_v6  ;;  %s2484_s9 = scalar_lea.vmem %s2884_s0, %s2258_s29  ;;  %v2321_v48 = vld [vmem:[%s2885_s1 + $0xb0] sm:$0xff]   ;;  %v2324_v52 = vld [vmem:[%s2885_s1 + $0xb8] sm:$0xff]  }
  0x11   : > { %v2285_v11 = vld [vmem:[%s2484_s9 + $0x4] ss:$20 sps:$4 sm:$0xff]   ;;  %v2283_v20 = vld [vmem:[%s2484_s9] ss:$20 sps:$4 sm:$0xff]   ;;  %v2298_v27 = vld [vmem:[%s2484_s9 + $0x28] ss:$20 sps:$4 sm:$0xff]  }
  0x12   : > { %v2288_v12 = vld [vmem:[%s2484_s9 + $0x1e4] ss:$20 sps:$4 sm:$0xff]   ;;  %1050 = vmatprep.mubr.bf16.mxu0 %v2285_v11  ;;  %v2286_v21 = vld [vmem:[%s2484_s9 + $0x1e0] ss:$20 sps:$4 sm:$0xff]   ;;  %v2299_v29 = vld [vmem:[%s2484_s9 + $0x208] ss:$20 sps:$4 sm:$0xff]  }
  0x13   : > { %1965 = vmatpush3.bf16.msra.mxu0 %v2274_v7  ;;  %2253 = vmatpush3.bf16.msra.mxu1 %v2274_v7  ;;  %v2294_v24 = vld [vmem:[%s2484_s9 + $0x2c] ss:$20 sps:$4 sm:$0xff]   ;;  %v2304_v32 = vld [vmem:[%s2484_s9 + $0x54] ss:$20 sps:$4 sm:$0xff]   ;;  %v2308_v36 = vld [vmem:[%s2484_s9 + $0x50] ss:$20 sps:$4 sm:$0xff]  }
  0x14   : > { %1966 = vmatprep.subr.bf16.mxu0 %v2275_v8  ;;  %2246 = vmatprep.subr.bf16.mxu1 %v2275_v8  ;;  %v2296_v25 = vld [vmem:[%s2484_s9 + $0x20c] ss:$20 sps:$4 sm:$0xff]   ;;  %v2306_v33 = vld [vmem:[%s2484_s9 + $0x234] ss:$20 sps:$4 sm:$0xff]   ;;  %v2309_v38 = vld [vmem:[%s2484_s9 + $0x230] ss:$20 sps:$4 sm:$0xff]  }
  0x15   : > { %1146 = vmatprep.mubr.bf16.mxu1 %v2288_v12  ;;  %v2314_v41 = vld [vmem:[%s2484_s9 + $0x7c] ss:$20 sps:$4 sm:$0xff]   ;;  %v2318_v44 = vld [vmem:[%s2484_s9 + $0x78] ss:$20 sps:$4 sm:$0xff]   ;;  %v2330_v54 = vld [vmem:[%s2484_s9 + $0xa0] ss:$20 sps:$4 sm:$0xff]  }
  0x16   : > { %v2316_v42 = vld [vmem:[%s2484_s9 + $0x25c] ss:$20 sps:$4 sm:$0xff]   ;;  %v2319_v45 = vld [vmem:[%s2484_s9 + $0x258] ss:$20 sps:$4 sm:$0xff]   ;;  %v2333_v57 = vld [vmem:[%s2484_s9 + $0x34] ss:$20 sps:$4 sm:$0xff]  }
  0x17   : > { %1967 = vmatpush3.bf16.msra.mxu0 %v2276_v9  ;;  %2254 = vmatpush3.bf16.msra.mxu1 %v2276_v9  ;;  %v2325_v50 = vld [vmem:[%s2484_s9 + $0xa4] ss:$20 sps:$4 sm:$0xff]   ;;  %v2329_v51 = vld [vmem:[%s2484_s9 + $0xc] ss:$20 sps:$4 sm:$0xff]   ;;  %v2327_v53 = vld [vmem:[%s2484_s9 + $0x8] ss:$20 sps:$4 sm:$0xff]  }
  0x18   : > { %1968 = vmatprep.subr.bf16.mxu0 %v2277_v10  ;;  %2247 = vmatprep.subr.bf16.mxu1 %v2277_v10  ;;  %v2331_v55 = vld [vmem:[%s2484_s9 + $0xcc] ss:$20 sps:$4 sm:$0xff]   ;;  %v2362_v56 = vld [vmem:[%s2885_s1 + $0x118] sm:$0xff]   ;;  %v2336_v59 = vld [vmem:[%s2484_s9 + $0x30] ss:$20 sps:$4 sm:$0xff]  }
  0x19   : > { %v2335_v58 = vld [vmem:[%s2484_s9 + $0xc8] ss:$20 sps:$4 sm:$0xff]   ;;  %v2341_v62 = vld [vmem:[%s2484_s9 + $0xf0] ss:$20 sps:$4 sm:$0xff]   ;;  %v2342_v63 = vld [vmem:[%s2484_s9 + $0x58] ss:$20 sps:$4 sm:$0xff]  }
  0x1a   : > { %v2337_v60 = vld [vmem:[%s2484_s9 + $0xf4] ss:$20 sps:$4 sm:$0xff]   ;;  %v2339_v61 = vld [vmem:[%s2484_s9 + $0x5c] ss:$20 sps:$4 sm:$0xff]   ;;  %v2346_v1 = vld [vmem:[%s2484_s9 + $0x84] ss:$20 sps:$4 sm:$0xff]  }
  0x1b   : > { %1969 = vmatpush3.bf16.msra.mxu0 %v2278_v13  ;;  %2255 = vmatpush3.bf16.msra.mxu1 %v2278_v13  ;;  %v2344_v0 = vld [vmem:[%s2484_s9 + $0x11c] ss:$20 sps:$4 sm:$0xff]   ;;  %v2348_v2 = vld [vmem:[%s2484_s9 + $0x118] ss:$20 sps:$4 sm:$0xff]   ;;  %v2349_v3 = vld [vmem:[%s2484_s9 + $0x80] ss:$20 sps:$4 sm:$0xff]  }
  0x1c   : > { %1970 = vmatprep.subr.bf16.mxu0 %v2279_v14  ;;  %2248 = vmatprep.subr.bf16.mxu1 %v2279_v14  ;;  %v2350_v4 = vld [vmem:[%s2484_s9 + $0x144] ss:$20 sps:$4 sm:$0xff]   ;;  %v2352_v5 = vld [vmem:[%s2484_s9 + $0xac] ss:$20 sps:$4 sm:$0xff]   ;;  %v2355_v7 = vld [vmem:[%s2484_s9 + $0xa8] ss:$20 sps:$4 sm:$0xff]  }
  0x1d   : > { %v2354_v6 = vld [vmem:[%s2484_s9 + $0x140] ss:$20 sps:$4 sm:$0xff]   ;;  %v2360_v10 = vld [vmem:[%s2484_s9 + $0x168] ss:$20 sps:$4 sm:$0xff]   ;;  %v2361_v11 = vld [vmem:[%s2484_s9 + $0xd0] ss:$20 sps:$4 sm:$0xff]  }
  0x1e   : > { %v2356_v8 = vld [vmem:[%s2484_s9 + $0x16c] ss:$20 sps:$4 sm:$0xff]   ;;  %v2358_v9 = vld [vmem:[%s2484_s9 + $0xd4] ss:$20 sps:$4 sm:$0xff]   ;;  %v2365_v13 = vld [vmem:[%s2484_s9 + $0xfc] ss:$20 sps:$4 sm:$0xff]  }
  0x1f   : > { %1971 = vmatpush3.bf16.msra.mxu0 %v2280_v15  ;;  %2256 = vmatpush3.bf16.msra.mxu1 %v2280_v15  ;;  %v2363_v12 = vld [vmem:[%s2484_s9 + $0x194] ss:$20 sps:$4 sm:$0xff]   ;;  %v2367_v14 = vld [vmem:[%s2484_s9 + $0x190] ss:$20 sps:$4 sm:$0xff]   ;;  %v2368_v15 = vld [vmem:[%s2484_s9 + $0xf8] ss:$20 sps:$4 sm:$0xff]  }
  0x20   : > { %1972 = vmatprep.subr.bf16.mxu0 %v2281_v16  ;;  %2249 = vmatprep.subr.bf16.mxu1 %v2281_v16  ;;  %v2369_v16 = vld [vmem:[%s2484_s9 + $0x1bc] ss:$20 sps:$4 sm:$0xff]  }
  0x23   : > { %1973 = vmatpush3.bf16.msra.mxu0 %v2282_v17  ;;  %2257 = vmatpush3.bf16.msra.mxu1 %v2282_v17  ;;  %v2371_v17 = vld [vmem:[%s2484_s9 + $0x124] ss:$20 sps:$4 sm:$0xff]  }
  0x24   : > { %2070 = vmatprep.subr.bf16.mxu1 %v2289_v18  ;;  %2202 = vmatprep.subr.bf16.mxu0 %v2292_v19  ;;  %v2373_v18 = vld [vmem:[%s2484_s9 + $0x1b8] ss:$20 sps:$4 sm:$0xff]  }
  0x26   : > { %1051 = vmatmul.mubr.bf16.vlgmr.msra.gmra.mrb[0].mxu0 %v2283_v20  ;;  %1147 = vmatmul.mubr.bf16.vlgmr.msra.gmra.mrb[0].mxu1 %v2286_v21  ;;  %v2375_v20 = vld [vmem:[%s2484_s9 + $0x14c] ss:$20 sps:$4 sm:$0xff]   ;;  %v2377_v21 = vld [vmem:[%s2484_s9 + $0x10] ss:$20 sps:$4 sm:$0xff]  }
  0x27   : > { %2071 = vmatpush3.bf16.msra.mxu1 %v2290_v22  ;;  %2203 = vmatpush3.bf16.msra.mxu0 %v2292_v19  ;;  %v2374_v19 = vld [vmem:[%s2484_s9 + $0x120] ss:$20 sps:$4 sm:$0xff]   ;;  %v2378_v22 = vld [vmem:[%s2484_s9 + $0x148] ss:$20 sps:$4 sm:$0xff]  }
  0x28   : > { %2072 = vmatprep.subr.bf16.mxu1 %v2291_v23  ;;  %1058 = vmatprep.mubr.bf16.mxu0 %v2294_v24  ;;  %v2379_v23 = vld [vmem:[%s2484_s9 + $0x38] ss:$20 sps:$4 sm:$0xff]   ;;  %v2380_v24 = vld [vmem:[%s2484_s9 + $0x174] ss:$20 sps:$4 sm:$0xff]  }
  0x29   : > { %1154 = vmatprep.mubr.bf16.mxu1 %v2296_v25  ;;  %2204 = vmatprep.subr.bf16.mxu0 %v2323_v35  ;;  %v2382_v25 = vld [vmem:[%s2484_s9 + $0x60] ss:$20 sps:$4 sm:$0xff]  }
  0x2b   : > { %2073 = vmatpush3.bf16.msra.mxu1 %v2293_v26  ;;  %2205 = vmatpush3.bf16.msra.mxu0 %v2323_v35  ;;  %v2383_v26 = vld [vmem:[%s2484_s9 + $0x170] ss:$20 sps:$4 sm:$0xff]   ;;  %v2394_v35 = vld [vmem:[%s2484_s9 + $0x128] ss:$20 sps:$4 sm:$0xff]  }
  0x2c   : > { %2074 = vmatprep.subr.bf16.mxu1 %v2300_v28  ;;  %2206 = vmatprep.subr.bf16.mxu0 %v2343_v47  ;;  %v2385_v28 = vld [vmem:[%s2484_s9 + $0x19c] ss:$20 sps:$4 sm:$0xff]  }
  0x2e   : > { %1059 = vmatmul.mubr.bf16.gmra.mrb[4].mxu0 %v2298_v27  ;;  %1155 = vmatmul.mubr.bf16.gmra.mrb[4].mxu1 %v2299_v29  ;;  %v2384_v27 = vld [vmem:[%s2484_s9 + $0x88] ss:$20 sps:$4 sm:$0xff]   ;;  %v2387_v29 = vld [vmem:[%s2484_s9 + $0xb0] ss:$20 sps:$4 sm:$0xff]  }
  0x2f   : > { %2075 = vmatpush3.bf16.msra.mxu1 %v2301_v30  ;;  %1066 = vmatprep.mubr.bf16.mxu0 %v2304_v32  ;;  %v2388_v30 = vld [vmem:[%s2484_s9 + $0x198] ss:$20 sps:$4 sm:$0xff]  }
  0x30   : > { %2076 = vmatprep.subr.bf16.mxu1 %v2302_v31  ;;  %1162 = vmatprep.mubr.bf16.mxu1 %v2306_v33  ;;  %v2389_v31 = vld [vmem:[%s2484_s9 + $0xd8] ss:$20 sps:$4 sm:$0xff]   ;;  %v2392_v33 = vld [vmem:[%s2484_s9 + $0x100] ss:$20 sps:$4 sm:$0xff]  }
  0x31   : > { %2207 = vmatpush3.bf16.msra.mxu0 %v2343_v47  ;;  %v2390_v32 = vld [vmem:[%s2484_s9 + $0x1c4] ss:$20 sps:$4 sm:$0xff]  }
  0x32   : > { %2208 = vmatprep.subr.bf16.mxu0 %v2362_v56  ;;  %v2409_v47 = vld [vmem:[%s2484_s9 + $0x218] ss:$20 sps:$4 sm:$0xff]  }
  0x33   : > { %2077 = vmatpush3.bf16.msra.mxu1 %v2303_v34  ;;  %v2393_v34 = vld [vmem:[%s2484_s9 + $0x1c0] ss:$20 sps:$4 sm:$0xff]  }
  0x34   : > { %2078 = vmatprep.subr.bf16.mxu1 %v2310_v37  ;;  %v2397_v37 = vld [vmem:[%s2484_s9 + $0x150] ss:$20 sps:$4 sm:$0xff]  }
  0x35   : > { %2209 = vmatpush3.bf16.msra.mxu0 %v2362_v56 }
  0x36   : > { %1067 = vmatmul.mubr.bf16.gmra.mrb[8].mxu0 %v2308_v36  ;;  %1163 = vmatmul.mubr.bf16.gmra.mrb[8].mxu1 %v2309_v38  ;;  %v2395_v36 = vld [vmem:[%s2484_s9 + $0x1ec] ss:$20 sps:$4 sm:$0xff]   ;;  %v2398_v38 = vld [vmem:[%s2484_s9 + $0x1e8] ss:$20 sps:$4 sm:$0xff]  }
  0x37   : > { %2079 = vmatpush3.bf16.msra.mxu1 %v2311_v39  ;;  %1074 = vmatprep.mubr.bf16.mxu0 %v2314_v41  ;;  %v2399_v39 = vld [vmem:[%s2484_s9 + $0x178] ss:$20 sps:$4 sm:$0xff]   ;;  %v2402_v41 = vld [vmem:[%s2484_s9 + $0x1a0] ss:$20 sps:$4 sm:$0xff]  }
  0x38   : > { %2080 = vmatprep.subr.bf16.mxu1 %v2312_v40  ;;  %1170 = vmatprep.mubr.bf16.mxu1 %v2316_v42  ;;  %v2400_v40 = vld [vmem:[%s2484_s9 + $0x214] ss:$20 sps:$4 sm:$0xff]   ;;  %v2403_v42 = vld [vmem:[%s2484_s9 + $0x210] ss:$20 sps:$4 sm:$0xff]  }
  0x3b   : > { %2081 = vmatpush3.bf16.msra.mxu1 %v2313_v43  ;;  %v2404_v43 = vld [vmem:[%s2484_s9 + $0x1c8] ss:$20 sps:$4 sm:$0xff]  }
  0x3c   : > { %2082 = vmatprep.subr.bf16.mxu1 %v2320_v46  ;;  %v2408_v46 = vld [vmem:[%s2484_s9 + $0x238] ss:$20 sps:$4 sm:$0xff]  }
  0x3e   : > { %1075 = vmatmul.mubr.bf16.gmra.mrb[12].mxu0 %v2318_v44  ;;  %1171 = vmatmul.mubr.bf16.gmra.mrb[12].mxu1 %v2319_v45  ;;  %v2405_v44 = vld [vmem:[%s2484_s9 + $0x23c] ss:$20 sps:$4 sm:$0xff]  }
  0x3f   : > { %2083 = vmatpush3.bf16.msra.mxu1 %v2321_v48  ;;  %1082 = vmatprep.mubr.bf16.mxu0 %v2325_v50  ;;  %v2407_v45 = vld [vmem:[%s2484_s9 + $0x1f0] ss:$20 sps:$4 sm:$0xff]   ;;  %v2413_v50 = vld [vmem:[%s2484_s9 + $0x260] ss:$20 sps:$4 sm:$0xff]  }
  0x40   : > { %2084 = vmatprep.subr.bf16.mxu1 %v2322_v49  ;;  %1211 = vmatprep.mubr.bf16.mxu1 %v2329_v51  ;;  %v2410_v48 = vld [vmem:[%s2484_s9 + $0x264] ss:$20 sps:$4 sm:$0xff]   ;;  %v2412_v49 = vld [vmem:[%s2484_s9 + $0x240] ss:$20 sps:$4 sm:$0xff]   ;;  %v2414_v51 = vld [vmem:[%s2484_s9 + $0x268] ss:$20 sps:$4 sm:$0xff]  }
  0x43   : > { %2085 = vmatpush3.bf16.msra.mxu1 %v2324_v52 }
  0x46   : > { %1083 = vmatmul.mubr.bf16.gmra.mrb[16].mxu0 %v2330_v54  ;;  %1212 = vmatmul.mubr.bf16.vlgmr.msra.gmra.mrb[16].mxu1 %v2327_v53 }
  0x47   : > { %1090 = vmatprep.mubr.bf16.mxu0 %v2331_v55  ;;  %1219 = vmatprep.mubr.bf16.mxu1 %v2333_v57 }
  0x4e   : > { %1091 = vmatmul.mubr.bf16.gmra.mrb[20].mxu0 %v2335_v58  ;;  %1220 = vmatmul.mubr.bf16.gmra.mrb[20].mxu1 %v2336_v59 }
  0x4f   : > { %1098 = vmatprep.mubr.bf16.mxu0 %v2337_v60  ;;  %1227 = vmatprep.mubr.bf16.mxu1 %v2339_v61 }
  0x56   : > { %1099 = vmatmul.mubr.bf16.gmra.mrb[24].mxu0 %v2341_v62  ;;  %1228 = vmatmul.mubr.bf16.gmra.mrb[24].mxu1 %v2342_v63 }
  0x57   : > { %1106 = vmatprep.mubr.bf16.mxu0 %v2344_v0  ;;  %1235 = vmatprep.mubr.bf16.mxu1 %v2346_v1 }
  0x5e   : > { %1107 = vmatmul.mubr.bf16.gmra.mrb[28].mxu0 %v2348_v2  ;;  %1236 = vmatmul.mubr.bf16.gmra.mrb[28].mxu1 %v2349_v3 }
  0x5f   : > { %1114 = vmatprep.mubr.bf16.mxu0 %v2350_v4  ;;  %1243 = vmatprep.mubr.bf16.mxu1 %v2352_v5 }
  0x66   : > { %1115 = vmatmul.mubr.bf16.gmra.mrb[32].mxu0 %v2354_v6  ;;  %1244 = vmatmul.mubr.bf16.gmra.mrb[32].mxu1 %v2355_v7 }
  0x67   : > { %1122 = vmatprep.mubr.bf16.mxu0 %v2356_v8  ;;  %1251 = vmatprep.mubr.bf16.mxu1 %v2358_v9 }
  0x6e   : > { %1123 = vmatmul.mubr.bf16.gmra.mrb[36].mxu0 %v2360_v10  ;;  %1252 = vmatmul.mubr.bf16.gmra.mrb[36].mxu1 %v2361_v11 }
  0x6f   : > { %1130 = vmatprep.mubr.bf16.mxu0 %v2363_v12  ;;  %1259 = vmatprep.mubr.bf16.mxu1 %v2365_v13 }
  0x76   : > { %1131 = vmatmul.mubr.bf16.gmra.mrb[40].mxu0 %v2367_v14  ;;  %1260 = vmatmul.mubr.bf16.gmra.mrb[40].mxu1 %v2368_v15 }
  0x77   : > { %1138 = vmatprep.mubr.bf16.mxu0 %v2369_v16  ;;  %1267 = vmatprep.mubr.bf16.mxu1 %v2371_v17 }
  0x7e   : > { %1139 = vmatmul.mubr.bf16.gmra.mrb[44].mxu0 %v2373_v18  ;;  %1268 = vmatmul.mubr.bf16.gmra.mrb[44].mxu1 %v2374_v19 }
  0x7f   : > { %1275 = vmatprep.mubr.bf16.mxu1 %v2375_v20  ;;  %2210 = vmatprep.mubr.msk.bf16.mxu0 %vm969_vm0, %v2377_v21 }
  0x86   : > { %1276 = vmatmul.mubr.bf16.gmra.mrb[48].mxu1 %v2378_v22  ;;  %2211 = vmatmul.mubr.msk.bf16.vlgmr.msra.gmra.mrb[48].mxu0 %vm969_vm0, %v2379_v23 }
  0x87   : > { %1283 = vmatprep.mubr.bf16.mxu1 %v2380_v24  ;;  %2214 = vmatprep.mubr.msk.bf16.mxu0 %vm969_vm0, %v2382_v25 }
  0x8e   : > { %1284 = vmatmul.mubr.bf16.gmra.mrb[52].mxu1 %v2383_v26  ;;  %2215 = vmatmul.mubr.msk.bf16.gmra.mrb[52].mxu0 %vm969_vm0, %v2384_v27 }
  0x8f   : > { %1291 = vmatprep.mubr.bf16.mxu1 %v2385_v28  ;;  %2218 = vmatprep.mubr.msk.bf16.mxu0 %vm969_vm0, %v2387_v29 }
  0x96   : > { %1292 = vmatmul.mubr.bf16.gmra.mrb[56].mxu1 %v2388_v30  ;;  %2219 = vmatmul.mubr.msk.bf16.gmra.mrb[56].mxu0 %vm969_vm0, %v2389_v31 }
  0x97   : > { %1299 = vmatprep.mubr.bf16.mxu1 %v2390_v32  ;;  %2222 = vmatprep.mubr.msk.bf16.mxu0 %vm969_vm0, %v2392_v33 }
  0x9e   : > { %1300 = vmatmul.mubr.bf16.gmra.mrb[60].mxu1 %v2393_v34  ;;  %2223 = vmatmul.mubr.msk.bf16.gmra.mrb[60].mxu0 %vm969_vm0, %v2394_v35 }
  0x9f   : > { %1307 = vmatprep.mubr.bf16.mxu1 %v2395_v36  ;;  %2226 = vmatprep.mubr.msk.bf16.mxu0 %vm969_vm0, %v2397_v37 }
  0xa6   : > { %1308 = vmatmul.mubr.bf16.gmra.mrb[64].mxu1 %v2398_v38  ;;  %2227 = vmatmul.mubr.msk.bf16.gmra.mrb[64].mxu0 %vm969_vm0, %v2399_v39  ;;  %v2682_v38 = vld [vmem:[%s2886_s2] ss:$0 sm:$0xff] }
  0xa7   : > { %1315 = vmatprep.mubr.bf16.mxu1 %v2400_v40  ;;  %2230 = vmatprep.mubr.msk.bf16.mxu0 %vm969_vm0, %v2402_v41 }
  0xae   : > { %1316 = vmatmul.mubr.bf16.gmra.mrb[68].mxu1 %v2403_v42  ;;  %2231 = vmatmul.mubr.msk.bf16.gmra.mrb[68].mxu0 %vm969_vm0, %v2404_v43 }
  0xaf   : > { %1323 = vmatprep.mubr.bf16.mxu1 %v2405_v44  ;;  %2234 = vmatprep.mubr.msk.bf16.mxu0 %vm969_vm0, %v2407_v45 }
  0xb6   : > { %1324 = vmatmul.mubr.bf16.gmra.mrb[72].mxu1 %v2408_v46  ;;  %2235 = vmatmul.mubr.msk.bf16.gmra.mrb[72].mxu0 %vm969_vm0, %v2409_v47 }
  0xb7   : > { %1331 = vmatprep.mubr.bf16.mxu1 %v2410_v48  ;;  %2238 = vmatprep.mubr.msk.bf16.mxu0 %vm969_vm0, %v2412_v49 }
  0xbe   : > { %1332 = vmatmul.mubr.bf16.gmra.mrb[76].mxu1 %v2413_v50  ;;  %2239 = vmatmul.mubr.msk.bf16.gmra.mrb[76].mxu0 %vm969_vm0, %v2414_v51 }
  0xf9   : > { %v2046_v52 = vpop.f32.mrb[0].mxu1  ;;  %v1974_v53 = vpop.f32.mrb[0].mxu0 }
  0xfa   : > { %v2047_v54 = vpop.f32.mrb[1].mxu1  ;;  %v1975_v55 = vpop.f32.mrb[1].mxu0 }
  0xfb   : > { %v2663_v56 = vadd.f32 %v2047_v54, %v2046_v52  ;;  %v2049_v57 = vpop.f32.mrb[2].mxu1  ;;  %v1976_v58 = vadd.f32 %v1975_v55, %v1974_v53  ;;  %v1977_v59 = vpop.f32.mrb[2].mxu0 }
  0xfc   : > { %v2050_v60 = vpop.f32.mrb[3].mxu1  ;;  %v1978_v61 = vpop.f32.mrb[3].mxu0 }
  0xfd   : > { %v2665_v62 = vadd.f32 %v2050_v60, %v2049_v57  ;;  %v1979_v63 = vadd.f32 %v1978_v61, %v1977_v59  ;;  %v1053_v41 = vadd.f32 %v1976_v58, %v2682_v38 }
  0xff   : > { %v1056_v48 = vadd.f32 %v1979_v63, %v2682_v38 }
 0x101   : > { %v2052_v0 = vpop.f32.mrb[4].mxu1  ;;  %v1980_v1 = vpop.f32.mrb[4].mxu0 }
 0x102   : > { %v2053_v2 = vpop.f32.mrb[5].mxu1  ;;  %v1981_v3 = vpop.f32.mrb[5].mxu0 }
 0x103   : > { %v2667_v4 = vadd.f32 %v2053_v2, %v2052_v0  ;;  %v2055_v5 = vpop.f32.mrb[6].mxu1  ;;  %v1982_v6 = vadd.f32 %v1981_v3, %v1980_v1  ;;  %v1983_v7 = vpop.f32.mrb[6].mxu0 }
 0x104   : > { %v2056_v8 = vpop.f32.mrb[7].mxu1  ;;  %v1984_v9 = vpop.f32.mrb[7].mxu0 }
 0x105   : > { %v2669_v10 = vadd.f32 %v2056_v8, %v2055_v5  ;;  %v1985_v11 = vadd.f32 %v1984_v9, %v1983_v7  ;;  %v1061_v58 = vadd.f32 %v1982_v6, %v2682_v38 }
 0x107   : > { %v1064_v63 = vadd.f32 %v1985_v11, %v2682_v38 }
 0x109   : > { %v2058_v12 = vpop.f32.mrb[8].mxu1  ;;  %v1986_v13 = vpop.f32.mrb[8].mxu0 }
 0x10a   : > { %v2059_v14 = vpop.f32.mrb[9].mxu1  ;;  %v1987_v15 = vpop.f32.mrb[9].mxu0 }
 0x10b   : > { %v2671_v16 = vadd.f32 %v2059_v14, %v2058_v12  ;;  %v2061_v17 = vpop.f32.mrb[10].mxu1  ;;  %v1988_v18 = vadd.f32 %v1987_v15, %v1986_v13  ;;  %v1989_v19 = vpop.f32.mrb[10].mxu0 }
 0x10c   : > { %v2062_v20 = vpop.f32.mrb[11].mxu1  ;;  %v1990_v21 = vpop.f32.mrb[11].mxu0 }
 0x10d   : > { %v2673_v22 = vadd.f32 %v2062_v20, %v2061_v17  ;;  %v1991_v23 = vadd.f32 %v1990_v21, %v1989_v19  ;;  %v1069_v6 = vadd.f32 %v1988_v18, %v2682_v38 }
 0x10f   : > { %v1072_v11 = vadd.f32 %v1991_v23, %v2682_v38 }
 0x111   : > { %v2064_v24 = vpop.f32.mrb[12].mxu1  ;;  %v1992_v25 = vpop.f32.mrb[12].mxu0 }
 0x112   : > { %v2065_v26 = vpop.f32.mrb[13].mxu1  ;;  %v1993_v27 = vpop.f32.mrb[13].mxu0 }
 0x113   : > { %v2675_v28 = vadd.f32 %v2065_v26, %v2064_v24  ;;  %v2067_v29 = vpop.f32.mrb[14].mxu1  ;;  %v1994_v30 = vadd.f32 %v1993_v27, %v1992_v25  ;;  %v1995_v31 = vpop.f32.mrb[14].mxu0 }
 0x114   : > { %v2068_v32 = vpop.f32.mrb[15].mxu1  ;;  %v1996_v33 = vpop.f32.mrb[15].mxu0 }
 0x115   : > { %v2677_v34 = vadd.f32 %v2068_v32, %v2067_v29  ;;  %v1997_v35 = vadd.f32 %v1996_v33, %v1995_v31  ;;  %v1077_v18 = vadd.f32 %v1994_v30, %v2682_v38 }
 0x117   : > { %v1080_v23 = vadd.f32 %v1997_v35, %v2682_v38 }
 0x119   : > { %v2086_v36 = vpop.f32.mrb[16].mxu1  ;;  %v1998_v37 = vpop.f32.mrb[16].mxu0 }
 0x11a   : > { %v2087_v39 = vpop.f32.mrb[17].mxu1  ;;  %v1999_v40 = vpop.f32.mrb[17].mxu0 }
 0x11b   : > { %v2088_v42 = vadd.f32 %v2087_v39, %v2086_v36  ;;  %v2089_v43 = vpop.f32.mrb[18].mxu1  ;;  %v2000_v44 = vadd.f32 %v1999_v40, %v1998_v37  ;;  %v2001_v45 = vpop.f32.mrb[18].mxu0 }
 0x11c   : > { %v2090_v46 = vpop.f32.mrb[19].mxu1  ;;  %v2002_v47 = vpop.f32.mrb[19].mxu0 }
 0x11d   : > { %v2091_v49 = vadd.f32 %v2090_v46, %v2089_v43  ;;  %v2003_v50 = vadd.f32 %v2002_v47, %v2001_v45  ;;  %v2686_v51 = vadd.f32 %v2088_v42, %v1053_v41  ;;  %v1085_v30 = vadd.f32 %v2000_v44, %v2682_v38 }
 0x11f   : > { %v2688_v52 = vadd.f32 %v2091_v49, %v1056_v48  ;;  %v1088_v35 = vadd.f32 %v2003_v50, %v2682_v38 }
 0x121   : > { %v2092_v53 = vpop.f32.mrb[20].mxu1  ;;  %v2004_v54 = vpop.f32.mrb[20].mxu0 }
 0x122   : > { %v2093_v55 = vpop.f32.mrb[21].mxu1  ;;  %v2005_v57 = vpop.f32.mrb[21].mxu0 }
 0x123   : > { %v2094_v59 = vadd.f32 %v2093_v55, %v2092_v53  ;;  %v2095_v60 = vpop.f32.mrb[22].mxu1  ;;  %v2006_v61 = vadd.f32 %v2005_v57, %v2004_v54  ;;  %v2007_v0 = vpop.f32.mrb[22].mxu0 }
 0x124   : > { %v2096_v1 = vpop.f32.mrb[23].mxu1  ;;  %v2008_v2 = vpop.f32.mrb[23].mxu0 }
 0x125   : > { %v2097_v3 = vadd.f32 %v2096_v1, %v2095_v60  ;;  %v2009_v5 = vadd.f32 %v2008_v2, %v2007_v0  ;;  %v2692_v7 = vadd.f32 %v2094_v59, %v1061_v58  ;;  %v1093_v44 = vadd.f32 %v2006_v61, %v2682_v38 }
 0x127   : > { %v2694_v8 = vadd.f32 %v2097_v3, %v1064_v63  ;;  %v1096_v50 = vadd.f32 %v2009_v5, %v2682_v38 }
 0x129   : > { %v2098_v9 = vpop.f32.mrb[24].mxu1  ;;  %v2010_v12 = vpop.f32.mrb[24].mxu0 }
 0x12a   : > { %v2099_v13 = vpop.f32.mrb[25].mxu1  ;;  %v2011_v14 = vpop.f32.mrb[25].mxu0 }
 0x12b   : > { %v2100_v15 = vadd.f32 %v2099_v13, %v2098_v9  ;;  %v2101_v17 = vpop.f32.mrb[26].mxu1  ;;  %v2012_v19 = vadd.f32 %v2011_v14, %v2010_v12  ;;  %v2013_v20 = vpop.f32.mrb[26].mxu0 }
 0x12c   : > { %v2102_v21 = vpop.f32.mrb[27].mxu1  ;;  %v2014_v24 = vpop.f32.mrb[27].mxu0 }
 0x12d   : > { %v2103_v25 = vadd.f32 %v2102_v21, %v2101_v17  ;;  %v2015_v26 = vadd.f32 %v2014_v24, %v2013_v20  ;;  %v2698_v27 = vadd.f32 %v2100_v15, %v1069_v6 }
 0x12f   : > { %v2700_v29 = vadd.f32 %v2103_v25, %v1072_v11 }
 0x131   : > { %v2104_v31 = vpop.f32.mrb[28].mxu1  ;;  %v2016_v32 = vpop.f32.mrb[28].mxu0 }
 0x132   : > { %v2105_v33 = vpop.f32.mrb[29].mxu1  ;;  %v2017_v36 = vpop.f32.mrb[29].mxu0 }
 0x133   : > { %v2106_v37 = vadd.f32 %v2105_v33, %v2104_v31  ;;  %v2107_v39 = vpop.f32.mrb[30].mxu1  ;;  %v2018_v40 = vadd.f32 %v2017_v36, %v2016_v32  ;;  %v2019_v41 = vpop.f32.mrb[30].mxu0 }
 0x134   : > { %v2108_v42 = vpop.f32.mrb[31].mxu1  ;;  %v2020_v43 = vpop.f32.mrb[31].mxu0 }
 0x135   : > { %v2109_v45 = vadd.f32 %v2108_v42, %v2107_v39  ;;  %v2021_v46 = vadd.f32 %v2020_v43, %v2019_v41  ;;  %v2704_v47 = vadd.f32 %v2106_v37, %v1077_v18  ;;  %v1101_v39 = vadd.f32 %v2012_v19, %v2682_v38 }
 0x137   : > { %v2706_v48 = vadd.f32 %v2109_v45, %v1080_v23 }
 0x139   : > { %v2110_v49 = vpop.f32.mrb[32].mxu1  ;;  %v2022_v53 = vpop.f32.mrb[32].mxu0 }
 0x13a   : > { %v2111_v54 = vpop.f32.mrb[33].mxu1  ;;  %v2023_v55 = vpop.f32.mrb[33].mxu0 }
 0x13b   : > { %v2112_v57 = vadd.f32 %v2111_v54, %v2110_v49  ;;  %v2113_v58 = vpop.f32.mrb[34].mxu1  ;;  %v2709_v59 = vadd.f32 %v2023_v55, %v2022_v53  ;;  %v2025_v60 = vpop.f32.mrb[34].mxu0  ;;  %v1104_v49 = vadd.f32 %v2015_v26, %v2682_v38 }
 0x13c   : > { %v2114_v0 = vpop.f32.mrb[35].mxu1  ;;  %v2026_v1 = vpop.f32.mrb[35].mxu0 }
 0x13d   : > { %v2115_v2 = vadd.f32 %v2114_v0, %v2113_v58  ;;  %v2027_v63 = vadd.f32 %v2026_v1, %v2025_v60  ;;  %v2712_v3 = vadd.f32 %v2112_v57, %v1085_v30  ;;  %v1109_v0 = vadd.f32 %v2018_v40, %v2682_v38 }
 0x13f   : > { %v2714_v9 = vadd.f32 %v2115_v2, %v1088_v35 }
 0x141   : > { %v2116_v12 = vpop.f32.mrb[36].mxu1  ;;  %v2028_v13 = vpop.f32.mrb[36].mxu0 }
 0x142   : > { %v2117_v14 = vpop.f32.mrb[37].mxu1  ;;  %v2029_v6 = vpop.f32.mrb[37].mxu0 }
 0x143   : > { %v2118_v15 = vadd.f32 %v2117_v14, %v2116_v12  ;;  %v2119_v17 = vpop.f32.mrb[38].mxu1  ;;  %v2717_v20 = vadd.f32 %v2029_v6, %v2028_v13  ;;  %v2031_v21 = vpop.f32.mrb[38].mxu0  ;;  %v1112_v14 = vadd.f32 %v2021_v46, %v2682_v38 }
 0x144   : > { %v2120_v24 = vpop.f32.mrb[39].mxu1  ;;  %v2032_v11 = vpop.f32.mrb[39].mxu0 }
 0x145   : > { %v2121_v25 = vadd.f32 %v2120_v24, %v2119_v17  ;;  %v2720_v31 = vadd.f32 %v2032_v11, %v2031_v21  ;;  %v2722_v32 = vadd.f32 %v2118_v15, %v1093_v44 }
 0x147   : > { %v2724_v33 = vadd.f32 %v2121_v25, %v1096_v50  ;;  %v1117_v25 = vadd.f32 %v2709_v59, %v2682_v38 }
 0x149   : > { %v2122_v36 = vpop.f32.mrb[40].mxu1  ;;  %v2034_v18 = vpop.f32.mrb[40].mxu0 }
 0x14a   : > { %v2123_v37 = vpop.f32.mrb[41].mxu1  ;;  %v2035_v61 = vpop.f32.mrb[41].mxu0 }
 0x14b   : > { %v2124_v41 = vadd.f32 %v2123_v37, %v2122_v36  ;;  %v2125_v42 = vpop.f32.mrb[42].mxu1  ;;  %v2727_v43 = vadd.f32 %v2035_v61, %v2034_v18  ;;  %v2037_v23 = vpop.f32.mrb[42].mxu0  ;;  %v1120_v61 = vadd.f32 %v2027_v63, %v2682_v38 }
 0x14c   : > { %v2126_v45 = vpop.f32.mrb[43].mxu1  ;;  %v2038_v5 = vpop.f32.mrb[43].mxu0 }
 0x14d   : > { %v2127_v53 = vadd.f32 %v2126_v45, %v2125_v42  ;;  %v2730_v54 = vadd.f32 %v2038_v5, %v2037_v23  ;;  %v2732_v55 = vadd.f32 %v2124_v41, %v1101_v39 }
 0x14f   : > { %v2734_v30 = vadd.f32 %v2127_v53, %v1104_v49 }
 0x151   : > { %v2128_v57 = vpop.f32.mrb[44].mxu1  ;;  %v2040_v58 = vpop.f32.mrb[44].mxu0 }
 0x152   : > { %v2129_v60 = vpop.f32.mrb[45].mxu1  ;;  %v2041_v19 = vpop.f32.mrb[45].mxu0 }
 0x153   : > { %v2130_v1 = vadd.f32 %v2129_v60, %v2128_v57  ;;  %v2131_v35 = vpop.f32.mrb[46].mxu1  ;;  %v2737_v2 = vadd.f32 %v2041_v19, %v2040_v58  ;;  %v2043_v12 = vpop.f32.mrb[46].mxu0 }
 0x154   : > { %v2132_v26 = vpop.f32.mrb[47].mxu1  ;;  %v2044_v13 = vpop.f32.mrb[47].mxu0 }
 0x155   : > { %v2133_v6 = vadd.f32 %v2132_v26, %v2131_v35  ;;  %v2740_v44 = vadd.f32 %v2044_v13, %v2043_v12  ;;  %v2742_v15 = vadd.f32 %v2130_v1, %v1109_v0  ;;  %v1125_v35 = vadd.f32 %v2717_v20, %v2682_v38 }
 0x157   : > { %v2744_v17 = vadd.f32 %v2133_v6, %v1112_v14  ;;  %v1128_v6 = vadd.f32 %v2720_v31, %v2682_v38 }
 0x159   : > { %v2134_v21 = vpop.f32.mrb[48].mxu1  ;;  %v2212_v24 = vpop.f32.mrb[48].mxu0 }
 0x15a   : > { %v1383_v40 = vadd.f32 %v2212_v24, %v2692_v7  ;;  %v2135_v11 = vpop.f32.mrb[49].mxu1  ;;  %v1374_v50 = vpop.f32.mrb[49].mxu0 }
 0x15b   : > { %v2136_v36 = vadd.f32 %v2135_v11, %v2134_v21  ;;  %v1375_v46 = vadd.f32 %v1374_v50, %v2686_v51  ;;  %v2137_v18 = vpop.f32.mrb[50].mxu1  ;;  %v2213_v37 = vpop.f32.mrb[50].mxu0 }
 0x15c   : > { %v1503_v39 = vmax.f32 %v1383_v40, 0.0  ;;  %v1386_v41 = vadd.f32 %v2213_v37, %v2694_v8  ;;  %v2138_v42 = vpop.f32.mrb[51].mxu1  ;;  %v1377_v23 = vpop.f32.mrb[51].mxu0 }
 0x15d   : > { %v1501_v7 = vmax.f32 %v1375_v46, 0.0  ;;  %v2139_v51 = vadd.f32 %v2138_v42, %v2137_v18  ;;  %v1378_v59 = vadd.f32 %v1377_v23, %v2688_v52  ;;  %v2759_v45 = vadd.f32 %v2136_v36, %v1117_v25 }
 0x15e   : > { %v1928_v63 = vpack.c.bf16 %v1503_v39, %v1503_v39  ;;  %v1504_v5 = vmax.f32 %v1386_v41, 0.0  ;;  %v1133_v23 = vadd.f32 %v2727_v43, %v2682_v38 }
 0x15f   : > { %v1926_v8 = vpack.c.bf16 %v1501_v7, %v1501_v7  ;;  %v1502_v49 = vmax.f32 %v1378_v59, 0.0  ;;  %v2761_v53 = vadd.f32 %v2139_v51, %v1120_v61 }
 0x160   : > { %1664 = vst.msk [vmem:[%s2756_s21 + $0x8] sm:$0xf] %vm1661_vm1, %v1928_v63  ;;  %v1929_v57 = vpack.c.bf16 %v1504_v5, %v1504_v5  ;;  %v1136_v5 = vadd.f32 %v2730_v54, %v2682_v38 }
 0x161   : > { %1662 = vst.msk [vmem:[%s2756_s21] sm:$0xf] %vm1661_vm1, %v1926_v8  ;;  %v1927_v58 = vpack.c.bf16 %v1502_v49, %v1502_v49  ;;  %v2140_v60 = vpop.f32.mrb[52].mxu1  ;;  %v2216_v19 = vpop.f32.mrb[52].mxu0 }
 0x162   : > { %1665 = vst.msk [vmem:[%s2756_s21 + $0xc] sm:$0xf] %vm1661_vm1, %v1929_v57  ;;  %v1399_v52 = vadd.f32 %v2216_v19, %v2704_v47  ;;  %v2141_v0 = vpop.f32.mrb[53].mxu1  ;;  %v1390_v1 = vpop.f32.mrb[53].mxu0 }
 0x163   : > { %1663 = vst.msk [vmem:[%s2756_s21 + $0x4] sm:$0xf] %vm1661_vm1, %v1927_v58  ;;  %v2142_v12 = vadd.f32 %v2141_v0, %v2140_v60  ;;  %v1391_v26 = vadd.f32 %v1390_v1, %v2698_v27  ;;  %v2143_v13 = vpop.f32.mrb[54].mxu1  ;;  %v2217_v14 = vpop.f32.mrb[54].mxu0 }
 0x164   : > { %v1507_v21 = vmax.f32 %v1399_v52, 0.0  ;;  %v1402_v47 = vadd.f32 %v2217_v14, %v2706_v48  ;;  %v2144_v24 = vpop.f32.mrb[55].mxu1  ;;  %v1393_v40 = vpop.f32.mrb[55].mxu0 }
 0x165   : > { %v1505_v11 = vmax.f32 %v1391_v26, 0.0  ;;  %v2145_v20 = vadd.f32 %v2144_v24, %v2143_v13  ;;  %v1394_v50 = vadd.f32 %v1393_v40, %v2700_v29  ;;  %v2779_v25 = vadd.f32 %v2142_v12, %v1125_v35 }
 0x166   : > { %v1932_v27 = vpack.c.bf16 %v1507_v21, %v1507_v21  ;;  %v1508_v36 = vmax.f32 %v1402_v47, 0.0 }
 0x167   : > { %v1930_v46 = vpack.c.bf16 %v1505_v11, %v1505_v11  ;;  %v1506_v18 = vmax.f32 %v1394_v50, 0.0  ;;  %v2781_v37 = vadd.f32 %v2145_v20, %v1128_v6  ;;  %v1141_v6 = vadd.f32 %v2737_v2, %v2682_v38 }
 0x168   : > { %1668 = vst.msk [vmem:[%s2756_s21 + $0x18] sm:$0xf] %vm1661_vm1, %v1932_v27  ;;  %v1933_v31 = vpack.c.bf16 %v1508_v36, %v1508_v36  ;;  %v1144_v11 = vadd.f32 %v2740_v44, %v2682_v38 }
 0x169   : > { %1666 = vst.msk [vmem:[%s2756_s21 + $0x10] sm:$0xf] %vm1661_vm1, %v1930_v46  ;;  %v1931_v48 = vpack.c.bf16 %v1506_v18, %v1506_v18  ;;  %v2146_v61 = vpop.f32.mrb[56].mxu1  ;;  %v2220_v39 = vpop.f32.mrb[56].mxu0 }
 0x16a   : > { %1669 = vst.msk [vmem:[%s2756_s21 + $0x1c] sm:$0xf] %vm1661_vm1, %v1933_v31  ;;  %v1415_v29 = vadd.f32 %v2220_v39, %v2722_v32  ;;  %v2147_v41 = vpop.f32.mrb[57].mxu1  ;;  %v1406_v42 = vpop.f32.mrb[57].mxu0 }
 0x16b   : > { %1667 = vst.msk [vmem:[%s2756_s21 + $0x14] sm:$0xf] %vm1661_vm1, %v1931_v48  ;;  %v2148_v7 = vadd.f32 %v2147_v41, %v2146_v61  ;;  %v1407_v51 = vadd.f32 %v1406_v42, %v2712_v3  ;;  %v2149_v59 = vpop.f32.mrb[58].mxu1  ;;  %v2221_v63 = vpop.f32.mrb[58].mxu0 }
 0x16c   : > { %v1511_v8 = vmax.f32 %v1415_v29, 0.0  ;;  %v1418_v32 = vadd.f32 %v2221_v63, %v2724_v33  ;;  %v2150_v49 = vpop.f32.mrb[59].mxu1  ;;  %v1409_v57 = vpop.f32.mrb[59].mxu0 }
 0x16d   : > { %v1509_v58 = vmax.f32 %v1407_v51, 0.0  ;;  %v2151_v43 = vadd.f32 %v2150_v49, %v2149_v59  ;;  %v1410_v60 = vadd.f32 %v1409_v57, %v2714_v9  ;;  %v2799_v19 = vadd.f32 %v2148_v7, %v1133_v23 }
 0x16e   : > { %v1936_v3 = vpack.c.bf16 %v1511_v8, %v1511_v8  ;;  %v1512_v52 = vmax.f32 %v1418_v32, 0.0  ;;  %v1149_v7 = vadd.f32 %v2663_v56, %v2682_v38  ;;  %v1152_v8 = vadd.f32 %v2665_v62, %v2682_v38 }
 0x16f   : > { %v1934_v0 = vpack.c.bf16 %v1509_v58, %v1509_v58  ;;  %v1510_v1 = vmax.f32 %v1410_v60, 0.0  ;;  %v2801_v35 = vadd.f32 %v2151_v43, %v1136_v5 }
 0x170   : > { %1672 = vst.msk [vmem:[%s2756_s21 + $0x28] sm:$0xf] %vm1661_vm1, %v1936_v3  ;;  %v1937_v54 = vpack.c.bf16 %v1512_v52, %v1512_v52 }
 0x171   : > { %1670 = vst.msk [vmem:[%s2756_s21 + $0x20] sm:$0xf] %vm1661_vm1, %v1934_v0  ;;  %v1935_v33 = vpack.c.bf16 %v1510_v1, %v1510_v1  ;;  %v2152_v12 = vpop.f32.mrb[60].mxu1  ;;  %v2224_v26 = vpop.f32.mrb[60].mxu0 }
 0x172   : > { %1673 = vst.msk [vmem:[%s2756_s21 + $0x2c] sm:$0xf] %vm1661_vm1, %v1937_v54  ;;  %v1431_v9 = vadd.f32 %v2224_v26, %v2742_v15  ;;  %v2153_v13 = vpop.f32.mrb[61].mxu1  ;;  %v1422_v14 = vpop.f32.mrb[61].mxu0 }
 0x173   : > { %1671 = vst.msk [vmem:[%s2756_s21 + $0x24] sm:$0xf] %vm1661_vm1, %v1935_v33  ;;  %v2154_v21 = vadd.f32 %v2153_v13, %v2152_v12  ;;  %v1423_v47 = vadd.f32 %v1422_v14, %v2732_v55  ;;  %v2155_v24 = vpop.f32.mrb[62].mxu1  ;;  %v2225_v40 = vpop.f32.mrb[62].mxu0 }
 0x174   : > { %v1515_v20 = vmax.f32 %v1431_v9, 0.0  ;;  %v1434_v15 = vadd.f32 %v2225_v40, %v2744_v17  ;;  %v2156_v50 = vpop.f32.mrb[63].mxu1  ;;  %v1425_v27 = vpop.f32.mrb[63].mxu0  ;;  %v1157_v9 = vadd.f32 %v2667_v4, %v2682_v38 }
 0x175   : > { %v1513_v36 = vmax.f32 %v1423_v47, 0.0  ;;  %v2157_v2 = vadd.f32 %v2156_v50, %v2155_v24  ;;  %v1426_v46 = vadd.f32 %v1425_v27, %v2734_v30  ;;  %v1302_v18 = vadd.f32 %v2154_v21, %v1141_v6 }
 0x176   : > { %v1940_v31 = vpack.c.bf16 %v1515_v20, %v1515_v20  ;;  %v1516_v55 = vmax.f32 %v1434_v15, 0.0  ;;  %v1160_v47 = vadd.f32 %v2669_v10, %v2682_v38 }
 0x177   : > { %v1938_v48 = vpack.c.bf16 %v1513_v36, %v1513_v36  ;;  %v1514_v61 = vmax.f32 %v1426_v46, 0.0  ;;  %v1305_v39 = vadd.f32 %v2157_v2, %v1144_v11 }
 0x178   : > { %1676 = vst.msk [vmem:[%s2756_s21 + $0x38] sm:$0xf] %vm1661_vm1, %v1940_v31  ;;  %v1941_v44 = vpack.c.bf16 %v1516_v55, %v1516_v55 }
 0x179   : > { %1674 = vst.msk [vmem:[%s2756_s21 + $0x30] sm:$0xf] %vm1661_vm1, %v1938_v48  ;;  %v1939_v17 = vpack.c.bf16 %v1514_v61, %v1514_v61  ;;  %v2158_v29 = vpop.f32.mrb[64].mxu1  ;;  %v2228_v41 = vpop.f32.mrb[64].mxu0 }
 0x17a   : > { %1677 = vst.msk [vmem:[%s2756_s21 + $0x3c] sm:$0xf] %vm1661_vm1, %v1941_v44  ;;  %v1447_v42 = vadd.f32 %v2228_v41, %v2779_v25  ;;  %v2159_v30 = vpop.f32.mrb[65].mxu1  ;;  %v1438_v23 = vpop.f32.mrb[65].mxu0  ;;  %v1165_v44 = vadd.f32 %v2671_v16, %v2682_v38 }
 0x17b   : > { %1675 = vst.msk [vmem:[%s2756_s21 + $0x34] sm:$0xf] %vm1661_vm1, %v1939_v17  ;;  %v2160_v51 = vadd.f32 %v2159_v30, %v2158_v29  ;;  %v1439_v59 = vadd.f32 %v1438_v23, %v2759_v45  ;;  %v2161_v63 = vpop.f32.mrb[66].mxu1  ;;  %v2229_v5 = vpop.f32.mrb[66].mxu0  ;;  %v1168_v30 = vadd.f32 %v2673_v22, %v2682_v38 }
 0x17c   : > { %v1519_v32 = vmax.f32 %v1447_v42, 0.0  ;;  %v1450_v25 = vadd.f32 %v2229_v5, %v2781_v37  ;;  %v2162_v49 = vpop.f32.mrb[67].mxu1  ;;  %v1441_v57 = vpop.f32.mrb[67].mxu0 }
 0x17d   : > { %v1517_v58 = vmax.f32 %v1439_v59, 0.0  ;;  %v2163_v56 = vadd.f32 %v2162_v49, %v2161_v63  ;;  %v1442_v43 = vadd.f32 %v1441_v57, %v2761_v53  ;;  %v1310_v60 = vadd.f32 %v2160_v51, %v1149_v7 }
 0x17e   : > { %v1944_v3 = vpack.c.bf16 %v1519_v32, %v1519_v32  ;;  %v1520_v45 = vmax.f32 %v1450_v25, 0.0 }
 0x17f   : > { %v1942_v52 = vpack.c.bf16 %v1517_v58, %v1517_v58  ;;  %v1518_v0 = vmax.f32 %v1442_v43, 0.0  ;;  %v1313_v1 = vadd.f32 %v2163_v56, %v1152_v8 }
 0x180   : > { %1680 = vst.msk [vmem:[%s2756_s21 + $0x48] sm:$0xf] %vm1661_vm1, %v1944_v3  ;;  %v1945_v62 = vpack.c.bf16 %v1520_v45, %v1520_v45 }
 0x181   : > { %1678 = vst.msk [vmem:[%s2756_s21 + $0x40] sm:$0xf] %vm1661_vm1, %v1942_v52  ;;  %v1943_v37 = vpack.c.bf16 %v1518_v0, %v1518_v0  ;;  %v2164_v54 = vpop.f32.mrb[68].mxu1  ;;  %v2232_v33 = vpop.f32.mrb[68].mxu0  ;;  %v1173_v52 = vadd.f32 %v2675_v28, %v2682_v38 }
 0x182   : > { %1681 = vst.msk [vmem:[%s2756_s21 + $0x4c] sm:$0xf] %vm1661_vm1, %v1945_v62  ;;  %v1463_v12 = vadd.f32 %v2232_v33, %v1302_v18  ;;  %v2165_v26 = vpop.f32.mrb[69].mxu1  ;;  %v1454_v53 = vpop.f32.mrb[69].mxu0 }
 0x183   : > { %1679 = vst.msk [vmem:[%s2756_s21 + $0x44] sm:$0xf] %vm1661_vm1, %v1943_v37  ;;  %v2166_v13 = vadd.f32 %v2165_v26, %v2164_v54  ;;  %v1455_v14 = vadd.f32 %v1454_v53, %v2799_v19  ;;  %v2167_v6 = vpop.f32.mrb[70].mxu1  ;;  %v2233_v21 = vpop.f32.mrb[70].mxu0  ;;  %v1176_v54 = vadd.f32 %v2677_v34, %v2682_v38 }
 0x184   : > { %v1523_v24 = vmax.f32 %v1463_v12, 0.0  ;;  %v1466_v40 = vadd.f32 %v2233_v21, %v1305_v39  ;;  %v2168_v11 = vpop.f32.mrb[71].mxu1  ;;  %v1457_v20 = vpop.f32.mrb[71].mxu0 }
 0x185   : > { %v1521_v15 = vmax.f32 %v1455_v14, 0.0  ;;  %v2169_v50 = vadd.f32 %v2168_v11, %v2167_v6  ;;  %v1458_v4 = vadd.f32 %v1457_v20, %v2801_v35  ;;  %v1318_v27 = vadd.f32 %v2166_v13, %v1157_v9 }
 0x186   : > { %v1948_v36 = vpack.c.bf16 %v1523_v24, %v1523_v24  ;;  %v1524_v19 = vmax.f32 %v1466_v40, 0.0 }
 0x187   : > { %v1946_v2 = vpack.c.bf16 %v1521_v15, %v1521_v15  ;;  %v1522_v46 = vmax.f32 %v1458_v4, 0.0  ;;  %v1321_v18 = vadd.f32 %v2169_v50, %v1160_v47 }
 0x188   : > { %1684 = vst.msk [vmem:[%s2756_s21 + $0x58] sm:$0xf] %vm1661_vm1, %v1948_v36  ;;  %v1949_v10 = vpack.c.bf16 %v1524_v19, %v1524_v19 }
 0x189   : > { %1682 = vst.msk [vmem:[%s2756_s21 + $0x50] sm:$0xf] %vm1661_vm1, %v1946_v2  ;;  %v1947_v31 = vpack.c.bf16 %v1522_v46, %v1522_v46  ;;  %v2170_v55 = vpop.f32.mrb[72].mxu1  ;;  %v2236_v48 = vpop.f32.mrb[72].mxu0 }
 0x18a   : > { %1685 = vst.msk [vmem:[%s2756_s21 + $0x5c] sm:$0xf] %vm1661_vm1, %v1949_v10  ;;  %v1479_v61 = vadd.f32 %v2236_v48, %v1318_v27  ;;  %v2171_v39 = vpop.f32.mrb[73].mxu1  ;;  %v1470_v35 = vpop.f32.mrb[73].mxu0 }
 0x18b   : > { %1683 = vst.msk [vmem:[%s2756_s21 + $0x54] sm:$0xf] %vm1661_vm1, %v1947_v31  ;;  %v2172_v17 = vadd.f32 %v2171_v39, %v2170_v55  ;;  %v1471_v29 = vadd.f32 %v1470_v35, %v1310_v60  ;;  %v2173_v41 = vpop.f32.mrb[74].mxu1  ;;  %v2237_v42 = vpop.f32.mrb[74].mxu0 }
 0x18c   : > { %v1527_v23 = vmax.f32 %v1479_v61, 0.0  ;;  %v1482_v7 = vadd.f32 %v2237_v42, %v1321_v18  ;;  %v2174_v51 = vpop.f32.mrb[75].mxu1  ;;  %v1473_v59 = vpop.f32.mrb[75].mxu0 }
 0x18d   : > { %v1525_v63 = vmax.f32 %v1471_v29, 0.0  ;;  %v2175_v5 = vadd.f32 %v2174_v51, %v2173_v41  ;;  %v1474_v8 = vadd.f32 %v1473_v59, %v1313_v1  ;;  %v1326_v16 = vadd.f32 %v2172_v17, %v1165_v44 }
 0x18e   : > { %v1952_v32 = vpack.c.bf16 %v1527_v23, %v1527_v23  ;;  %v1528_v25 = vmax.f32 %v1482_v7, 0.0 }
 0x18f   : > { %v1950_v49 = vpack.c.bf16 %v1525_v63, %v1525_v63  ;;  %v1526_v57 = vmax.f32 %v1474_v8, 0.0  ;;  %v1329_v58 = vadd.f32 %v2175_v5, %v1168_v30 }
 0x190   : > { %1688 = vst.msk [vmem:[%s2756_s21 + $0x68] sm:$0xf] %vm1661_vm1, %v1952_v32  ;;  %v1953_v56 = vpack.c.bf16 %v1528_v25, %v1528_v25 }
 0x191   : > { %1686 = vst.msk [vmem:[%s2756_s21 + $0x60] sm:$0xf] %vm1661_vm1, %v1950_v49  ;;  %v1951_v22 = vpack.c.bf16 %v1526_v57, %v1526_v57  ;;  %v2176_v43 = vpop.f32.mrb[76].mxu1  ;;  %v2240_v60 = vpop.f32.mrb[76].mxu0 }
 0x192   : > { %1689 = vst.msk [vmem:[%s2756_s21 + $0x6c] sm:$0xf] %vm1661_vm1, %v1953_v56  ;;  %v2177_v3 = vpop.f32.mrb[77].mxu1  ;;  %v1486_v45 = vpop.f32.mrb[77].mxu0 }
 0x193   : > { %1687 = vst.msk [vmem:[%s2756_s21 + $0x64] sm:$0xf] %vm1661_vm1, %v1951_v22  ;;  %v2178_v0 = vadd.f32 %v2177_v3, %v2176_v43  ;;  %v1487_v1 = vadd.f32 %v1486_v45, %v1326_v16  ;;  %v2179_v62 = vpop.f32.mrb[78].mxu1  ;;  %v2241_v37 = vpop.f32.mrb[78].mxu0 }
 0x194   : > { %v2180_v33 = vpop.f32.mrb[79].mxu1  ;;  %v1489_v12 = vpop.f32.mrb[79].mxu0 }
 0x195   : > { %v1334_v26 = vadd.f32 %v2178_v0, %v1173_v52  ;;  %v1529_v53 = vmax.f32 %v1487_v1, 0.0  ;;  %v2181_v9 = vadd.f32 %v2180_v33, %v2179_v62  ;;  %v1490_v13 = vadd.f32 %v1489_v12, %v1329_v58 }
 0x197   : > { %v1495_v28 = vadd.f32 %v2240_v60, %v1334_v26  ;;  %v1954_v14 = vpack.c.bf16 %v1529_v53, %v1529_v53  ;;  %v1337_v6 = vadd.f32 %v2181_v9, %v1176_v54  ;;  %v1530_v21 = vmax.f32 %v1490_v13, 0.0 }
 0x199   : > { %v1531_v47 = vmax.f32 %v1495_v28, 0.0  ;;  %1690 = vst.msk [vmem:[%s2756_s21 + $0x70] sm:$0xf] %vm1661_vm1, %v1954_v14  ;;  %v1498_v24 = vadd.f32 %v2241_v37, %v1337_v6  ;;  %v1955_v40 = vpack.c.bf16 %v1530_v21, %v1530_v21 }
 0x19b   : > { %v1956_v11 = vpack.c.bf16 %v1531_v47, %v1531_v47  ;;  %v1532_v34 = vmax.f32 %v1498_v24, 0.0  ;;  %1691 = vst.msk [vmem:[%s2756_s21 + $0x74] sm:$0xf] %vm1661_vm1, %v1955_v40 }
 0x19d   : > { %1692 = vst.msk [vmem:[%s2756_s21 + $0x78] sm:$0xf] %vm1661_vm1, %v1956_v11  ;;  %v1957_v38 = vpack.c.bf16 %v1532_v34, %v1532_v34 }
 0x19f   : > { %1693 = vst.msk [vmem:[%s2756_s21 + $0x7c] sm:$0xf] %vm1661_vm1, %v1957_v38 }
 0x1a0 PF: > { %s13_s12 = sadd.s32 1, %s2421_s12  }
 0x1a1   : > { %p10_p4 = scmp.ge.s32.totalorder %s13_s12, 4  }
 0x1a3   :  { %12 = sbr.rel (!%p10_p4) target bundleno = 1 (0x1), region = 62 }

// kernel: _lambda_.7
= control target key start
LH: loop header
LB: loop body
LE: loop exit
PB: predicated region body
PF: predicated region fallthrough
CT: control target
= control target key end

     0   :  { %10 = vsyncpa [#allocation4], 0  ;;  %s6103_s18 = smov 0   ;;  %s6105_s19 = smov 0   ;;  %s6984_s0 = inlined_call_operand.vmem [shape: bf16[2,16384], index: 0, kind: input, shape index: {}]   ;;  %s6985_s1 = inlined_call_operand.vmem [shape: bf16[16384,512], index: 1, kind: input, shape index: {}]   ;;  %s6986_s2 = inlined_call_operand.vmem [shape: f32[1,512], index: 2, kind: input, shape index: {}]   ;;  %s6987_s3 = inlined_call_operand.vmem [shape: f32[512,128], index: 3, kind: input, shape index: {}]   ;;  %s6988_s4 = inlined_call_operand.vmem [shape: f32[1,128], index: 4, kind: input, shape index: {}]   ;;  %s6989_s5 = inlined_call_operand.hbm [shape: f32[2,128], index: 5, kind: output, shape index: {}]  }
   0x1   :  { %s6107_s20 = smov 0  }
   0x2 LB: > { %s4493_s21 = sadd.s32 4294967295, %s6067_s20   ;;  %s25_s22 = sadd.s32 1, %s6063_s19  ;;  %s6067_s20 = sphi %s6107_s20, %s16_s20   ;;  %s6063_s19 = sphi %s6105_s19, %s6992_s19   ;;  %s6059_s18 = sphi %s6103_s18, %s6991_s18  }
   0x3   : > { %p26_p0 = scmp.ge.s32.totalorder %s25_s22, 8  ;;  %p4496_p1 = scmp.ge.s32.totalorder %s6067_s20, 1 }
   0x4   : > { %p218_p2 = scmp.lt.s32.totalorder %s6067_s20, 9 }
   0x5   : > { %s6994_s22 = smov (%p26_p0, %s25_s22), 0 }
   0x6   : > { %p219_p3 = pnand %p4496_p1, %p218_p2 }
   0x7   : > { %s4497_s23 = sshll.u32 (!%p219_p3), %s6059_s18, 4  ;;  %s4498_s24 = sshll.u32 (!%p219_p3), %s6059_s18, 8 }
   0x8   : > { %222 = sbr.rel (%p219_p3) target bundleno = 1020 (0x3fc), region = 40  ;;  %p253_p4 = scmp.lt.s32.totalorder (!%p219_p3), %s4497_s23, 127 }
   0x9   : > { %p260_p5 = scmp.lt.s32.totalorder (!%p219_p3), %s4498_s24, 2047  ;;  %p4501_p6 = scmp.ne.s32.totalorder (!%p219_p3), %s6059_s18, 0 }
   0xf   : > { %s6996_s23 = smov (!%p253_p4, %s4497_s23), 127  ;;  %s6998_s24 = smov (!%p260_p5, %s4498_s24), 2047 }
  0x10   : > { %s6129_s27 = scalar_lea.vmem %s6984_s0, %s6996_s23  ;;  %s5020_s28 = sshll.u32 %s6998_s24, 4  ;;  %v6069_v0 = vmov (!%p4501_p6), 0.0  }
  0x11   : > { %s6134_s6 = scalar_lea.vmem %s6985_s1, %s5020_s28  ;;  %269 = sbr.rel (%p4501_p6) target bundleno = 24 (0x18), region = 44  ;;  %270 = vst [vmem:[#allocation2] sm:$0xff] (!%p4501_p6), %v6069_v0 }
  0x18 PF: > { %v5245_v1 = vld [vmem:[%s6134_s6 + $0x4] ss:$16 sps:$4 sm:$0xff]   ;;  %v5247_v2 = vld [vmem:[%s6134_s6 + $0xc] ss:$16 sps:$4 sm:$0xff]   ;;  %v5249_v3 = vld [vmem:[%s6134_s6] ss:$16 sps:$4 sm:$0xff]   ;;  %v792_v39 = vlaneseq }
  0x19   : > { %3462 = vmatprep.subr.bf16.mxu0 %v5245_v1  ;;  %v5250_v4 = vld [vmem:[%s6134_s6 + $0x8] ss:$16 sps:$4 sm:$0xff]   ;;  %3790 = vmatprep.subr.bf16.mxu1 %v5247_v2  ;;  %v5251_v5 = vld [vmem:[%s6134_s6 + $0x24] ss:$16 sps:$4 sm:$0xff]   ;;  %v5253_v6 = vld [vmem:[%s6134_s6 + $0x2c] ss:$16 sps:$4 sm:$0xff]  }
  0x1a   : > { %3463 = vmatpush1.bf16.msra.mxu0 %v5249_v3  ;;  %3791 = vmatpush1.bf16.msra.mxu1 %v5250_v4  ;;  %v5255_v7 = vld [vmem:[%s6134_s6 + $0x20] ss:$16 sps:$4 sm:$0xff]   ;;  %v5256_v8 = vld [vmem:[%s6134_s6 + $0x28] ss:$16 sps:$4 sm:$0xff]   ;;  %v5257_v9 = vld [vmem:[%s6134_s6 + $0x44] ss:$16 sps:$4 sm:$0xff]  }
  0x1b   : > { %3464 = vmatprep.subr.bf16.mxu0 %v5251_v5  ;;  %3792 = vmatprep.subr.bf16.mxu1 %v5253_v6  ;;  %v5259_v10 = vld [vmem:[%s6134_s6 + $0x4c] ss:$16 sps:$4 sm:$0xff]   ;;  %v5261_v11 = vld [vmem:[%s6134_s6 + $0x40] ss:$16 sps:$4 sm:$0xff]   ;;  %v5262_v12 = vld [vmem:[%s6134_s6 + $0x48] ss:$16 sps:$4 sm:$0xff]  }
  0x1c   : > { %v5263_v13 = vld [vmem:[%s6134_s6 + $0x64] ss:$16 sps:$4 sm:$0xff]   ;;  %v5265_v14 = vld [vmem:[%s6134_s6 + $0x6c] ss:$16 sps:$4 sm:$0xff]   ;;  %v5267_v15 = vld [vmem:[%s6134_s6 + $0x60] ss:$16 sps:$4 sm:$0xff]  }
  0x1d   : > { %v5268_v16 = vld [vmem:[%s6134_s6 + $0x68] ss:$16 sps:$4 sm:$0xff]   ;;  %v5269_v17 = vld [vmem:[%s6134_s6 + $0x84] ss:$16 sps:$4 sm:$0xff]   ;;  %v5271_v18 = vld [vmem:[%s6134_s6 + $0x8c] ss:$16 sps:$4 sm:$0xff]  }
  0x1e   : > { %3465 = vmatpush1.bf16.msra.mxu0 %v5255_v7  ;;  %3793 = vmatpush1.bf16.msra.mxu1 %v5256_v8  ;;  %v5273_v19 = vld [vmem:[%s6134_s6 + $0x80] ss:$16 sps:$4 sm:$0xff]   ;;  %v5274_v20 = vld [vmem:[%s6134_s6 + $0x88] ss:$16 sps:$4 sm:$0xff]   ;;  %v5275_v21 = vld [vmem:[%s6134_s6 + $0xa4] ss:$16 sps:$4 sm:$0xff]  }
  0x1f   : > { %3466 = vmatprep.subr.bf16.mxu0 %v5257_v9  ;;  %3794 = vmatprep.subr.bf16.mxu1 %v5259_v10  ;;  %v5277_v22 = vld [vmem:[%s6134_s6 + $0xac] ss:$16 sps:$4 sm:$0xff]   ;;  %v5279_v23 = vld [vmem:[%s6134_s6 + $0xa0] ss:$16 sps:$4 sm:$0xff]   ;;  %v5280_v24 = vld [vmem:[%s6134_s6 + $0xa8] ss:$16 sps:$4 sm:$0xff]  }
  0x20   : > { %v5281_v25 = vld [vmem:[%s6134_s6 + $0xc4] ss:$16 sps:$4 sm:$0xff]   ;;  %v5283_v26 = vld [vmem:[%s6134_s6 + $0xcc] ss:$16 sps:$4 sm:$0xff]   ;;  %v5285_v27 = vld [vmem:[%s6134_s6 + $0xc0] ss:$16 sps:$4 sm:$0xff]  }
  0x21   : > { %v5286_v28 = vld [vmem:[%s6134_s6 + $0xc8] ss:$16 sps:$4 sm:$0xff]   ;;  %v5287_v29 = vld [vmem:[%s6134_s6 + $0xe4] ss:$16 sps:$4 sm:$0xff]   ;;  %v5289_v30 = vld [vmem:[%s6134_s6 + $0xec] ss:$16 sps:$4 sm:$0xff]  }
  0x22   : > { %3467 = vmatpush1.bf16.msra.mxu0 %v5261_v11  ;;  %3795 = vmatpush1.bf16.msra.mxu1 %v5262_v12  ;;  %v5291_v31 = vld [vmem:[%s6134_s6 + $0xe0] ss:$16 sps:$4 sm:$0xff]   ;;  %v5292_v32 = vld [vmem:[%s6134_s6 + $0xe8] ss:$16 sps:$4 sm:$0xff]   ;;  %v5293_v33 = vld [vmem:[%s6134_s6 + $0x104] ss:$16 sps:$4 sm:$0xff]  }
  0x23   : > { %3468 = vmatprep.subr.bf16.mxu0 %v5263_v13  ;;  %3796 = vmatprep.subr.bf16.mxu1 %v5265_v14  ;;  %v5295_v34 = vld [vmem:[%s6134_s6 + $0x10c] ss:$16 sps:$4 sm:$0xff]   ;;  %v5297_v35 = vld [vmem:[%s6134_s6 + $0x100] ss:$16 sps:$4 sm:$0xff]   ;;  %v5298_v36 = vld [vmem:[%s6134_s6 + $0x108] ss:$16 sps:$4 sm:$0xff]  }
  0x24   : > { %v6070_v37 = vmov 1966171168   ;;  %v5299_v40 = vld [vmem:[%s6134_s6 + $0x124] ss:$16 sps:$4 sm:$0xff]   ;;  %v5301_v41 = vld [vmem:[%s6134_s6 + $0x12c] ss:$16 sps:$4 sm:$0xff]  }
  0x25   : > { %v790_v38 = vunpack.c.l.s4 %v6070_v37  ;;  %v5303_v42 = vld [vmem:[%s6134_s6 + $0x120] ss:$16 sps:$4 sm:$0xff]   ;;  %v6176_v44 = vshrl.u32 %v792_v39, 7  ;;  %v5304_v45 = vld [vmem:[%s6134_s6 + $0x128] ss:$16 sps:$4 sm:$0xff]   ;;  %p5014_p7 = scmp.ne.s32.totalorder %s6059_s18, 7 }
  0x26   : > { %3469 = vmatpush1.bf16.msra.mxu0 %v5267_v15  ;;  %3797 = vmatpush1.bf16.msra.mxu1 %v5268_v16  ;;  %v5305_v46 = vld [vmem:[%s6134_s6 + $0x144] ss:$16 sps:$4 sm:$0xff]   ;;  %v5307_v47 = vld [vmem:[%s6134_s6 + $0x14c] ss:$16 sps:$4 sm:$0xff]   ;;  %v5309_v48 = vld [vmem:[%s6134_s6 + $0x140] ss:$16 sps:$4 sm:$0xff]  }
  0x27   : > { %3470 = vmatprep.subr.bf16.mxu0 %v5269_v17  ;;  %3798 = vmatprep.subr.bf16.mxu1 %v5271_v18  ;;  %v791_v43 = vunpack.c.0.s8 %v790_v38  ;;  %v5310_v49 = vld [vmem:[%s6134_s6 + $0x148] ss:$16 sps:$4 sm:$0xff]   ;;  %v5311_v51 = vld [vmem:[%s6134_s6 + $0x164] ss:$16 sps:$4 sm:$0xff]   ;;  %v5313_v52 = vld [vmem:[%s6134_s6 + $0x16c] ss:$16 sps:$4 sm:$0xff]  }
  0x28   : > { %v6189_v53 = vld [vmem:[%s6129_s27] sm:$0xff]  ;;  %v5316_v56 = vld [vmem:[%s6134_s6 + $0x168] ss:$16 sps:$4 sm:$0xff]   ;;  %v5319_v58 = vld [vmem:[%s6134_s6 + $0x18c] ss:$16 sps:$4 sm:$0xff]  }
  0x29   : > { %v6184_v50 = vsub.s32 %v791_v43, %v6176_v44  ;;  %v5315_v54 = vld [vmem:[%s6134_s6 + $0x160] ss:$16 sps:$4 sm:$0xff]   ;;  %v5317_v57 = vld [vmem:[%s6134_s6 + $0x184] ss:$16 sps:$4 sm:$0xff]   ;;  %v5322_v62 = vld [vmem:[%s6134_s6 + $0x188] ss:$16 sps:$4 sm:$0xff]  }
  0x2a   : > { %3471 = vmatpush1.bf16.msra.mxu0 %v5273_v19  ;;  %3799 = vmatpush1.bf16.msra.mxu1 %v5274_v20  ;;  %v5321_v60 = vld [vmem:[%s6134_s6 + $0x180] ss:$16 sps:$4 sm:$0xff]   ;;  %v5323_v63 = vld [vmem:[%s6134_s6 + $0x1a4] ss:$16 sps:$4 sm:$0xff]   ;;  %v5325_v0 = vld [vmem:[%s6134_s6 + $0x1ac] ss:$16 sps:$4 sm:$0xff]  }
  0x2b   : > { %3472 = vmatprep.subr.bf16.mxu0 %v5275_v21  ;;  %3800 = vmatprep.subr.bf16.mxu1 %v5277_v22  ;;  %v795_v55 = vrot.slane %v6189_v53, %v6184_v50  ;;  %v5327_v1 = vld [vmem:[%s6134_s6 + $0x1a0] ss:$16 sps:$4 sm:$0xff]   ;;  %v5328_v2 = vld [vmem:[%s6134_s6 + $0x1a8] ss:$16 sps:$4 sm:$0xff]   ;;  %v5329_v3 = vld [vmem:[%s6134_s6 + $0x1c4] ss:$16 sps:$4 sm:$0xff]  }
  0x2c   : > { %v5331_v4 = vld [vmem:[%s6134_s6 + $0x1cc] ss:$16 sps:$4 sm:$0xff]   ;;  %v5333_v5 = vld [vmem:[%s6134_s6 + $0x1c0] ss:$16 sps:$4 sm:$0xff]   ;;  %v5334_v6 = vld [vmem:[%s6134_s6 + $0x1c8] ss:$16 sps:$4 sm:$0xff]  }
  0x2d   : > { %v803_v59 = vcombine.high %v795_v55, %v795_v55  ;;  %v5335_v7 = vld [vmem:[%s6134_s6 + $0x1e4] ss:$16 sps:$4 sm:$0xff]   ;;  %v5337_v8 = vld [vmem:[%s6134_s6 + $0x1ec] ss:$16 sps:$4 sm:$0xff]   ;;  %v5339_v9 = vld [vmem:[%s6134_s6 + $0x1e0] ss:$16 sps:$4 sm:$0xff]   ;;  %v6216_v14 = vrot.slane %v795_v55, %v6184_v50 }
  0x2e   : > { %3473 = vmatpush1.bf16.msra.mxu0 %v5279_v23  ;;  %3801 = vmatpush1.bf16.msra.mxu1 %v5280_v24  ;;  %v5340_v10 = vld [vmem:[%s6134_s6 + $0x1e8] ss:$16 sps:$4 sm:$0xff]   ;;  %v5343_v11 = vld [vmem:[%s6134_s6 + $0x204] ss:$16 sps:$4 sm:$0xff]   ;;  %v5346_v12 = vld [vmem:[%s6134_s6 + $0x20c] ss:$16 sps:$4 sm:$0xff]  }
  0x2f   : > { %3474 = vmatprep.subr.bf16.mxu0 %v5281_v25  ;;  %3802 = vmatprep.subr.bf16.mxu1 %v5283_v26  ;;  %v825_v61 = vrot.slane %v803_v59, %v6184_v50  ;;  %v5341_v13 = vld [vmem:[%s6134_s6 + $0x200] ss:$16 sps:$4 sm:$0xff]   ;;  %v5344_v15 = vld [vmem:[%s6134_s6 + $0x208] ss:$16 sps:$4 sm:$0xff]   ;;  %v5349_v16 = vld [vmem:[%s6134_s6 + $0x224] ss:$16 sps:$4 sm:$0xff]  }
  0x30   : > { %v5352_v17 = vld [vmem:[%s6134_s6 + $0x22c] ss:$16 sps:$4 sm:$0xff]   ;;  %v5347_v19 = vld [vmem:[%s6134_s6 + $0x220] ss:$16 sps:$4 sm:$0xff]   ;;  %v5350_v20 = vld [vmem:[%s6134_s6 + $0x228] ss:$16 sps:$4 sm:$0xff]  }
  0x31   : > { %3494 = vmatprep.mubr.bf16.mxu0 %v825_v61  ;;  %3822 = vmatprep.mubr.bf16.mxu1 %v825_v61  ;;  %v835_v18 = vcombine.high %v825_v61, %v825_v61  ;;  %v5355_v21 = vld [vmem:[%s6134_s6 + $0x244] ss:$16 sps:$4 sm:$0xff]   ;;  %v5358_v22 = vld [vmem:[%s6134_s6 + $0x24c] ss:$16 sps:$4 sm:$0xff]   ;;  %v5353_v23 = vld [vmem:[%s6134_s6 + $0x240] ss:$16 sps:$4 sm:$0xff]  }
  0x32   : > { %3475 = vmatpush1.bf16.msra.mxu0 %v5285_v27  ;;  %3803 = vmatpush1.bf16.msra.mxu1 %v5286_v28  ;;  %v5356_v24 = vld [vmem:[%s6134_s6 + $0x248] ss:$16 sps:$4 sm:$0xff]   ;;  %v5361_v25 = vld [vmem:[%s6134_s6 + $0x264] ss:$16 sps:$4 sm:$0xff]   ;;  %v5364_v26 = vld [vmem:[%s6134_s6 + $0x26c] ss:$16 sps:$4 sm:$0xff]  }
  0x33   : > { %3476 = vmatprep.subr.bf16.mxu0 %v5287_v29  ;;  %3804 = vmatprep.subr.bf16.mxu1 %v5289_v30  ;;  %v5359_v27 = vld [vmem:[%s6134_s6 + $0x260] ss:$16 sps:$4 sm:$0xff]   ;;  %v5362_v28 = vld [vmem:[%s6134_s6 + $0x268] ss:$16 sps:$4 sm:$0xff]   ;;  %v5367_v29 = vld [vmem:[%s6134_s6 + $0x284] ss:$16 sps:$4 sm:$0xff]  }
  0x34   : > { %v5370_v30 = vld [vmem:[%s6134_s6 + $0x28c] ss:$16 sps:$4 sm:$0xff]   ;;  %v5379_v37 = vld [vmem:[%s6134_s6 + $0x2c4] ss:$16 sps:$4 sm:$0xff]   ;;  %v5377_v39 = vld [vmem:[%s6134_s6 + $0x2c0] ss:$16 sps:$4 sm:$0xff]  }
  0x35   : > { %v5382_v38 = vld [vmem:[%s6134_s6 + $0x2cc] ss:$16 sps:$4 sm:$0xff]   ;;  %v5383_v43 = vld [vmem:[%s6134_s6 + $0x2e0] ss:$16 sps:$4 sm:$0xff]   ;;  %v5398_v55 = vld [vmem:[%s6134_s6 + $0x328] ss:$16 sps:$4 sm:$0xff]  }
  0x36   : > { %3477 = vmatpush1.bf16.msra.mxu0 %v5291_v31  ;;  %3805 = vmatpush1.bf16.msra.mxu1 %v5292_v32  ;;  %v5365_v31 = vld [vmem:[%s6134_s6 + $0x280] ss:$16 sps:$4 sm:$0xff]   ;;  %v5368_v32 = vld [vmem:[%s6134_s6 + $0x288] ss:$16 sps:$4 sm:$0xff]   ;;  %v5412_v61 = vld [vmem:[%s6134_s6 + $0x36c] ss:$16 sps:$4 sm:$0xff]  }
  0x37   : > { %3478 = vmatprep.subr.bf16.mxu0 %v5293_v33  ;;  %3806 = vmatprep.subr.bf16.mxu1 %v5295_v34  ;;  %v5373_v33 = vld [vmem:[%s6134_s6 + $0x2a4] ss:$16 sps:$4 sm:$0xff]   ;;  %v5376_v34 = vld [vmem:[%s6134_s6 + $0x2ac] ss:$16 sps:$4 sm:$0xff]   ;;  %v5404_v59 = vld [vmem:[%s6134_s6 + $0x348] ss:$16 sps:$4 sm:$0xff]  }
  0x3a   : > { %3479 = vmatpush1.bf16.msra.mxu0 %v5297_v35  ;;  %3807 = vmatpush1.bf16.msra.mxu1 %v5298_v36  ;;  %v5371_v35 = vld [vmem:[%s6134_s6 + $0x2a0] ss:$16 sps:$4 sm:$0xff]   ;;  %v5374_v36 = vld [vmem:[%s6134_s6 + $0x2a8] ss:$16 sps:$4 sm:$0xff]  }
  0x3b   : > { %3480 = vmatprep.subr.bf16.mxu0 %v5299_v40  ;;  %3808 = vmatprep.subr.bf16.mxu1 %v5301_v41  ;;  %v5380_v40 = vld [vmem:[%s6134_s6 + $0x2c8] ss:$16 sps:$4 sm:$0xff]   ;;  %v5385_v41 = vld [vmem:[%s6134_s6 + $0x2e4] ss:$16 sps:$4 sm:$0xff]  }
  0x3e   : > { %3481 = vmatpush1.bf16.msra.mxu0 %v5303_v42  ;;  %3809 = vmatpush1.bf16.msra.mxu1 %v5304_v45  ;;  %v5388_v42 = vld [vmem:[%s6134_s6 + $0x2ec] ss:$16 sps:$4 sm:$0xff]   ;;  %v5386_v45 = vld [vmem:[%s6134_s6 + $0x2e8] ss:$16 sps:$4 sm:$0xff]  }
  0x3f   : > { %3482 = vmatprep.subr.bf16.mxu0 %v5305_v46  ;;  %3810 = vmatprep.subr.bf16.mxu1 %v5307_v47  ;;  %v5391_v46 = vld [vmem:[%s6134_s6 + $0x304] ss:$16 sps:$4 sm:$0xff]   ;;  %v5394_v47 = vld [vmem:[%s6134_s6 + $0x30c] ss:$16 sps:$4 sm:$0xff]  }
  0x42   : > { %3483 = vmatpush1.bf16.msra.mxu0 %v5309_v48  ;;  %3811 = vmatpush1.bf16.msra.mxu1 %v5310_v49  ;;  %v5389_v48 = vld [vmem:[%s6134_s6 + $0x300] ss:$16 sps:$4 sm:$0xff]   ;;  %v5392_v49 = vld [vmem:[%s6134_s6 + $0x308] ss:$16 sps:$4 sm:$0xff]  }
  0x43   : > { %3484 = vmatprep.subr.bf16.mxu0 %v5311_v51  ;;  %3812 = vmatprep.subr.bf16.mxu1 %v5313_v52  ;;  %v5397_v51 = vld [vmem:[%s6134_s6 + $0x324] ss:$16 sps:$4 sm:$0xff]   ;;  %v5400_v52 = vld [vmem:[%s6134_s6 + $0x32c] ss:$16 sps:$4 sm:$0xff]  }
  0x46   : > { %3485 = vmatpush1.bf16.msra.mxu0 %v5315_v54  ;;  %3813 = vmatpush1.bf16.msra.mxu1 %v5316_v56  ;;  %v5395_v54 = vld [vmem:[%s6134_s6 + $0x320] ss:$16 sps:$4 sm:$0xff]   ;;  %v5403_v56 = vld [vmem:[%s6134_s6 + $0x344] ss:$16 sps:$4 sm:$0xff]  }
  0x47   : > { %3486 = vmatprep.subr.bf16.mxu0 %v5317_v57  ;;  %3814 = vmatprep.subr.bf16.mxu1 %v5319_v58  ;;  %v5406_v57 = vld [vmem:[%s6134_s6 + $0x34c] ss:$16 sps:$4 sm:$0xff]   ;;  %v5401_v58 = vld [vmem:[%s6134_s6 + $0x340] ss:$16 sps:$4 sm:$0xff]  }
  0x4a   : > { %3487 = vmatpush1.bf16.msra.mxu0 %v5321_v60  ;;  %3815 = vmatpush1.bf16.msra.mxu1 %v5322_v62  ;;  %v5409_v60 = vld [vmem:[%s6134_s6 + $0x364] ss:$16 sps:$4 sm:$0xff]   ;;  %v5407_v62 = vld [vmem:[%s6134_s6 + $0x360] ss:$16 sps:$4 sm:$0xff]  }
  0x4b   : > { %3488 = vmatprep.subr.bf16.mxu0 %v5323_v63  ;;  %3816 = vmatprep.subr.bf16.mxu1 %v5325_v0  ;;  %v5410_v63 = vld [vmem:[%s6134_s6 + $0x368] ss:$16 sps:$4 sm:$0xff]   ;;  %v5415_v0 = vld [vmem:[%s6134_s6 + $0x384] ss:$16 sps:$4 sm:$0xff]  }
  0x4e   : > { %3489 = vmatpush1.bf16.msra.mxu0 %v5327_v1  ;;  %3817 = vmatpush1.bf16.msra.mxu1 %v5328_v2  ;;  %v5418_v1 = vld [vmem:[%s6134_s6 + $0x38c] ss:$16 sps:$4 sm:$0xff]   ;;  %v5413_v2 = vld [vmem:[%s6134_s6 + $0x380] ss:$16 sps:$4 sm:$0xff]  }
  0x4f   : > { %3490 = vmatprep.subr.bf16.mxu0 %v5329_v3  ;;  %3818 = vmatprep.subr.bf16.mxu1 %v5331_v4  ;;  %v5416_v3 = vld [vmem:[%s6134_s6 + $0x388] ss:$16 sps:$4 sm:$0xff]   ;;  %v5421_v4 = vld [vmem:[%s6134_s6 + $0x3a4] ss:$16 sps:$4 sm:$0xff]  }
  0x52   : > { %3491 = vmatpush1.bf16.msra.mxu0 %v5333_v5  ;;  %3819 = vmatpush1.bf16.msra.mxu1 %v5334_v6  ;;  %v5424_v5 = vld [vmem:[%s6134_s6 + $0x3ac] ss:$16 sps:$4 sm:$0xff]   ;;  %v5419_v6 = vld [vmem:[%s6134_s6 + $0x3a0] ss:$16 sps:$4 sm:$0xff]  }
  0x53   : > { %3492 = vmatprep.subr.bf16.mxu0 %v5335_v7  ;;  %3820 = vmatprep.subr.bf16.mxu1 %v5337_v8  ;;  %v5422_v7 = vld [vmem:[%s6134_s6 + $0x3a8] ss:$16 sps:$4 sm:$0xff]   ;;  %v5427_v8 = vld [vmem:[%s6134_s6 + $0x3c4] ss:$16 sps:$4 sm:$0xff]  }
  0x56   : > { %3493 = vmatpush1.bf16.msra.mxu0 %v5339_v9  ;;  %3821 = vmatpush1.bf16.msra.mxu1 %v5340_v10  ;;  %v5430_v9 = vld [vmem:[%s6134_s6 + $0x3cc] ss:$16 sps:$4 sm:$0xff]   ;;  %v788_v10 = vcombine.high %v6189_v53, %v6189_v53  ;;  %v5434_v53 = vld [vmem:[%s6134_s6 + $0x3e8] ss:$16 sps:$4 sm:$0xff]  }
  0x57   : > { %3503 = vmatprep.subr.bf16.mxu0 %v5343_v11  ;;  %3831 = vmatprep.subr.bf16.mxu1 %v5346_v12  ;;  %v5425_v11 = vld [vmem:[%s6134_s6 + $0x3c0] ss:$16 sps:$4 sm:$0xff]   ;;  %v5428_v12 = vld [vmem:[%s6134_s6 + $0x3c8] ss:$16 sps:$4 sm:$0xff]  }
  0x59   : > { %3495 = vmatmul.mubr.bf16.vlgmr.msra.gmra.mrb[0].mxu0 %v6216_v14  ;;  %3823 = vmatmul.mubr.bf16.vlgmr.msra.gmra.mrb[0].mxu1 %v6216_v14 }
  0x5a   : > { %3504 = vmatpush1.bf16.msra.mxu0 %v5341_v13  ;;  %3832 = vmatpush1.bf16.msra.mxu1 %v5344_v15  ;;  %v5433_v13 = vld [vmem:[%s6134_s6 + $0x3e4] ss:$16 sps:$4 sm:$0xff]   ;;  %v5436_v15 = vld [vmem:[%s6134_s6 + $0x3ec] ss:$16 sps:$4 sm:$0xff]  }
  0x5b   : > { %3505 = vmatprep.subr.bf16.mxu0 %v5349_v16  ;;  %3833 = vmatprep.subr.bf16.mxu1 %v5352_v17  ;;  %v6282_v16 = vrot.slane %v788_v10, %v6184_v50  ;;  %v5431_v17 = vld [vmem:[%s6134_s6 + $0x3e0] ss:$16 sps:$4 sm:$0xff]   ;;  %v5512_v10 = vld [vmem:[%s6134_s6 + $0x588] ss:$16 sps:$4 sm:$0xff]  }
  0x5c   : > { %3535 = vmatprep.mubr.bf16.mxu0 %v835_v18  ;;  %3863 = vmatprep.mubr.bf16.mxu1 %v835_v18  ;;  %v5439_v18 = vld [vmem:[%s6134_s6 + $0x404] ss:$16 sps:$4 sm:$0xff]  }
  0x5e   : > { %3506 = vmatpush1.bf16.msra.mxu0 %v5347_v19  ;;  %3834 = vmatpush1.bf16.msra.mxu1 %v5350_v20  ;;  %v5442_v19 = vld [vmem:[%s6134_s6 + $0x40c] ss:$16 sps:$4 sm:$0xff]   ;;  %v804_v20 = vcombine.high %v6282_v16, %v6282_v16 }
  0x5f   : > { %3507 = vmatprep.subr.bf16.mxu0 %v5355_v21  ;;  %3835 = vmatprep.subr.bf16.mxu1 %v5358_v22  ;;  %v5437_v21 = vld [vmem:[%s6134_s6 + $0x400] ss:$16 sps:$4 sm:$0xff]   ;;  %v833_v22 = vcombine.high %v6216_v14, %v6216_v14  ;;  %v5446_v14 = vld [vmem:[%s6134_s6 + $0x428] ss:$16 sps:$4 sm:$0xff]  }
  0x62   : > { %3508 = vmatpush1.bf16.msra.mxu0 %v5353_v23  ;;  %3836 = vmatpush1.bf16.msra.mxu1 %v5356_v24  ;;  %v5440_v23 = vld [vmem:[%s6134_s6 + $0x408] ss:$16 sps:$4 sm:$0xff]   ;;  %v5445_v24 = vld [vmem:[%s6134_s6 + $0x424] ss:$16 sps:$4 sm:$0xff]  }
  0x63   : > { %3509 = vmatprep.subr.bf16.mxu0 %v5361_v25  ;;  %3837 = vmatprep.subr.bf16.mxu1 %v5364_v26  ;;  %v5448_v25 = vld [vmem:[%s6134_s6 + $0x42c] ss:$16 sps:$4 sm:$0xff]   ;;  %v6297_v26 = vrot.slane %v804_v20, %v6184_v50  ;;  %v5529_v20 = vld [vmem:[%s6134_s6 + $0x5e4] ss:$16 sps:$4 sm:$0xff]  }
  0x66   : > { %3510 = vmatpush1.bf16.msra.mxu0 %v5359_v27  ;;  %3838 = vmatpush1.bf16.msra.mxu1 %v5362_v28  ;;  %v5443_v27 = vld [vmem:[%s6134_s6 + $0x420] ss:$16 sps:$4 sm:$0xff]   ;;  %v5451_v28 = vld [vmem:[%s6134_s6 + $0x444] ss:$16 sps:$4 sm:$0xff]  }
  0x67   : > { %3511 = vmatprep.subr.bf16.mxu0 %v5367_v29  ;;  %3839 = vmatprep.subr.bf16.mxu1 %v5370_v30  ;;  %v5454_v29 = vld [vmem:[%s6134_s6 + $0x44c] ss:$16 sps:$4 sm:$0xff]   ;;  %v5449_v30 = vld [vmem:[%s6134_s6 + $0x440] ss:$16 sps:$4 sm:$0xff]  }
  0x6a   : > { %3512 = vmatpush1.bf16.msra.mxu0 %v5365_v31  ;;  %3840 = vmatpush1.bf16.msra.mxu1 %v5368_v32  ;;  %v5452_v31 = vld [vmem:[%s6134_s6 + $0x448] ss:$16 sps:$4 sm:$0xff]   ;;  %v5457_v32 = vld [vmem:[%s6134_s6 + $0x464] ss:$16 sps:$4 sm:$0xff]  }
  0x6b   : > { %3513 = vmatprep.subr.bf16.mxu0 %v5373_v33  ;;  %3841 = vmatprep.subr.bf16.mxu1 %v5376_v34  ;;  %v5460_v33 = vld [vmem:[%s6134_s6 + $0x46c] ss:$16 sps:$4 sm:$0xff]   ;;  %v5455_v34 = vld [vmem:[%s6134_s6 + $0x460] ss:$16 sps:$4 sm:$0xff]  }
  0x6e   : > { %3514 = vmatpush1.bf16.msra.mxu0 %v5371_v35  ;;  %3842 = vmatpush1.bf16.msra.mxu1 %v5374_v36  ;;  %v5458_v35 = vld [vmem:[%s6134_s6 + $0x468] ss:$16 sps:$4 sm:$0xff]   ;;  %v5463_v36 = vld [vmem:[%s6134_s6 + $0x484] ss:$16 sps:$4 sm:$0xff]  }
  0x6f   : > { %3515 = vmatprep.subr.bf16.mxu0 %v5379_v37  ;;  %3843 = vmatprep.subr.bf16.mxu1 %v5382_v38  ;;  %v5466_v37 = vld [vmem:[%s6134_s6 + $0x48c] ss:$16 sps:$4 sm:$0xff]   ;;  %v5461_v38 = vld [vmem:[%s6134_s6 + $0x480] ss:$16 sps:$4 sm:$0xff]  }
  0x72   : > { %3516 = vmatpush1.bf16.msra.mxu0 %v5377_v39  ;;  %3844 = vmatpush1.bf16.msra.mxu1 %v5380_v40  ;;  %v5464_v39 = vld [vmem:[%s6134_s6 + $0x488] ss:$16 sps:$4 sm:$0xff]   ;;  %v5469_v40 = vld [vmem:[%s6134_s6 + $0x4a4] ss:$16 sps:$4 sm:$0xff]  }
  0x73   : > { %3517 = vmatprep.subr.bf16.mxu0 %v5385_v41  ;;  %3845 = vmatprep.subr.bf16.mxu1 %v5388_v42  ;;  %v5472_v41 = vld [vmem:[%s6134_s6 + $0x4ac] ss:$16 sps:$4 sm:$0xff]   ;;  %v5467_v42 = vld [vmem:[%s6134_s6 + $0x4a0] ss:$16 sps:$4 sm:$0xff]  }
  0x76   : > { %3518 = vmatpush1.bf16.msra.mxu0 %v5383_v43  ;;  %3846 = vmatpush1.bf16.msra.mxu1 %v5386_v45  ;;  %v5470_v43 = vld [vmem:[%s6134_s6 + $0x4a8] ss:$16 sps:$4 sm:$0xff]   ;;  %v5475_v45 = vld [vmem:[%s6134_s6 + $0x4c4] ss:$16 sps:$4 sm:$0xff]  }
  0x77   : > { %3519 = vmatprep.subr.bf16.mxu0 %v5391_v46  ;;  %3847 = vmatprep.subr.bf16.mxu1 %v5394_v47  ;;  %v5478_v46 = vld [vmem:[%s6134_s6 + $0x4cc] ss:$16 sps:$4 sm:$0xff]   ;;  %v5473_v47 = vld [vmem:[%s6134_s6 + $0x4c0] ss:$16 sps:$4 sm:$0xff]  }
  0x7a   : > { %3520 = vmatpush1.bf16.msra.mxu0 %v5389_v48  ;;  %3848 = vmatpush1.bf16.msra.mxu1 %v5392_v49  ;;  %v5476_v48 = vld [vmem:[%s6134_s6 + $0x4c8] ss:$16 sps:$4 sm:$0xff]   ;;  %v5481_v49 = vld [vmem:[%s6134_s6 + $0x4e4] ss:$16 sps:$4 sm:$0xff]  }
  0x7b   : > { %3521 = vmatprep.subr.bf16.mxu0 %v5397_v51  ;;  %3849 = vmatprep.subr.bf16.mxu1 %v5400_v52  ;;  %v5484_v51 = vld [vmem:[%s6134_s6 + $0x4ec] ss:$16 sps:$4 sm:$0xff]   ;;  %v5479_v52 = vld [vmem:[%s6134_s6 + $0x4e0] ss:$16 sps:$4 sm:$0xff]  }
  0x7e   : > { %3522 = vmatpush1.bf16.msra.mxu0 %v5395_v54  ;;  %3850 = vmatpush1.bf16.msra.mxu1 %v5398_v55  ;;  %v5482_v54 = vld [vmem:[%s6134_s6 + $0x4e8] ss:$16 sps:$4 sm:$0xff]   ;;  %v5487_v55 = vld [vmem:[%s6134_s6 + $0x504] ss:$16 sps:$4 sm:$0xff]  }
  0x7f   : > { %3523 = vmatprep.subr.bf16.mxu0 %v5403_v56  ;;  %3851 = vmatprep.subr.bf16.mxu1 %v5406_v57  ;;  %v5490_v56 = vld [vmem:[%s6134_s6 + $0x50c] ss:$16 sps:$4 sm:$0xff]   ;;  %v5485_v57 = vld [vmem:[%s6134_s6 + $0x500] ss:$16 sps:$4 sm:$0xff]  }
  0x82   : > { %3524 = vmatpush1.bf16.msra.mxu0 %v5401_v58  ;;  %3852 = vmatpush1.bf16.msra.mxu1 %v5404_v59  ;;  %v5488_v58 = vld [vmem:[%s6134_s6 + $0x508] ss:$16 sps:$4 sm:$0xff]   ;;  %v5493_v59 = vld [vmem:[%s6134_s6 + $0x524] ss:$16 sps:$4 sm:$0xff]  }
  0x83   : > { %3525 = vmatprep.subr.bf16.mxu0 %v5409_v60  ;;  %3853 = vmatprep.subr.bf16.mxu1 %v5412_v61  ;;  %v5496_v60 = vld [vmem:[%s6134_s6 + $0x52c] ss:$16 sps:$4 sm:$0xff]   ;;  %v5491_v61 = vld [vmem:[%s6134_s6 + $0x520] ss:$16 sps:$4 sm:$0xff]  }
  0x86   : > { %3526 = vmatpush1.bf16.msra.mxu0 %v5407_v62  ;;  %3854 = vmatpush1.bf16.msra.mxu1 %v5410_v63  ;;  %v5494_v62 = vld [vmem:[%s6134_s6 + $0x528] ss:$16 sps:$4 sm:$0xff]   ;;  %v5499_v63 = vld [vmem:[%s6134_s6 + $0x544] ss:$16 sps:$4 sm:$0xff]  }
  0x87   : > { %3527 = vmatprep.subr.bf16.mxu0 %v5415_v0  ;;  %3855 = vmatprep.subr.bf16.mxu1 %v5418_v1  ;;  %v5502_v0 = vld [vmem:[%s6134_s6 + $0x54c] ss:$16 sps:$4 sm:$0xff]   ;;  %v5497_v1 = vld [vmem:[%s6134_s6 + $0x540] ss:$16 sps:$4 sm:$0xff]  }
  0x8a   : > { %3528 = vmatpush1.bf16.msra.mxu0 %v5413_v2  ;;  %3856 = vmatpush1.bf16.msra.mxu1 %v5416_v3  ;;  %v5500_v2 = vld [vmem:[%s6134_s6 + $0x548] ss:$16 sps:$4 sm:$0xff]   ;;  %v5505_v3 = vld [vmem:[%s6134_s6 + $0x564] ss:$16 sps:$4 sm:$0xff]  }
  0x8b   : > { %3529 = vmatprep.subr.bf16.mxu0 %v5421_v4  ;;  %3857 = vmatprep.subr.bf16.mxu1 %v5424_v5  ;;  %v5508_v4 = vld [vmem:[%s6134_s6 + $0x56c] ss:$16 sps:$4 sm:$0xff]   ;;  %v5503_v5 = vld [vmem:[%s6134_s6 + $0x560] ss:$16 sps:$4 sm:$0xff]  }
  0x8e   : > { %3530 = vmatpush1.bf16.msra.mxu0 %v5419_v6  ;;  %3858 = vmatpush1.bf16.msra.mxu1 %v5422_v7  ;;  %v5506_v6 = vld [vmem:[%s6134_s6 + $0x568] ss:$16 sps:$4 sm:$0xff]   ;;  %v5511_v7 = vld [vmem:[%s6134_s6 + $0x584] ss:$16 sps:$4 sm:$0xff]  }
  0x8f   : > { %3531 = vmatprep.subr.bf16.mxu0 %v5427_v8  ;;  %3859 = vmatprep.subr.bf16.mxu1 %v5430_v9  ;;  %v5514_v8 = vld [vmem:[%s6134_s6 + $0x58c] ss:$16 sps:$4 sm:$0xff]   ;;  %v5509_v9 = vld [vmem:[%s6134_s6 + $0x580] ss:$16 sps:$4 sm:$0xff]  }
  0x92   : > { %3532 = vmatpush1.bf16.msra.mxu0 %v5425_v11  ;;  %3860 = vmatpush1.bf16.msra.mxu1 %v5428_v12  ;;  %v5517_v11 = vld [vmem:[%s6134_s6 + $0x5a4] ss:$16 sps:$4 sm:$0xff]   ;;  %v5520_v12 = vld [vmem:[%s6134_s6 + $0x5ac] ss:$16 sps:$4 sm:$0xff]  }
  0x93   : > { %3533 = vmatprep.subr.bf16.mxu0 %v5433_v13  ;;  %3861 = vmatprep.subr.bf16.mxu1 %v5436_v15  ;;  %v5515_v13 = vld [vmem:[%s6134_s6 + $0x5a0] ss:$16 sps:$4 sm:$0xff]   ;;  %v5518_v15 = vld [vmem:[%s6134_s6 + $0x5a8] ss:$16 sps:$4 sm:$0xff]  }
  0x96   : > { %3534 = vmatpush1.bf16.msra.mxu0 %v5431_v17  ;;  %3862 = vmatpush1.bf16.msra.mxu1 %v5434_v53  ;;  %v5523_v17 = vld [vmem:[%s6134_s6 + $0x5c4] ss:$16 sps:$4 sm:$0xff]   ;;  %v5526_v53 = vld [vmem:[%s6134_s6 + $0x5cc] ss:$16 sps:$4 sm:$0xff]  }
  0x97   : > { %3544 = vmatprep.subr.bf16.mxu0 %v5439_v18  ;;  %3872 = vmatprep.subr.bf16.mxu1 %v5442_v19  ;;  %v5521_v18 = vld [vmem:[%s6134_s6 + $0x5c0] ss:$16 sps:$4 sm:$0xff]   ;;  %v5524_v19 = vld [vmem:[%s6134_s6 + $0x5c8] ss:$16 sps:$4 sm:$0xff]  }
  0x99   : > { %3536 = vmatmul.mubr.bf16.vlgmr.msra.gmra.mrb[0].mxu0 %v833_v22  ;;  %3864 = vmatmul.mubr.bf16.vlgmr.msra.gmra.mrb[0].mxu1 %v833_v22  ;;  %v5527_v22 = vld [vmem:[%s6134_s6 + $0x5e0] ss:$16 sps:$4 sm:$0xff]  }
  0x9a   : > { %3545 = vmatpush1.bf16.msra.mxu0 %v5437_v21  ;;  %3873 = vmatpush1.bf16.msra.mxu1 %v5440_v23  ;;  %v5532_v21 = vld [vmem:[%s6134_s6 + $0x5ec] ss:$16 sps:$4 sm:$0xff]   ;;  %v5530_v23 = vld [vmem:[%s6134_s6 + $0x5e8] ss:$16 sps:$4 sm:$0xff]  }
  0x9b   : > { %3546 = vmatprep.subr.bf16.mxu0 %v5445_v24  ;;  %3874 = vmatprep.subr.bf16.mxu1 %v5448_v25  ;;  %v5536_v24 = vld [vmem:[%s6134_s6 + $0x604] ss:$16 sps:$4 sm:$0xff]   ;;  %v5539_v25 = vld [vmem:[%s6134_s6 + $0x60c] ss:$16 sps:$4 sm:$0xff]  }
  0x9c   : > { %3576 = vmatprep.mubr.bf16.mxu0 %v6297_v26  ;;  %3904 = vmatprep.mubr.bf16.mxu1 %v6297_v26 }
  0x9e   : > { %3547 = vmatpush1.bf16.msra.mxu0 %v5443_v27  ;;  %3875 = vmatpush1.bf16.msra.mxu1 %v5446_v14  ;;  %v5534_v27 = vld [vmem:[%s6134_s6 + $0x600] ss:$16 sps:$4 sm:$0xff]   ;;  %v6364_v14 = vrot.slane %v6282_v16, %v6184_v50 }
  0x9f   : > { %3548 = vmatprep.subr.bf16.mxu0 %v5451_v28  ;;  %3876 = vmatprep.subr.bf16.mxu1 %v5454_v29  ;;  %v5537_v28 = vld [vmem:[%s6134_s6 + $0x608] ss:$16 sps:$4 sm:$0xff]   ;;  %v5542_v29 = vld [vmem:[%s6134_s6 + $0x624] ss:$16 sps:$4 sm:$0xff]   ;;  %v5540_v16 = vld [vmem:[%s6134_s6 + $0x620] ss:$16 sps:$4 sm:$0xff]  }
  0xa2   : > { %3549 = vmatpush1.bf16.msra.mxu0 %v5449_v30  ;;  %3877 = vmatpush1.bf16.msra.mxu1 %v5452_v31  ;;  %v5545_v30 = vld [vmem:[%s6134_s6 + $0x62c] ss:$16 sps:$4 sm:$0xff]   ;;  %v836_v31 = vcombine.high %v6297_v26, %v6297_v26  ;;  %v5546_v26 = vld [vmem:[%s6134_s6 + $0x640] ss:$16 sps:$4 sm:$0xff]  }
  0xa3   : > { %3550 = vmatprep.subr.bf16.mxu0 %v5457_v32  ;;  %3878 = vmatprep.subr.bf16.mxu1 %v5460_v33  ;;  %v5543_v32 = vld [vmem:[%s6134_s6 + $0x628] ss:$16 sps:$4 sm:$0xff]   ;;  %v5548_v33 = vld [vmem:[%s6134_s6 + $0x644] ss:$16 sps:$4 sm:$0xff]  }
  0xa6   : > { %3551 = vmatpush1.bf16.msra.mxu0 %v5455_v34  ;;  %3879 = vmatpush1.bf16.msra.mxu1 %v5458_v35  ;;  %v5551_v34 = vld [vmem:[%s6134_s6 + $0x64c] ss:$16 sps:$4 sm:$0xff]   ;;  %v5549_v35 = vld [vmem:[%s6134_s6 + $0x648] ss:$16 sps:$4 sm:$0xff]  }
  0xa7   : > { %3552 = vmatprep.subr.bf16.mxu0 %v5463_v36  ;;  %3880 = vmatprep.subr.bf16.mxu1 %v5466_v37  ;;  %v5554_v36 = vld [vmem:[%s6134_s6 + $0x664] ss:$16 sps:$4 sm:$0xff]   ;;  %v5557_v37 = vld [vmem:[%s6134_s6 + $0x66c] ss:$16 sps:$4 sm:$0xff]  }
  0xaa   : > { %3553 = vmatpush1.bf16.msra.mxu0 %v5461_v38  ;;  %3881 = vmatpush1.bf16.msra.mxu1 %v5464_v39  ;;  %v5552_v38 = vld [vmem:[%s6134_s6 + $0x660] ss:$16 sps:$4 sm:$0xff]   ;;  %v5555_v39 = vld [vmem:[%s6134_s6 + $0x668] ss:$16 sps:$4 sm:$0xff]  }
  0xab   : > { %3554 = vmatprep.subr.bf16.mxu0 %v5469_v40  ;;  %3882 = vmatprep.subr.bf16.mxu1 %v5472_v41  ;;  %v5560_v40 = vld [vmem:[%s6134_s6 + $0x684] ss:$16 sps:$4 sm:$0xff]   ;;  %v5563_v41 = vld [vmem:[%s6134_s6 + $0x68c] ss:$16 sps:$4 sm:$0xff]  }
  0xae   : > { %3555 = vmatpush1.bf16.msra.mxu0 %v5467_v42  ;;  %3883 = vmatpush1.bf16.msra.mxu1 %v5470_v43  ;;  %v5558_v42 = vld [vmem:[%s6134_s6 + $0x680] ss:$16 sps:$4 sm:$0xff]   ;;  %v5561_v43 = vld [vmem:[%s6134_s6 + $0x688] ss:$16 sps:$4 sm:$0xff]  }
  0xaf   : > { %3556 = vmatprep.subr.bf16.mxu0 %v5475_v45  ;;  %3884 = vmatprep.subr.bf16.mxu1 %v5478_v46  ;;  %v5566_v45 = vld [vmem:[%s6134_s6 + $0x6a4] ss:$16 sps:$4 sm:$0xff]   ;;  %v5569_v46 = vld [vmem:[%s6134_s6 + $0x6ac] ss:$16 sps:$4 sm:$0xff]  }
  0xb2   : > { %3557 = vmatpush1.bf16.msra.mxu0 %v5473_v47  ;;  %3885 = vmatpush1.bf16.msra.mxu1 %v5476_v48  ;;  %v5564_v47 = vld [vmem:[%s6134_s6 + $0x6a0] ss:$16 sps:$4 sm:$0xff]   ;;  %v5567_v48 = vld [vmem:[%s6134_s6 + $0x6a8] ss:$16 sps:$4 sm:$0xff]  }
  0xb3   : > { %3558 = vmatprep.subr.bf16.mxu0 %v5481_v49  ;;  %3886 = vmatprep.subr.bf16.mxu1 %v5484_v51  ;;  %v5572_v49 = vld [vmem:[%s6134_s6 + $0x6c4] ss:$16 sps:$4 sm:$0xff]   ;;  %v5575_v51 = vld [vmem:[%s6134_s6 + $0x6cc] ss:$16 sps:$4 sm:$0xff]  }
  0xb6   : > { %3559 = vmatpush1.bf16.msra.mxu0 %v5479_v52  ;;  %3887 = vmatpush1.bf16.msra.mxu1 %v5482_v54  ;;  %v5570_v52 = vld [vmem:[%s6134_s6 + $0x6c0] ss:$16 sps:$4 sm:$0xff]   ;;  %v5573_v54 = vld [vmem:[%s6134_s6 + $0x6c8] ss:$16 sps:$4 sm:$0xff]  }
  0xb7   : > { %3560 = vmatprep.subr.bf16.mxu0 %v5487_v55  ;;  %3888 = vmatprep.subr.bf16.mxu1 %v5490_v56  ;;  %v5578_v55 = vld [vmem:[%s6134_s6 + $0x6e4] ss:$16 sps:$4 sm:$0xff]   ;;  %v5581_v56 = vld [vmem:[%s6134_s6 + $0x6ec] ss:$16 sps:$4 sm:$0xff]  }
  0xba   : > { %3561 = vmatpush1.bf16.msra.mxu0 %v5485_v57  ;;  %3889 = vmatpush1.bf16.msra.mxu1 %v5488_v58  ;;  %v5576_v57 = vld [vmem:[%s6134_s6 + $0x6e0] ss:$16 sps:$4 sm:$0xff]   ;;  %v5579_v58 = vld [vmem:[%s6134_s6 + $0x6e8] ss:$16 sps:$4 sm:$0xff]  }
  0xbb   : > { %3562 = vmatprep.subr.bf16.mxu0 %v5493_v59  ;;  %3890 = vmatprep.subr.bf16.mxu1 %v5496_v60  ;;  %v5584_v59 = vld [vmem:[%s6134_s6 + $0x704] ss:$16 sps:$4 sm:$0xff]   ;;  %v5587_v60 = vld [vmem:[%s6134_s6 + $0x70c] ss:$16 sps:$4 sm:$0xff]  }
  0xbe   : > { %3563 = vmatpush1.bf16.msra.mxu0 %v5491_v61  ;;  %3891 = vmatpush1.bf16.msra.mxu1 %v5494_v62  ;;  %v5582_v61 = vld [vmem:[%s6134_s6 + $0x700] ss:$16 sps:$4 sm:$0xff]   ;;  %v5585_v62 = vld [vmem:[%s6134_s6 + $0x708] ss:$16 sps:$4 sm:$0xff]  }
  0xbf   : > { %3564 = vmatprep.subr.bf16.mxu0 %v5499_v63  ;;  %3892 = vmatprep.subr.bf16.mxu1 %v5502_v0  ;;  %v5590_v63 = vld [vmem:[%s6134_s6 + $0x724] ss:$16 sps:$4 sm:$0xff]   ;;  %v5593_v0 = vld [vmem:[%s6134_s6 + $0x72c] ss:$16 sps:$4 sm:$0xff]  }
  0xc2   : > { %3565 = vmatpush1.bf16.msra.mxu0 %v5497_v1  ;;  %3893 = vmatpush1.bf16.msra.mxu1 %v5500_v2  ;;  %v5588_v1 = vld [vmem:[%s6134_s6 + $0x720] ss:$16 sps:$4 sm:$0xff]   ;;  %v5591_v2 = vld [vmem:[%s6134_s6 + $0x728] ss:$16 sps:$4 sm:$0xff]  }
  0xc3   : > { %3566 = vmatprep.subr.bf16.mxu0 %v5505_v3  ;;  %3894 = vmatprep.subr.bf16.mxu1 %v5508_v4  ;;  %v5596_v3 = vld [vmem:[%s6134_s6 + $0x744] ss:$16 sps:$4 sm:$0xff]   ;;  %v5599_v4 = vld [vmem:[%s6134_s6 + $0x74c] ss:$16 sps:$4 sm:$0xff]  }
  0xc6   : > { %3567 = vmatpush1.bf16.msra.mxu0 %v5503_v5  ;;  %3895 = vmatpush1.bf16.msra.mxu1 %v5506_v6  ;;  %v5594_v5 = vld [vmem:[%s6134_s6 + $0x740] ss:$16 sps:$4 sm:$0xff]   ;;  %v5597_v6 = vld [vmem:[%s6134_s6 + $0x748] ss:$16 sps:$4 sm:$0xff]  }
  0xc7   : > { %3568 = vmatprep.subr.bf16.mxu0 %v5511_v7  ;;  %3896 = vmatprep.subr.bf16.mxu1 %v5514_v8  ;;  %v5602_v7 = vld [vmem:[%s6134_s6 + $0x764] ss:$16 sps:$4 sm:$0xff]   ;;  %v5605_v8 = vld [vmem:[%s6134_s6 + $0x76c] ss:$16 sps:$4 sm:$0xff]  }
  0xca   : > { %3569 = vmatpush1.bf16.msra.mxu0 %v5509_v9  ;;  %3897 = vmatpush1.bf16.msra.mxu1 %v5512_v10  ;;  %v5600_v9 = vld [vmem:[%s6134_s6 + $0x760] ss:$16 sps:$4 sm:$0xff]   ;;  %v5603_v10 = vld [vmem:[%s6134_s6 + $0x768] ss:$16 sps:$4 sm:$0xff]  }
  0xcb   : > { %3570 = vmatprep.subr.bf16.mxu0 %v5517_v11  ;;  %3898 = vmatprep.subr.bf16.mxu1 %v5520_v12  ;;  %v5608_v11 = vld [vmem:[%s6134_s6 + $0x784] ss:$16 sps:$4 sm:$0xff]   ;;  %v5611_v12 = vld [vmem:[%s6134_s6 + $0x78c] ss:$16 sps:$4 sm:$0xff]  }
  0xce   : > { %3571 = vmatpush1.bf16.msra.mxu0 %v5515_v13  ;;  %3899 = vmatpush1.bf16.msra.mxu1 %v5518_v15  ;;  %v5606_v13 = vld [vmem:[%s6134_s6 + $0x780] ss:$16 sps:$4 sm:$0xff]   ;;  %v5609_v15 = vld [vmem:[%s6134_s6 + $0x788] ss:$16 sps:$4 sm:$0xff]  }
  0xcf   : > { %3572 = vmatprep.subr.bf16.mxu0 %v5523_v17  ;;  %3900 = vmatprep.subr.bf16.mxu1 %v5526_v53  ;;  %v5614_v17 = vld [vmem:[%s6134_s6 + $0x7a4] ss:$16 sps:$4 sm:$0xff]   ;;  %v5617_v53 = vld [vmem:[%s6134_s6 + $0x7ac] ss:$16 sps:$4 sm:$0xff]  }
  0xd2   : > { %3573 = vmatpush1.bf16.msra.mxu0 %v5521_v18  ;;  %3901 = vmatpush1.bf16.msra.mxu1 %v5524_v19  ;;  %v5612_v18 = vld [vmem:[%s6134_s6 + $0x7a0] ss:$16 sps:$4 sm:$0xff]   ;;  %v5615_v19 = vld [vmem:[%s6134_s6 + $0x7a8] ss:$16 sps:$4 sm:$0xff]  }
  0xd3   : > { %3574 = vmatprep.subr.bf16.mxu0 %v5529_v20  ;;  %3902 = vmatprep.subr.bf16.mxu1 %v5532_v21  ;;  %v5620_v20 = vld [vmem:[%s6134_s6 + $0x7c4] ss:$16 sps:$4 sm:$0xff]   ;;  %v5623_v21 = vld [vmem:[%s6134_s6 + $0x7cc] ss:$16 sps:$4 sm:$0xff]  }
  0xd6   : > { %3575 = vmatpush1.bf16.msra.mxu0 %v5527_v22  ;;  %3903 = vmatpush1.bf16.msra.mxu1 %v5530_v23  ;;  %v6426_v22 = vld [vmem:[%s6129_s27 + $0x8] sm:$0xff]  ;;  %v5618_v23 = vld [vmem:[%s6134_s6 + $0x7c0] ss:$16 sps:$4 sm:$0xff]  }
  0xd7   : > { %3585 = vmatprep.subr.bf16.mxu0 %v5536_v24  ;;  %3913 = vmatprep.subr.bf16.mxu1 %v5539_v25  ;;  %v5621_v24 = vld [vmem:[%s6134_s6 + $0x7c8] ss:$16 sps:$4 sm:$0xff]   ;;  %v5626_v25 = vld [vmem:[%s6134_s6 + $0x7e4] ss:$16 sps:$4 sm:$0xff]  }
  0xd9   : > { %3577 = vmatmul.mubr.bf16.vlgmr.msra.gmra.mrb[0].mxu0 %v6364_v14  ;;  %3905 = vmatmul.mubr.bf16.vlgmr.msra.gmra.mrb[0].mxu1 %v6364_v14 }
  0xda   : > { %3586 = vmatpush1.bf16.msra.mxu0 %v5534_v27  ;;  %3914 = vmatpush1.bf16.msra.mxu1 %v5537_v28  ;;  %v5629_v27 = vld [vmem:[%s6134_s6 + $0x7ec] ss:$16 sps:$4 sm:$0xff]   ;;  %v6434_v28 = vrot.slane %v6426_v22, %v6184_v50 }
  0xdb   : > { %3587 = vmatprep.subr.bf16.mxu0 %v5542_v29  ;;  %3915 = vmatprep.subr.bf16.mxu1 %v5545_v30  ;;  %v5624_v29 = vld [vmem:[%s6134_s6 + $0x7e0] ss:$16 sps:$4 sm:$0xff]   ;;  %v5627_v30 = vld [vmem:[%s6134_s6 + $0x7e8] ss:$16 sps:$4 sm:$0xff]  }
  0xdc   : > { %3617 = vmatprep.mubr.bf16.mxu0 %v836_v31  ;;  %3945 = vmatprep.mubr.bf16.mxu1 %v836_v31  ;;  %v5632_v31 = vld [vmem:[%s6134_s6 + $0x804] ss:$16 sps:$4 sm:$0xff]  }
  0xde   : > { %3588 = vmatpush1.bf16.msra.mxu0 %v5540_v16  ;;  %3916 = vmatpush1.bf16.msra.mxu1 %v5543_v32  ;;  %v5635_v16 = vld [vmem:[%s6134_s6 + $0x80c] ss:$16 sps:$4 sm:$0xff]   ;;  %v852_v32 = vcombine.high %v6434_v28, %v6434_v28 }
  0xdf   : > { %3589 = vmatprep.subr.bf16.mxu0 %v5548_v33  ;;  %3917 = vmatprep.subr.bf16.mxu1 %v5551_v34  ;;  %v834_v33 = vcombine.high %v6364_v14, %v6364_v14  ;;  %v5630_v34 = vld [vmem:[%s6134_s6 + $0x800] ss:$16 sps:$4 sm:$0xff]  }
  0xe0   : > { %v5636_v14 = vld [vmem:[%s6134_s6 + $0x820] ss:$16 sps:$4 sm:$0xff]  }
  0xe2   : > { %3590 = vmatpush1.bf16.msra.mxu0 %v5546_v26  ;;  %3918 = vmatpush1.bf16.msra.mxu1 %v5549_v35  ;;  %v5633_v26 = vld [vmem:[%s6134_s6 + $0x808] ss:$16 sps:$4 sm:$0xff]   ;;  %v5638_v35 = vld [vmem:[%s6134_s6 + $0x824] ss:$16 sps:$4 sm:$0xff]  }
  0xe3   : > { %3591 = vmatprep.subr.bf16.mxu0 %v5554_v36  ;;  %3919 = vmatprep.subr.bf16.mxu1 %v5557_v37  ;;  %v5641_v36 = vld [vmem:[%s6134_s6 + $0x82c] ss:$16 sps:$4 sm:$0xff]   ;;  %v6449_v37 = vrot.slane %v852_v32, %v6184_v50  ;;  %v5717_v32 = vld [vmem:[%s6134_s6 + $0x9c8] ss:$16 sps:$4 sm:$0xff]  }
  0xe6   : > { %3592 = vmatpush1.bf16.msra.mxu0 %v5552_v38  ;;  %3920 = vmatpush1.bf16.msra.mxu1 %v5555_v39  ;;  %v5639_v38 = vld [vmem:[%s6134_s6 + $0x828] ss:$16 sps:$4 sm:$0xff]   ;;  %v5644_v39 = vld [vmem:[%s6134_s6 + $0x844] ss:$16 sps:$4 sm:$0xff]  }
  0xe7   : > { %3593 = vmatprep.subr.bf16.mxu0 %v5560_v40  ;;  %3921 = vmatprep.subr.bf16.mxu1 %v5563_v41  ;;  %v5647_v40 = vld [vmem:[%s6134_s6 + $0x84c] ss:$16 sps:$4 sm:$0xff]   ;;  %v5642_v41 = vld [vmem:[%s6134_s6 + $0x840] ss:$16 sps:$4 sm:$0xff]  }
  0xea   : > { %3594 = vmatpush1.bf16.msra.mxu0 %v5558_v42  ;;  %3922 = vmatpush1.bf16.msra.mxu1 %v5561_v43  ;;  %v5645_v42 = vld [vmem:[%s6134_s6 + $0x848] ss:$16 sps:$4 sm:$0xff]   ;;  %v5650_v43 = vld [vmem:[%s6134_s6 + $0x864] ss:$16 sps:$4 sm:$0xff]  }
  0xeb   : > { %3595 = vmatprep.subr.bf16.mxu0 %v5566_v45  ;;  %3923 = vmatprep.subr.bf16.mxu1 %v5569_v46  ;;  %v5653_v45 = vld [vmem:[%s6134_s6 + $0x86c] ss:$16 sps:$4 sm:$0xff]   ;;  %v5648_v46 = vld [vmem:[%s6134_s6 + $0x860] ss:$16 sps:$4 sm:$0xff]  }
  0xee   : > { %3596 = vmatpush1.bf16.msra.mxu0 %v5564_v47  ;;  %3924 = vmatpush1.bf16.msra.mxu1 %v5567_v48  ;;  %v5651_v47 = vld [vmem:[%s6134_s6 + $0x868] ss:$16 sps:$4 sm:$0xff]   ;;  %v5656_v48 = vld [vmem:[%s6134_s6 + $0x884] ss:$16 sps:$4 sm:$0xff]  }
  0xef   : > { %3597 = vmatprep.subr.bf16.mxu0 %v5572_v49  ;;  %3925 = vmatprep.subr.bf16.mxu1 %v5575_v51  ;;  %v5659_v49 = vld [vmem:[%s6134_s6 + $0x88c] ss:$16 sps:$4 sm:$0xff]   ;;  %v5654_v51 = vld [vmem:[%s6134_s6 + $0x880] ss:$16 sps:$4 sm:$0xff]  }
  0xf2   : > { %3598 = vmatpush1.bf16.msra.mxu0 %v5570_v52  ;;  %3926 = vmatpush1.bf16.msra.mxu1 %v5573_v54  ;;  %v5657_v52 = vld [vmem:[%s6134_s6 + $0x888] ss:$16 sps:$4 sm:$0xff]   ;;  %v5662_v54 = vld [vmem:[%s6134_s6 + $0x8a4] ss:$16 sps:$4 sm:$0xff]  }
  0xf3   : > { %3599 = vmatprep.subr.bf16.mxu0 %v5578_v55  ;;  %3927 = vmatprep.subr.bf16.mxu1 %v5581_v56  ;;  %v5665_v55 = vld [vmem:[%s6134_s6 + $0x8ac] ss:$16 sps:$4 sm:$0xff]   ;;  %v5660_v56 = vld [vmem:[%s6134_s6 + $0x8a0] ss:$16 sps:$4 sm:$0xff]  }
  0xf6   : > { %3600 = vmatpush1.bf16.msra.mxu0 %v5576_v57  ;;  %3928 = vmatpush1.bf16.msra.mxu1 %v5579_v58  ;;  %v5663_v57 = vld [vmem:[%s6134_s6 + $0x8a8] ss:$16 sps:$4 sm:$0xff]   ;;  %v5668_v58 = vld [vmem:[%s6134_s6 + $0x8c4] ss:$16 sps:$4 sm:$0xff]  }
  0xf7   : > { %3601 = vmatprep.subr.bf16.mxu0 %v5584_v59  ;;  %3929 = vmatprep.subr.bf16.mxu1 %v5587_v60  ;;  %v5671_v59 = vld [vmem:[%s6134_s6 + $0x8cc] ss:$16 sps:$4 sm:$0xff]   ;;  %v5666_v60 = vld [vmem:[%s6134_s6 + $0x8c0] ss:$16 sps:$4 sm:$0xff]  }
  0xfa   : > { %3602 = vmatpush1.bf16.msra.mxu0 %v5582_v61  ;;  %3930 = vmatpush1.bf16.msra.mxu1 %v5585_v62  ;;  %v5669_v61 = vld [vmem:[%s6134_s6 + $0x8c8] ss:$16 sps:$4 sm:$0xff]   ;;  %v5674_v62 = vld [vmem:[%s6134_s6 + $0x8e4] ss:$16 sps:$4 sm:$0xff]  }
  0xfb   : > { %3603 = vmatprep.subr.bf16.mxu0 %v5590_v63  ;;  %3931 = vmatprep.subr.bf16.mxu1 %v5593_v0  ;;  %v5677_v63 = vld [vmem:[%s6134_s6 + $0x8ec] ss:$16 sps:$4 sm:$0xff]   ;;  %v5672_v0 = vld [vmem:[%s6134_s6 + $0x8e0] ss:$16 sps:$4 sm:$0xff]  }
  0xfe   : > { %3604 = vmatpush1.bf16.msra.mxu0 %v5588_v1  ;;  %3932 = vmatpush1.bf16.msra.mxu1 %v5591_v2  ;;  %v5675_v1 = vld [vmem:[%s6134_s6 + $0x8e8] ss:$16 sps:$4 sm:$0xff]   ;;  %v5680_v2 = vld [vmem:[%s6134_s6 + $0x904] ss:$16 sps:$4 sm:$0xff]  }
  0xff   : > { %3605 = vmatprep.subr.bf16.mxu0 %v5596_v3  ;;  %3933 = vmatprep.subr.bf16.mxu1 %v5599_v4  ;;  %v5683_v3 = vld [vmem:[%s6134_s6 + $0x90c] ss:$16 sps:$4 sm:$0xff]   ;;  %v5678_v4 = vld [vmem:[%s6134_s6 + $0x900] ss:$16 sps:$4 sm:$0xff]  }
 0x102   : > { %3606 = vmatpush1.bf16.msra.mxu0 %v5594_v5  ;;  %3934 = vmatpush1.bf16.msra.mxu1 %v5597_v6  ;;  %v5681_v5 = vld [vmem:[%s6134_s6 + $0x908] ss:$16 sps:$4 sm:$0xff]   ;;  %v5686_v6 = vld [vmem:[%s6134_s6 + $0x924] ss:$16 sps:$4 sm:$0xff]  }
 0x103   : > { %3607 = vmatprep.subr.bf16.mxu0 %v5602_v7  ;;  %3935 = vmatprep.subr.bf16.mxu1 %v5605_v8  ;;  %v5689_v7 = vld [vmem:[%s6134_s6 + $0x92c] ss:$16 sps:$4 sm:$0xff]   ;;  %v5684_v8 = vld [vmem:[%s6134_s6 + $0x920] ss:$16 sps:$4 sm:$0xff]  }
 0x106   : > { %3608 = vmatpush1.bf16.msra.mxu0 %v5600_v9  ;;  %3936 = vmatpush1.bf16.msra.mxu1 %v5603_v10  ;;  %v5687_v9 = vld [vmem:[%s6134_s6 + $0x928] ss:$16 sps:$4 sm:$0xff]   ;;  %v5692_v10 = vld [vmem:[%s6134_s6 + $0x944] ss:$16 sps:$4 sm:$0xff]  }
 0x107   : > { %3609 = vmatprep.subr.bf16.mxu0 %v5608_v11  ;;  %3937 = vmatprep.subr.bf16.mxu1 %v5611_v12  ;;  %v5695_v11 = vld [vmem:[%s6134_s6 + $0x94c] ss:$16 sps:$4 sm:$0xff]   ;;  %v5690_v12 = vld [vmem:[%s6134_s6 + $0x940] ss:$16 sps:$4 sm:$0xff]  }
 0x10a   : > { %3610 = vmatpush1.bf16.msra.mxu0 %v5606_v13  ;;  %3938 = vmatpush1.bf16.msra.mxu1 %v5609_v15  ;;  %v5693_v13 = vld [vmem:[%s6134_s6 + $0x948] ss:$16 sps:$4 sm:$0xff]   ;;  %v5698_v15 = vld [vmem:[%s6134_s6 + $0x964] ss:$16 sps:$4 sm:$0xff]  }
 0x10b   : > { %3611 = vmatprep.subr.bf16.mxu0 %v5614_v17  ;;  %3939 = vmatprep.subr.bf16.mxu1 %v5617_v53  ;;  %v5701_v17 = vld [vmem:[%s6134_s6 + $0x96c] ss:$16 sps:$4 sm:$0xff]   ;;  %v5696_v53 = vld [vmem:[%s6134_s6 + $0x960] ss:$16 sps:$4 sm:$0xff]  }
 0x10e   : > { %3612 = vmatpush1.bf16.msra.mxu0 %v5612_v18  ;;  %3940 = vmatpush1.bf16.msra.mxu1 %v5615_v19  ;;  %v5699_v18 = vld [vmem:[%s6134_s6 + $0x968] ss:$16 sps:$4 sm:$0xff]   ;;  %v5704_v19 = vld [vmem:[%s6134_s6 + $0x984] ss:$16 sps:$4 sm:$0xff]  }
 0x10f   : > { %3613 = vmatprep.subr.bf16.mxu0 %v5620_v20  ;;  %3941 = vmatprep.subr.bf16.mxu1 %v5623_v21  ;;  %v5707_v20 = vld [vmem:[%s6134_s6 + $0x98c] ss:$16 sps:$4 sm:$0xff]   ;;  %v5702_v21 = vld [vmem:[%s6134_s6 + $0x980] ss:$16 sps:$4 sm:$0xff]  }
 0x112   : > { %3614 = vmatpush1.bf16.msra.mxu0 %v5618_v23  ;;  %3942 = vmatpush1.bf16.msra.mxu1 %v5621_v24  ;;  %v5705_v23 = vld [vmem:[%s6134_s6 + $0x988] ss:$16 sps:$4 sm:$0xff]   ;;  %v5710_v24 = vld [vmem:[%s6134_s6 + $0x9a4] ss:$16 sps:$4 sm:$0xff]  }
 0x113   : > { %3615 = vmatprep.subr.bf16.mxu0 %v5626_v25  ;;  %3943 = vmatprep.subr.bf16.mxu1 %v5629_v27  ;;  %v5713_v25 = vld [vmem:[%s6134_s6 + $0x9ac] ss:$16 sps:$4 sm:$0xff]   ;;  %v5708_v27 = vld [vmem:[%s6134_s6 + $0x9a0] ss:$16 sps:$4 sm:$0xff]  }
 0x116   : > { %3616 = vmatpush1.bf16.msra.mxu0 %v5624_v29  ;;  %3944 = vmatpush1.bf16.msra.mxu1 %v5627_v30  ;;  %v5711_v29 = vld [vmem:[%s6134_s6 + $0x9a8] ss:$16 sps:$4 sm:$0xff]   ;;  %v5716_v30 = vld [vmem:[%s6134_s6 + $0x9c4] ss:$16 sps:$4 sm:$0xff]  }
 0x117   : > { %3626 = vmatprep.subr.bf16.mxu0 %v5632_v31  ;;  %3954 = vmatprep.subr.bf16.mxu1 %v5635_v16  ;;  %v5719_v31 = vld [vmem:[%s6134_s6 + $0x9cc] ss:$16 sps:$4 sm:$0xff]   ;;  %v5714_v16 = vld [vmem:[%s6134_s6 + $0x9c0] ss:$16 sps:$4 sm:$0xff]  }
 0x119   : > { %3618 = vmatmul.mubr.bf16.vlgmr.msra.gmra.mrb[0].mxu0 %v834_v33  ;;  %3946 = vmatmul.mubr.bf16.vlgmr.msra.gmra.mrb[0].mxu1 %v834_v33  ;;  %v5722_v33 = vld [vmem:[%s6134_s6 + $0x9e4] ss:$16 sps:$4 sm:$0xff]  }
 0x11a   : > { %3627 = vmatpush1.bf16.msra.mxu0 %v5630_v34  ;;  %3955 = vmatpush1.bf16.msra.mxu1 %v5633_v26  ;;  %v5725_v34 = vld [vmem:[%s6134_s6 + $0x9ec] ss:$16 sps:$4 sm:$0xff]   ;;  %v5720_v26 = vld [vmem:[%s6134_s6 + $0x9e0] ss:$16 sps:$4 sm:$0xff]  }
 0x11b   : > { %3628 = vmatprep.subr.bf16.mxu0 %v5638_v35  ;;  %3956 = vmatprep.subr.bf16.mxu1 %v5641_v36  ;;  %v5723_v35 = vld [vmem:[%s6134_s6 + $0x9e8] ss:$16 sps:$4 sm:$0xff]   ;;  %v5728_v36 = vld [vmem:[%s6134_s6 + $0xa04] ss:$16 sps:$4 sm:$0xff]  }
 0x11c   : > { %3658 = vmatprep.mubr.bf16.mxu0 %v6449_v37  ;;  %3986 = vmatprep.mubr.bf16.mxu1 %v6449_v37 }
 0x11e   : > { %3629 = vmatpush1.bf16.msra.mxu0 %v5636_v14  ;;  %3957 = vmatpush1.bf16.msra.mxu1 %v5639_v38  ;;  %v5731_v14 = vld [vmem:[%s6134_s6 + $0xa0c] ss:$16 sps:$4 sm:$0xff]   ;;  %v6515_v38 = vrot.slane %v6434_v28, %v6184_v50  ;;  %v5732_v28 = vld [vmem:[%s6134_s6 + $0xa20] ss:$16 sps:$4 sm:$0xff]  }
 0x11f   : > { %3630 = vmatprep.subr.bf16.mxu0 %v5644_v39  ;;  %3958 = vmatprep.subr.bf16.mxu1 %v5647_v40  ;;  %v5726_v39 = vld [vmem:[%s6134_s6 + $0xa00] ss:$16 sps:$4 sm:$0xff]   ;;  %v5729_v40 = vld [vmem:[%s6134_s6 + $0xa08] ss:$16 sps:$4 sm:$0xff]  }
 0x122   : > { %3631 = vmatpush1.bf16.msra.mxu0 %v5642_v41  ;;  %3959 = vmatpush1.bf16.msra.mxu1 %v5645_v42  ;;  %v5734_v41 = vld [vmem:[%s6134_s6 + $0xa24] ss:$16 sps:$4 sm:$0xff]   ;;  %v5737_v42 = vld [vmem:[%s6134_s6 + $0xa2c] ss:$16 sps:$4 sm:$0xff]  }
 0x123   : > { %3632 = vmatprep.subr.bf16.mxu0 %v5650_v43  ;;  %3960 = vmatprep.subr.bf16.mxu1 %v5653_v45  ;;  %v884_v43 = vcombine.high %v6449_v37, %v6449_v37  ;;  %v5735_v45 = vld [vmem:[%s6134_s6 + $0xa28] ss:$16 sps:$4 sm:$0xff]   ;;  %v5738_v37 = vld [vmem:[%s6134_s6 + $0xa40] ss:$16 sps:$4 sm:$0xff]  }
 0x126   : > { %3633 = vmatpush1.bf16.msra.mxu0 %v5648_v46  ;;  %3961 = vmatpush1.bf16.msra.mxu1 %v5651_v47  ;;  %v5740_v46 = vld [vmem:[%s6134_s6 + $0xa44] ss:$16 sps:$4 sm:$0xff]   ;;  %v5743_v47 = vld [vmem:[%s6134_s6 + $0xa4c] ss:$16 sps:$4 sm:$0xff]  }
 0x127   : > { %3634 = vmatprep.subr.bf16.mxu0 %v5656_v48  ;;  %3962 = vmatprep.subr.bf16.mxu1 %v5659_v49  ;;  %v5741_v48 = vld [vmem:[%s6134_s6 + $0xa48] ss:$16 sps:$4 sm:$0xff]   ;;  %v5746_v49 = vld [vmem:[%s6134_s6 + $0xa64] ss:$16 sps:$4 sm:$0xff]  }
 0x12a   : > { %3635 = vmatpush1.bf16.msra.mxu0 %v5654_v51  ;;  %3963 = vmatpush1.bf16.msra.mxu1 %v5657_v52  ;;  %v5749_v51 = vld [vmem:[%s6134_s6 + $0xa6c] ss:$16 sps:$4 sm:$0xff]   ;;  %v5744_v52 = vld [vmem:[%s6134_s6 + $0xa60] ss:$16 sps:$4 sm:$0xff]  }
 0x12b   : > { %3636 = vmatprep.subr.bf16.mxu0 %v5662_v54  ;;  %3964 = vmatprep.subr.bf16.mxu1 %v5665_v55  ;;  %v5747_v54 = vld [vmem:[%s6134_s6 + $0xa68] ss:$16 sps:$4 sm:$0xff]   ;;  %v5752_v55 = vld [vmem:[%s6134_s6 + $0xa84] ss:$16 sps:$4 sm:$0xff]  }
 0x12e   : > { %3637 = vmatpush1.bf16.msra.mxu0 %v5660_v56  ;;  %3965 = vmatpush1.bf16.msra.mxu1 %v5663_v57  ;;  %v5755_v56 = vld [vmem:[%s6134_s6 + $0xa8c] ss:$16 sps:$4 sm:$0xff]   ;;  %v5750_v57 = vld [vmem:[%s6134_s6 + $0xa80] ss:$16 sps:$4 sm:$0xff]  }
 0x12f   : > { %3638 = vmatprep.subr.bf16.mxu0 %v5668_v58  ;;  %3966 = vmatprep.subr.bf16.mxu1 %v5671_v59  ;;  %v5753_v58 = vld [vmem:[%s6134_s6 + $0xa88] ss:$16 sps:$4 sm:$0xff]   ;;  %v5758_v59 = vld [vmem:[%s6134_s6 + $0xaa4] ss:$16 sps:$4 sm:$0xff]  }
 0x132   : > { %3639 = vmatpush1.bf16.msra.mxu0 %v5666_v60  ;;  %3967 = vmatpush1.bf16.msra.mxu1 %v5669_v61  ;;  %v5761_v60 = vld [vmem:[%s6134_s6 + $0xaac] ss:$16 sps:$4 sm:$0xff]   ;;  %v5756_v61 = vld [vmem:[%s6134_s6 + $0xaa0] ss:$16 sps:$4 sm:$0xff]  }
 0x133   : > { %3640 = vmatprep.subr.bf16.mxu0 %v5674_v62  ;;  %3968 = vmatprep.subr.bf16.mxu1 %v5677_v63  ;;  %v5759_v62 = vld [vmem:[%s6134_s6 + $0xaa8] ss:$16 sps:$4 sm:$0xff]   ;;  %v5764_v63 = vld [vmem:[%s6134_s6 + $0xac4] ss:$16 sps:$4 sm:$0xff]  }
 0x136   : > { %3641 = vmatpush1.bf16.msra.mxu0 %v5672_v0  ;;  %3969 = vmatpush1.bf16.msra.mxu1 %v5675_v1  ;;  %v5767_v0 = vld [vmem:[%s6134_s6 + $0xacc] ss:$16 sps:$4 sm:$0xff]   ;;  %v5762_v1 = vld [vmem:[%s6134_s6 + $0xac0] ss:$16 sps:$4 sm:$0xff]  }
 0x137   : > { %3642 = vmatprep.subr.bf16.mxu0 %v5680_v2  ;;  %3970 = vmatprep.subr.bf16.mxu1 %v5683_v3  ;;  %v5765_v2 = vld [vmem:[%s6134_s6 + $0xac8] ss:$16 sps:$4 sm:$0xff]   ;;  %v5770_v3 = vld [vmem:[%s6134_s6 + $0xae4] ss:$16 sps:$4 sm:$0xff]  }
 0x13a   : > { %3643 = vmatpush1.bf16.msra.mxu0 %v5678_v4  ;;  %3971 = vmatpush1.bf16.msra.mxu1 %v5681_v5  ;;  %v5773_v4 = vld [vmem:[%s6134_s6 + $0xaec] ss:$16 sps:$4 sm:$0xff]   ;;  %v5768_v5 = vld [vmem:[%s6134_s6 + $0xae0] ss:$16 sps:$4 sm:$0xff]  }
 0x13b   : > { %3644 = vmatprep.subr.bf16.mxu0 %v5686_v6  ;;  %3972 = vmatprep.subr.bf16.mxu1 %v5689_v7  ;;  %v5771_v6 = vld [vmem:[%s6134_s6 + $0xae8] ss:$16 sps:$4 sm:$0xff]   ;;  %v5776_v7 = vld [vmem:[%s6134_s6 + $0xb04] ss:$16 sps:$4 sm:$0xff]  }
 0x13e   : > { %3645 = vmatpush1.bf16.msra.mxu0 %v5684_v8  ;;  %3973 = vmatpush1.bf16.msra.mxu1 %v5687_v9  ;;  %v5779_v8 = vld [vmem:[%s6134_s6 + $0xb0c] ss:$16 sps:$4 sm:$0xff]   ;;  %v5774_v9 = vld [vmem:[%s6134_s6 + $0xb00] ss:$16 sps:$4 sm:$0xff]  }
 0x13f   : > { %3646 = vmatprep.subr.bf16.mxu0 %v5692_v10  ;;  %3974 = vmatprep.subr.bf16.mxu1 %v5695_v11  ;;  %v5777_v10 = vld [vmem:[%s6134_s6 + $0xb08] ss:$16 sps:$4 sm:$0xff]   ;;  %v5782_v11 = vld [vmem:[%s6134_s6 + $0xb24] ss:$16 sps:$4 sm:$0xff]  }
 0x142   : > { %3647 = vmatpush1.bf16.msra.mxu0 %v5690_v12  ;;  %3975 = vmatpush1.bf16.msra.mxu1 %v5693_v13  ;;  %v5785_v12 = vld [vmem:[%s6134_s6 + $0xb2c] ss:$16 sps:$4 sm:$0xff]   ;;  %v5780_v13 = vld [vmem:[%s6134_s6 + $0xb20] ss:$16 sps:$4 sm:$0xff]  }
 0x143   : > { %3648 = vmatprep.subr.bf16.mxu0 %v5698_v15  ;;  %3976 = vmatprep.subr.bf16.mxu1 %v5701_v17  ;;  %v5783_v15 = vld [vmem:[%s6134_s6 + $0xb28] ss:$16 sps:$4 sm:$0xff]   ;;  %v5788_v17 = vld [vmem:[%s6134_s6 + $0xb44] ss:$16 sps:$4 sm:$0xff]  }
 0x146   : > { %3649 = vmatpush1.bf16.msra.mxu0 %v5696_v53  ;;  %3977 = vmatpush1.bf16.msra.mxu1 %v5699_v18  ;;  %v5791_v53 = vld [vmem:[%s6134_s6 + $0xb4c] ss:$16 sps:$4 sm:$0xff]   ;;  %v5786_v18 = vld [vmem:[%s6134_s6 + $0xb40] ss:$16 sps:$4 sm:$0xff]  }
 0x147   : > { %3650 = vmatprep.subr.bf16.mxu0 %v5704_v19  ;;  %3978 = vmatprep.subr.bf16.mxu1 %v5707_v20  ;;  %v5789_v19 = vld [vmem:[%s6134_s6 + $0xb48] ss:$16 sps:$4 sm:$0xff]   ;;  %v5794_v20 = vld [vmem:[%s6134_s6 + $0xb64] ss:$16 sps:$4 sm:$0xff]  }
 0x14a   : > { %3651 = vmatpush1.bf16.msra.mxu0 %v5702_v21  ;;  %3979 = vmatpush1.bf16.msra.mxu1 %v5705_v23  ;;  %v5797_v21 = vld [vmem:[%s6134_s6 + $0xb6c] ss:$16 sps:$4 sm:$0xff]   ;;  %v5792_v23 = vld [vmem:[%s6134_s6 + $0xb60] ss:$16 sps:$4 sm:$0xff]  }
 0x14b   : > { %3652 = vmatprep.subr.bf16.mxu0 %v5710_v24  ;;  %3980 = vmatprep.subr.bf16.mxu1 %v5713_v25  ;;  %v5795_v24 = vld [vmem:[%s6134_s6 + $0xb68] ss:$16 sps:$4 sm:$0xff]   ;;  %v5800_v25 = vld [vmem:[%s6134_s6 + $0xb84] ss:$16 sps:$4 sm:$0xff]  }
 0x14e   : > { %3653 = vmatpush1.bf16.msra.mxu0 %v5708_v27  ;;  %3981 = vmatpush1.bf16.msra.mxu1 %v5711_v29  ;;  %v5803_v27 = vld [vmem:[%s6134_s6 + $0xb8c] ss:$16 sps:$4 sm:$0xff]   ;;  %v5798_v29 = vld [vmem:[%s6134_s6 + $0xb80] ss:$16 sps:$4 sm:$0xff]  }
 0x14f   : > { %3654 = vmatprep.subr.bf16.mxu0 %v5716_v30  ;;  %3982 = vmatprep.subr.bf16.mxu1 %v5719_v31  ;;  %v5801_v30 = vld [vmem:[%s6134_s6 + $0xb88] ss:$16 sps:$4 sm:$0xff]   ;;  %v5806_v31 = vld [vmem:[%s6134_s6 + $0xba4] ss:$16 sps:$4 sm:$0xff]  }
 0x152   : > { %3655 = vmatpush1.bf16.msra.mxu0 %v5714_v16  ;;  %3983 = vmatpush1.bf16.msra.mxu1 %v5717_v32  ;;  %v5809_v16 = vld [vmem:[%s6134_s6 + $0xbac] ss:$16 sps:$4 sm:$0xff]   ;;  %v5804_v32 = vld [vmem:[%s6134_s6 + $0xba0] ss:$16 sps:$4 sm:$0xff]  }
 0x153   : > { %3656 = vmatprep.subr.bf16.mxu0 %v5722_v33  ;;  %3984 = vmatprep.subr.bf16.mxu1 %v5725_v34  ;;  %v5807_v33 = vld [vmem:[%s6134_s6 + $0xba8] ss:$16 sps:$4 sm:$0xff]   ;;  %v5812_v34 = vld [vmem:[%s6134_s6 + $0xbc4] ss:$16 sps:$4 sm:$0xff]  }
 0x156   : > { %3657 = vmatpush1.bf16.msra.mxu0 %v5720_v26  ;;  %3985 = vmatpush1.bf16.msra.mxu1 %v5723_v35  ;;  %v5815_v26 = vld [vmem:[%s6134_s6 + $0xbcc] ss:$16 sps:$4 sm:$0xff]   ;;  %v837_v35 = vcombine.high %v6426_v22, %v6426_v22  ;;  %v5816_v22 = vld [vmem:[%s6134_s6 + $0xbe0] ss:$16 sps:$4 sm:$0xff]  }
 0x157   : > { %3667 = vmatprep.subr.bf16.mxu0 %v5728_v36  ;;  %3995 = vmatprep.subr.bf16.mxu1 %v5731_v14  ;;  %v5810_v36 = vld [vmem:[%s6134_s6 + $0xbc0] ss:$16 sps:$4 sm:$0xff]   ;;  %v5813_v14 = vld [vmem:[%s6134_s6 + $0xbc8] ss:$16 sps:$4 sm:$0xff]  }
 0x159   : > { %3659 = vmatmul.mubr.bf16.vlgmr.msra.gmra.mrb[0].mxu0 %v6515_v38  ;;  %3987 = vmatmul.mubr.bf16.vlgmr.msra.gmra.mrb[0].mxu1 %v6515_v38 }
 0x15a   : > { %3668 = vmatpush1.bf16.msra.mxu0 %v5726_v39  ;;  %3996 = vmatpush1.bf16.msra.mxu1 %v5729_v40  ;;  %v5818_v39 = vld [vmem:[%s6134_s6 + $0xbe4] ss:$16 sps:$4 sm:$0xff]   ;;  %v5821_v40 = vld [vmem:[%s6134_s6 + $0xbec] ss:$16 sps:$4 sm:$0xff]  }
 0x15b   : > { %3669 = vmatprep.subr.bf16.mxu0 %v5734_v41  ;;  %3997 = vmatprep.subr.bf16.mxu1 %v5737_v42  ;;  %v6584_v41 = vrot.slane %v837_v35, %v6184_v50  ;;  %v5819_v42 = vld [vmem:[%s6134_s6 + $0xbe8] ss:$16 sps:$4 sm:$0xff]  }
 0x15c   : > { %3699 = vmatprep.mubr.bf16.mxu0 %v884_v43  ;;  %4027 = vmatprep.mubr.bf16.mxu1 %v884_v43  ;;  %v5824_v43 = vld [vmem:[%s6134_s6 + $0xc04] ss:$16 sps:$4 sm:$0xff]   ;;  %v5897_v35 = vld [vmem:[%s6134_s6 + $0xd88] ss:$16 sps:$4 sm:$0xff]  }
 0x15e   : > { %3670 = vmatpush1.bf16.msra.mxu0 %v5732_v28  ;;  %3998 = vmatpush1.bf16.msra.mxu1 %v5735_v45  ;;  %v5827_v28 = vld [vmem:[%s6134_s6 + $0xc0c] ss:$16 sps:$4 sm:$0xff]   ;;  %v853_v45 = vcombine.high %v6584_v41, %v6584_v41 }
 0x15f   : > { %3671 = vmatprep.subr.bf16.mxu0 %v5740_v46  ;;  %3999 = vmatprep.subr.bf16.mxu1 %v5743_v47  ;;  %v882_v46 = vcombine.high %v6515_v38, %v6515_v38  ;;  %v5822_v47 = vld [vmem:[%s6134_s6 + $0xc00] ss:$16 sps:$4 sm:$0xff]  }
 0x160   : > { %v5828_v38 = vld [vmem:[%s6134_s6 + $0xc20] ss:$16 sps:$4 sm:$0xff]  }
 0x162   : > { %3672 = vmatpush1.bf16.msra.mxu0 %v5738_v37  ;;  %4000 = vmatpush1.bf16.msra.mxu1 %v5741_v48  ;;  %v5825_v37 = vld [vmem:[%s6134_s6 + $0xc08] ss:$16 sps:$4 sm:$0xff]   ;;  %v5830_v48 = vld [vmem:[%s6134_s6 + $0xc24] ss:$16 sps:$4 sm:$0xff]  }
 0x163   : > { %3673 = vmatprep.subr.bf16.mxu0 %v5746_v49  ;;  %4001 = vmatprep.subr.bf16.mxu1 %v5749_v51  ;;  %v5833_v49 = vld [vmem:[%s6134_s6 + $0xc2c] ss:$16 sps:$4 sm:$0xff]   ;;  %v6599_v51 = vrot.slane %v853_v45, %v6184_v50  ;;  %v5914_v45 = vld [vmem:[%s6134_s6 + $0xde4] ss:$16 sps:$4 sm:$0xff]  }
 0x166   : > { %3674 = vmatpush1.bf16.msra.mxu0 %v5744_v52  ;;  %4002 = vmatpush1.bf16.msra.mxu1 %v5747_v54  ;;  %v5831_v52 = vld [vmem:[%s6134_s6 + $0xc28] ss:$16 sps:$4 sm:$0xff]   ;;  %v5836_v54 = vld [vmem:[%s6134_s6 + $0xc44] ss:$16 sps:$4 sm:$0xff]  }
 0x167   : > { %3675 = vmatprep.subr.bf16.mxu0 %v5752_v55  ;;  %4003 = vmatprep.subr.bf16.mxu1 %v5755_v56  ;;  %v5839_v55 = vld [vmem:[%s6134_s6 + $0xc4c] ss:$16 sps:$4 sm:$0xff]   ;;  %v5834_v56 = vld [vmem:[%s6134_s6 + $0xc40] ss:$16 sps:$4 sm:$0xff]  }
 0x16a   : > { %3676 = vmatpush1.bf16.msra.mxu0 %v5750_v57  ;;  %4004 = vmatpush1.bf16.msra.mxu1 %v5753_v58  ;;  %v5837_v57 = vld [vmem:[%s6134_s6 + $0xc48] ss:$16 sps:$4 sm:$0xff]   ;;  %v5842_v58 = vld [vmem:[%s6134_s6 + $0xc64] ss:$16 sps:$4 sm:$0xff]  }
 0x16b   : > { %3677 = vmatprep.subr.bf16.mxu0 %v5758_v59  ;;  %4005 = vmatprep.subr.bf16.mxu1 %v5761_v60  ;;  %v5845_v59 = vld [vmem:[%s6134_s6 + $0xc6c] ss:$16 sps:$4 sm:$0xff]   ;;  %v5840_v60 = vld [vmem:[%s6134_s6 + $0xc60] ss:$16 sps:$4 sm:$0xff]  }
 0x16e   : > { %3678 = vmatpush1.bf16.msra.mxu0 %v5756_v61  ;;  %4006 = vmatpush1.bf16.msra.mxu1 %v5759_v62  ;;  %v5843_v61 = vld [vmem:[%s6134_s6 + $0xc68] ss:$16 sps:$4 sm:$0xff]   ;;  %v5848_v62 = vld [vmem:[%s6134_s6 + $0xc84] ss:$16 sps:$4 sm:$0xff]  }
 0x16f   : > { %3679 = vmatprep.subr.bf16.mxu0 %v5764_v63  ;;  %4007 = vmatprep.subr.bf16.mxu1 %v5767_v0  ;;  %v5851_v63 = vld [vmem:[%s6134_s6 + $0xc8c] ss:$16 sps:$4 sm:$0xff]   ;;  %v5846_v0 = vld [vmem:[%s6134_s6 + $0xc80] ss:$16 sps:$4 sm:$0xff]  }
 0x172   : > { %3680 = vmatpush1.bf16.msra.mxu0 %v5762_v1  ;;  %4008 = vmatpush1.bf16.msra.mxu1 %v5765_v2  ;;  %v5849_v1 = vld [vmem:[%s6134_s6 + $0xc88] ss:$16 sps:$4 sm:$0xff]   ;;  %v5854_v2 = vld [vmem:[%s6134_s6 + $0xca4] ss:$16 sps:$4 sm:$0xff]  }
 0x173   : > { %3681 = vmatprep.subr.bf16.mxu0 %v5770_v3  ;;  %4009 = vmatprep.subr.bf16.mxu1 %v5773_v4  ;;  %v5857_v3 = vld [vmem:[%s6134_s6 + $0xcac] ss:$16 sps:$4 sm:$0xff]   ;;  %v5852_v4 = vld [vmem:[%s6134_s6 + $0xca0] ss:$16 sps:$4 sm:$0xff]  }
 0x176   : > { %3682 = vmatpush1.bf16.msra.mxu0 %v5768_v5  ;;  %4010 = vmatpush1.bf16.msra.mxu1 %v5771_v6  ;;  %v5855_v5 = vld [vmem:[%s6134_s6 + $0xca8] ss:$16 sps:$4 sm:$0xff]   ;;  %v5860_v6 = vld [vmem:[%s6134_s6 + $0xcc4] ss:$16 sps:$4 sm:$0xff]  }
 0x177   : > { %3683 = vmatprep.subr.bf16.mxu0 %v5776_v7  ;;  %4011 = vmatprep.subr.bf16.mxu1 %v5779_v8  ;;  %v5863_v7 = vld [vmem:[%s6134_s6 + $0xccc] ss:$16 sps:$4 sm:$0xff]   ;;  %v5858_v8 = vld [vmem:[%s6134_s6 + $0xcc0] ss:$16 sps:$4 sm:$0xff]  }
 0x17a   : > { %3684 = vmatpush1.bf16.msra.mxu0 %v5774_v9  ;;  %4012 = vmatpush1.bf16.msra.mxu1 %v5777_v10  ;;  %v5861_v9 = vld [vmem:[%s6134_s6 + $0xcc8] ss:$16 sps:$4 sm:$0xff]   ;;  %v5866_v10 = vld [vmem:[%s6134_s6 + $0xce4] ss:$16 sps:$4 sm:$0xff]  }
 0x17b   : > { %3685 = vmatprep.subr.bf16.mxu0 %v5782_v11  ;;  %4013 = vmatprep.subr.bf16.mxu1 %v5785_v12  ;;  %v5869_v11 = vld [vmem:[%s6134_s6 + $0xcec] ss:$16 sps:$4 sm:$0xff]   ;;  %v5864_v12 = vld [vmem:[%s6134_s6 + $0xce0] ss:$16 sps:$4 sm:$0xff]  }
 0x17e   : > { %3686 = vmatpush1.bf16.msra.mxu0 %v5780_v13  ;;  %4014 = vmatpush1.bf16.msra.mxu1 %v5783_v15  ;;  %v5867_v13 = vld [vmem:[%s6134_s6 + $0xce8] ss:$16 sps:$4 sm:$0xff]   ;;  %v5872_v15 = vld [vmem:[%s6134_s6 + $0xd04] ss:$16 sps:$4 sm:$0xff]  }
 0x17f   : > { %3687 = vmatprep.subr.bf16.mxu0 %v5788_v17  ;;  %4015 = vmatprep.subr.bf16.mxu1 %v5791_v53  ;;  %v5875_v17 = vld [vmem:[%s6134_s6 + $0xd0c] ss:$16 sps:$4 sm:$0xff]   ;;  %v5870_v53 = vld [vmem:[%s6134_s6 + $0xd00] ss:$16 sps:$4 sm:$0xff]  }
 0x182   : > { %3688 = vmatpush1.bf16.msra.mxu0 %v5786_v18  ;;  %4016 = vmatpush1.bf16.msra.mxu1 %v5789_v19  ;;  %v5873_v18 = vld [vmem:[%s6134_s6 + $0xd08] ss:$16 sps:$4 sm:$0xff]   ;;  %v5878_v19 = vld [vmem:[%s6134_s6 + $0xd24] ss:$16 sps:$4 sm:$0xff]  }
 0x183   : > { %3689 = vmatprep.subr.bf16.mxu0 %v5794_v20  ;;  %4017 = vmatprep.subr.bf16.mxu1 %v5797_v21  ;;  %v5881_v20 = vld [vmem:[%s6134_s6 + $0xd2c] ss:$16 sps:$4 sm:$0xff]   ;;  %v5876_v21 = vld [vmem:[%s6134_s6 + $0xd20] ss:$16 sps:$4 sm:$0xff]  }
 0x186   : > { %3690 = vmatpush1.bf16.msra.mxu0 %v5792_v23  ;;  %4018 = vmatpush1.bf16.msra.mxu1 %v5795_v24  ;;  %v5879_v23 = vld [vmem:[%s6134_s6 + $0xd28] ss:$16 sps:$4 sm:$0xff]   ;;  %v5884_v24 = vld [vmem:[%s6134_s6 + $0xd44] ss:$16 sps:$4 sm:$0xff]  }
 0x187   : > { %3691 = vmatprep.subr.bf16.mxu0 %v5800_v25  ;;  %4019 = vmatprep.subr.bf16.mxu1 %v5803_v27  ;;  %v5887_v25 = vld [vmem:[%s6134_s6 + $0xd4c] ss:$16 sps:$4 sm:$0xff]   ;;  %v5882_v27 = vld [vmem:[%s6134_s6 + $0xd40] ss:$16 sps:$4 sm:$0xff]  }
 0x18a   : > { %3692 = vmatpush1.bf16.msra.mxu0 %v5798_v29  ;;  %4020 = vmatpush1.bf16.msra.mxu1 %v5801_v30  ;;  %v5885_v29 = vld [vmem:[%s6134_s6 + $0xd48] ss:$16 sps:$4 sm:$0xff]   ;;  %v5890_v30 = vld [vmem:[%s6134_s6 + $0xd64] ss:$16 sps:$4 sm:$0xff]  }
 0x18b   : > { %3693 = vmatprep.subr.bf16.mxu0 %v5806_v31  ;;  %4021 = vmatprep.subr.bf16.mxu1 %v5809_v16  ;;  %v5893_v31 = vld [vmem:[%s6134_s6 + $0xd6c] ss:$16 sps:$4 sm:$0xff]   ;;  %v5888_v16 = vld [vmem:[%s6134_s6 + $0xd60] ss:$16 sps:$4 sm:$0xff]  }
 0x18e   : > { %3694 = vmatpush1.bf16.msra.mxu0 %v5804_v32  ;;  %4022 = vmatpush1.bf16.msra.mxu1 %v5807_v33  ;;  %v5891_v32 = vld [vmem:[%s6134_s6 + $0xd68] ss:$16 sps:$4 sm:$0xff]   ;;  %v5896_v33 = vld [vmem:[%s6134_s6 + $0xd84] ss:$16 sps:$4 sm:$0xff]  }
 0x18f   : > { %3695 = vmatprep.subr.bf16.mxu0 %v5812_v34  ;;  %4023 = vmatprep.subr.bf16.mxu1 %v5815_v26  ;;  %v5899_v34 = vld [vmem:[%s6134_s6 + $0xd8c] ss:$16 sps:$4 sm:$0xff]   ;;  %v5894_v26 = vld [vmem:[%s6134_s6 + $0xd80] ss:$16 sps:$4 sm:$0xff]  }
 0x192   : > { %3696 = vmatpush1.bf16.msra.mxu0 %v5810_v36  ;;  %4024 = vmatpush1.bf16.msra.mxu1 %v5813_v14  ;;  %v5902_v36 = vld [vmem:[%s6134_s6 + $0xda4] ss:$16 sps:$4 sm:$0xff]   ;;  %v5905_v14 = vld [vmem:[%s6134_s6 + $0xdac] ss:$16 sps:$4 sm:$0xff]  }
 0x193   : > { %3697 = vmatprep.subr.bf16.mxu0 %v5818_v39  ;;  %4025 = vmatprep.subr.bf16.mxu1 %v5821_v40  ;;  %v5900_v39 = vld [vmem:[%s6134_s6 + $0xda0] ss:$16 sps:$4 sm:$0xff]   ;;  %v5903_v40 = vld [vmem:[%s6134_s6 + $0xda8] ss:$16 sps:$4 sm:$0xff]  }
 0x196   : > { %3698 = vmatpush1.bf16.msra.mxu0 %v5816_v22  ;;  %4026 = vmatpush1.bf16.msra.mxu1 %v5819_v42  ;;  %v5908_v22 = vld [vmem:[%s6134_s6 + $0xdc4] ss:$16 sps:$4 sm:$0xff]   ;;  %v5911_v42 = vld [vmem:[%s6134_s6 + $0xdcc] ss:$16 sps:$4 sm:$0xff]  }
 0x197   : > { %3708 = vmatprep.subr.bf16.mxu0 %v5824_v43  ;;  %4036 = vmatprep.subr.bf16.mxu1 %v5827_v28  ;;  %v5906_v43 = vld [vmem:[%s6134_s6 + $0xdc0] ss:$16 sps:$4 sm:$0xff]   ;;  %v5909_v28 = vld [vmem:[%s6134_s6 + $0xdc8] ss:$16 sps:$4 sm:$0xff]  }
 0x199   : > { %3700 = vmatmul.mubr.bf16.vlgmr.msra.gmra.mrb[0].mxu0 %v882_v46  ;;  %4028 = vmatmul.mubr.bf16.vlgmr.msra.gmra.mrb[0].mxu1 %v882_v46  ;;  %v5917_v46 = vld [vmem:[%s6134_s6 + $0xdec] ss:$16 sps:$4 sm:$0xff]  }
 0x19a   : > { %3709 = vmatpush1.bf16.msra.mxu0 %v5822_v47  ;;  %4037 = vmatpush1.bf16.msra.mxu1 %v5825_v37  ;;  %v5912_v47 = vld [vmem:[%s6134_s6 + $0xde0] ss:$16 sps:$4 sm:$0xff]   ;;  %v5915_v37 = vld [vmem:[%s6134_s6 + $0xde8] ss:$16 sps:$4 sm:$0xff]  }
 0x19b   : > { %3710 = vmatprep.subr.bf16.mxu0 %v5830_v48  ;;  %4038 = vmatprep.subr.bf16.mxu1 %v5833_v49  ;;  %v5921_v48 = vld [vmem:[%s6134_s6 + $0xe04] ss:$16 sps:$4 sm:$0xff]   ;;  %v5924_v49 = vld [vmem:[%s6134_s6 + $0xe0c] ss:$16 sps:$4 sm:$0xff]  }
 0x19c   : > { %3740 = vmatprep.mubr.bf16.mxu0 %v6599_v51  ;;  %4068 = vmatprep.mubr.bf16.mxu1 %v6599_v51 }
 0x19e   : > { %3711 = vmatpush1.bf16.msra.mxu0 %v5828_v38  ;;  %4039 = vmatpush1.bf16.msra.mxu1 %v5831_v52  ;;  %v6665_v38 = vrot.slane %v6584_v41, %v6184_v50  ;;  %v5919_v52 = vld [vmem:[%s6134_s6 + $0xe00] ss:$16 sps:$4 sm:$0xff]   ;;  %v5928_v41 = vld [vmem:[%s6134_s6 + $0xe28] ss:$16 sps:$4 sm:$0xff]  }
 0x19f   : > { %3712 = vmatprep.subr.bf16.mxu0 %v5836_v54  ;;  %4040 = vmatprep.subr.bf16.mxu1 %v5839_v55  ;;  %v5922_v54 = vld [vmem:[%s6134_s6 + $0xe08] ss:$16 sps:$4 sm:$0xff]   ;;  %v5927_v55 = vld [vmem:[%s6134_s6 + $0xe24] ss:$16 sps:$4 sm:$0xff]   ;;  %v5925_v50 = vld [vmem:[%s6134_s6 + $0xe20] ss:$16 sps:$4 sm:$0xff]  }
 0x1a2   : > { %3713 = vmatpush1.bf16.msra.mxu0 %v5834_v56  ;;  %4041 = vmatpush1.bf16.msra.mxu1 %v5837_v57  ;;  %v5930_v56 = vld [vmem:[%s6134_s6 + $0xe2c] ss:$16 sps:$4 sm:$0xff]   ;;  %v885_v57 = vcombine.high %v6599_v51, %v6599_v51  ;;  %v5931_v51 = vld [vmem:[%s6134_s6 + $0xe40] ss:$16 sps:$4 sm:$0xff]  }
 0x1a3   : > { %3714 = vmatprep.subr.bf16.mxu0 %v5842_v58  ;;  %4042 = vmatprep.subr.bf16.mxu1 %v5845_v59  ;;  %v5933_v58 = vld [vmem:[%s6134_s6 + $0xe44] ss:$16 sps:$4 sm:$0xff]   ;;  %v5936_v59 = vld [vmem:[%s6134_s6 + $0xe4c] ss:$16 sps:$4 sm:$0xff]  }
 0x1a6   : > { %3715 = vmatpush1.bf16.msra.mxu0 %v5840_v60  ;;  %4043 = vmatpush1.bf16.msra.mxu1 %v5843_v61  ;;  %v5934_v60 = vld [vmem:[%s6134_s6 + $0xe48] ss:$16 sps:$4 sm:$0xff]   ;;  %v5939_v61 = vld [vmem:[%s6134_s6 + $0xe64] ss:$16 sps:$4 sm:$0xff]  }
 0x1a7   : > { %3716 = vmatprep.subr.bf16.mxu0 %v5848_v62  ;;  %4044 = vmatprep.subr.bf16.mxu1 %v5851_v63  ;;  %v5942_v62 = vld [vmem:[%s6134_s6 + $0xe6c] ss:$16 sps:$4 sm:$0xff]   ;;  %v5937_v63 = vld [vmem:[%s6134_s6 + $0xe60] ss:$16 sps:$4 sm:$0xff]  }
 0x1aa   : > { %3717 = vmatpush1.bf16.msra.mxu0 %v5846_v0  ;;  %4045 = vmatpush1.bf16.msra.mxu1 %v5849_v1  ;;  %v5940_v0 = vld [vmem:[%s6134_s6 + $0xe68] ss:$16 sps:$4 sm:$0xff]   ;;  %v5945_v1 = vld [vmem:[%s6134_s6 + $0xe84] ss:$16 sps:$4 sm:$0xff]  }
 0x1ab   : > { %3718 = vmatprep.subr.bf16.mxu0 %v5854_v2  ;;  %4046 = vmatprep.subr.bf16.mxu1 %v5857_v3  ;;  %v5948_v2 = vld [vmem:[%s6134_s6 + $0xe8c] ss:$16 sps:$4 sm:$0xff]   ;;  %v5943_v3 = vld [vmem:[%s6134_s6 + $0xe80] ss:$16 sps:$4 sm:$0xff]  }
 0x1ae   : > { %3719 = vmatpush1.bf16.msra.mxu0 %v5852_v4  ;;  %4047 = vmatpush1.bf16.msra.mxu1 %v5855_v5  ;;  %v5946_v4 = vld [vmem:[%s6134_s6 + $0xe88] ss:$16 sps:$4 sm:$0xff]   ;;  %v5951_v5 = vld [vmem:[%s6134_s6 + $0xea4] ss:$16 sps:$4 sm:$0xff]  }
 0x1af   : > { %3720 = vmatprep.subr.bf16.mxu0 %v5860_v6  ;;  %4048 = vmatprep.subr.bf16.mxu1 %v5863_v7  ;;  %v5954_v6 = vld [vmem:[%s6134_s6 + $0xeac] ss:$16 sps:$4 sm:$0xff]   ;;  %v5949_v7 = vld [vmem:[%s6134_s6 + $0xea0] ss:$16 sps:$4 sm:$0xff]  }
 0x1b2   : > { %3721 = vmatpush1.bf16.msra.mxu0 %v5858_v8  ;;  %4049 = vmatpush1.bf16.msra.mxu1 %v5861_v9  ;;  %v5952_v8 = vld [vmem:[%s6134_s6 + $0xea8] ss:$16 sps:$4 sm:$0xff]   ;;  %v5957_v9 = vld [vmem:[%s6134_s6 + $0xec4] ss:$16 sps:$4 sm:$0xff]  }
 0x1b3   : > { %3722 = vmatprep.subr.bf16.mxu0 %v5866_v10  ;;  %4050 = vmatprep.subr.bf16.mxu1 %v5869_v11  ;;  %v5960_v10 = vld [vmem:[%s6134_s6 + $0xecc] ss:$16 sps:$4 sm:$0xff]   ;;  %v5955_v11 = vld [vmem:[%s6134_s6 + $0xec0] ss:$16 sps:$4 sm:$0xff]  }
 0x1b6   : > { %3723 = vmatpush1.bf16.msra.mxu0 %v5864_v12  ;;  %4051 = vmatpush1.bf16.msra.mxu1 %v5867_v13  ;;  %v5958_v12 = vld [vmem:[%s6134_s6 + $0xec8] ss:$16 sps:$4 sm:$0xff]   ;;  %v5963_v13 = vld [vmem:[%s6134_s6 + $0xee4] ss:$16 sps:$4 sm:$0xff]  }
 0x1b7   : > { %3724 = vmatprep.subr.bf16.mxu0 %v5872_v15  ;;  %4052 = vmatprep.subr.bf16.mxu1 %v5875_v17  ;;  %v5966_v15 = vld [vmem:[%s6134_s6 + $0xeec] ss:$16 sps:$4 sm:$0xff]   ;;  %v5961_v17 = vld [vmem:[%s6134_s6 + $0xee0] ss:$16 sps:$4 sm:$0xff]  }
 0x1ba   : > { %3725 = vmatpush1.bf16.msra.mxu0 %v5870_v53  ;;  %4053 = vmatpush1.bf16.msra.mxu1 %v5873_v18  ;;  %v5964_v53 = vld [vmem:[%s6134_s6 + $0xee8] ss:$16 sps:$4 sm:$0xff]   ;;  %v5969_v18 = vld [vmem:[%s6134_s6 + $0xf04] ss:$16 sps:$4 sm:$0xff]  }
 0x1bb   : > { %3726 = vmatprep.subr.bf16.mxu0 %v5878_v19  ;;  %4054 = vmatprep.subr.bf16.mxu1 %v5881_v20  ;;  %v5972_v19 = vld [vmem:[%s6134_s6 + $0xf0c] ss:$16 sps:$4 sm:$0xff]   ;;  %v5967_v20 = vld [vmem:[%s6134_s6 + $0xf00] ss:$16 sps:$4 sm:$0xff]  }
 0x1be   : > { %3727 = vmatpush1.bf16.msra.mxu0 %v5876_v21  ;;  %4055 = vmatpush1.bf16.msra.mxu1 %v5879_v23  ;;  %v5970_v21 = vld [vmem:[%s6134_s6 + $0xf08] ss:$16 sps:$4 sm:$0xff]   ;;  %v5975_v23 = vld [vmem:[%s6134_s6 + $0xf24] ss:$16 sps:$4 sm:$0xff]  }
 0x1bf   : > { %3728 = vmatprep.subr.bf16.mxu0 %v5884_v24  ;;  %4056 = vmatprep.subr.bf16.mxu1 %v5887_v25  ;;  %v5978_v24 = vld [vmem:[%s6134_s6 + $0xf2c] ss:$16 sps:$4 sm:$0xff]   ;;  %v5973_v25 = vld [vmem:[%s6134_s6 + $0xf20] ss:$16 sps:$4 sm:$0xff]  }
 0x1c2   : > { %3729 = vmatpush1.bf16.msra.mxu0 %v5882_v27  ;;  %4057 = vmatpush1.bf16.msra.mxu1 %v5885_v29  ;;  %v5976_v27 = vld [vmem:[%s6134_s6 + $0xf28] ss:$16 sps:$4 sm:$0xff]   ;;  %v5981_v29 = vld [vmem:[%s6134_s6 + $0xf44] ss:$16 sps:$4 sm:$0xff]  }
 0x1c3   : > { %3730 = vmatprep.subr.bf16.mxu0 %v5890_v30  ;;  %4058 = vmatprep.subr.bf16.mxu1 %v5893_v31  ;;  %v5984_v30 = vld [vmem:[%s6134_s6 + $0xf4c] ss:$16 sps:$4 sm:$0xff]   ;;  %v5979_v31 = vld [vmem:[%s6134_s6 + $0xf40] ss:$16 sps:$4 sm:$0xff]  }
 0x1c6   : > { %3731 = vmatpush1.bf16.msra.mxu0 %v5888_v16  ;;  %4059 = vmatpush1.bf16.msra.mxu1 %v5891_v32  ;;  %v5982_v16 = vld [vmem:[%s6134_s6 + $0xf48] ss:$16 sps:$4 sm:$0xff]   ;;  %v5987_v32 = vld [vmem:[%s6134_s6 + $0xf64] ss:$16 sps:$4 sm:$0xff]  }
 0x1c7   : > { %3732 = vmatprep.subr.bf16.mxu0 %v5896_v33  ;;  %4060 = vmatprep.subr.bf16.mxu1 %v5899_v34  ;;  %v5990_v33 = vld [vmem:[%s6134_s6 + $0xf6c] ss:$16 sps:$4 sm:$0xff]   ;;  %v5985_v34 = vld [vmem:[%s6134_s6 + $0xf60] ss:$16 sps:$4 sm:$0xff]  }
 0x1ca   : > { %3733 = vmatpush1.bf16.msra.mxu0 %v5894_v26  ;;  %4061 = vmatpush1.bf16.msra.mxu1 %v5897_v35  ;;  %v5988_v26 = vld [vmem:[%s6134_s6 + $0xf68] ss:$16 sps:$4 sm:$0xff]   ;;  %v5993_v35 = vld [vmem:[%s6134_s6 + $0xf84] ss:$16 sps:$4 sm:$0xff]  }
 0x1cb   : > { %3734 = vmatprep.subr.bf16.mxu0 %v5902_v36  ;;  %4062 = vmatprep.subr.bf16.mxu1 %v5905_v14  ;;  %v5996_v36 = vld [vmem:[%s6134_s6 + $0xf8c] ss:$16 sps:$4 sm:$0xff]   ;;  %v5991_v14 = vld [vmem:[%s6134_s6 + $0xf80] ss:$16 sps:$4 sm:$0xff]  }
 0x1ce   : > { %3735 = vmatpush1.bf16.msra.mxu0 %v5900_v39  ;;  %4063 = vmatpush1.bf16.msra.mxu1 %v5903_v40  ;;  %v5994_v39 = vld [vmem:[%s6134_s6 + $0xf88] ss:$16 sps:$4 sm:$0xff]   ;;  %v5999_v40 = vld [vmem:[%s6134_s6 + $0xfa4] ss:$16 sps:$4 sm:$0xff]  }
 0x1cf   : > { %3736 = vmatprep.subr.bf16.mxu0 %v5908_v22  ;;  %4064 = vmatprep.subr.bf16.mxu1 %v5911_v42  ;;  %v6002_v22 = vld [vmem:[%s6134_s6 + $0xfac] ss:$16 sps:$4 sm:$0xff]   ;;  %v5997_v42 = vld [vmem:[%s6134_s6 + $0xfa0] ss:$16 sps:$4 sm:$0xff]  }
 0x1d2   : > { %3737 = vmatpush1.bf16.msra.mxu0 %v5906_v43  ;;  %4065 = vmatpush1.bf16.msra.mxu1 %v5909_v28  ;;  %v6000_v43 = vld [vmem:[%s6134_s6 + $0xfa8] ss:$16 sps:$4 sm:$0xff]   ;;  %v6005_v28 = vld [vmem:[%s6134_s6 + $0xfc4] ss:$16 sps:$4 sm:$0xff]  }
 0x1d3   : > { %3738 = vmatprep.subr.bf16.mxu0 %v5914_v45  ;;  %4066 = vmatprep.subr.bf16.mxu1 %v5917_v46  ;;  %v6008_v45 = vld [vmem:[%s6134_s6 + $0xfcc] ss:$16 sps:$4 sm:$0xff]   ;;  %v6003_v46 = vld [vmem:[%s6134_s6 + $0xfc0] ss:$16 sps:$4 sm:$0xff]  }
 0x1d6   : > { %3739 = vmatpush1.bf16.msra.mxu0 %v5912_v47  ;;  %4067 = vmatpush1.bf16.msra.mxu1 %v5915_v37  ;;  %v6006_v47 = vld [vmem:[%s6134_s6 + $0xfc8] ss:$16 sps:$4 sm:$0xff]   ;;  %v6011_v37 = vld [vmem:[%s6134_s6 + $0xfe4] ss:$16 sps:$4 sm:$0xff]  }
 0x1d7   : > { %3749 = vmatprep.subr.bf16.mxu0 %v5921_v48  ;;  %4077 = vmatprep.subr.bf16.mxu1 %v5924_v49  ;;  %v6014_v48 = vld [vmem:[%s6134_s6 + $0xfec] ss:$16 sps:$4 sm:$0xff]   ;;  %v6009_v49 = vld [vmem:[%s6134_s6 + $0xfe0] ss:$16 sps:$4 sm:$0xff]  }
 0x1d9   : > { %3741 = vmatmul.mubr.bf16.vlgmr.msra.gmra.mrb[0].mxu0 %v6665_v38  ;;  %4069 = vmatmul.mubr.bf16.vlgmr.msra.gmra.mrb[0].mxu1 %v6665_v38 }
 0x1da   : > { %3750 = vmatpush1.bf16.msra.mxu0 %v5919_v52  ;;  %4078 = vmatpush1.bf16.msra.mxu1 %v5922_v54  ;;  %v6012_v52 = vld [vmem:[%s6134_s6 + $0xfe8] ss:$16 sps:$4 sm:$0xff]   ;;  %v883_v54 = vcombine.high %v6665_v38, %v6665_v38 }
 0x1db   : > { %3751 = vmatprep.subr.bf16.mxu0 %v5927_v55  ;;  %4079 = vmatprep.subr.bf16.mxu1 %v5930_v56  ;;  %v6071_v55 = vmov 1983009808  }
 0x1dc   : > { %3781 = vmatprep.mubr.bf16.mxu0 %v885_v57  ;;  %4109 = vmatprep.mubr.bf16.mxu1 %v885_v57  ;;  %v4125_v56 = vunpack.c.l.s4 %v6071_v55  ;;  %v4223_v55 = vld [vmem:[%s6987_s3 + $0x130] sm:$0xff] (!%p5014_p7) }
 0x1de   : > { %3752 = vmatpush1.bf16.msra.mxu0 %v5925_v50  ;;  %4080 = vmatpush1.bf16.msra.mxu1 %v5928_v41  ;;  %v4126_v57 = vunpack.c.0.s8 %v4125_v56  ;;  %v4224_v56 = vld [vmem:[%s6987_s3 + $0x138] sm:$0xff] (!%p5014_p7) }
 0x1df   : > { %3753 = vmatprep.subr.bf16.mxu0 %v5933_v58  ;;  %4081 = vmatprep.subr.bf16.mxu1 %v5936_v59 }
 0x1e0   : > { %v6736_v58 = vsub.s32 %v4126_v57, %v6176_v44  ;;  %v4209_v57 = vld [vmem:[%s6987_s3 + $0xc0] sm:$0xff] (!%p5014_p7) }
 0x1e2   : > { %3754 = vmatpush1.bf16.msra.mxu0 %v5931_v51  ;;  %4082 = vmatpush1.bf16.msra.mxu1 %v5934_v60 }
 0x1e3   : > { %3755 = vmatprep.subr.bf16.mxu0 %v5939_v61  ;;  %4083 = vmatprep.subr.bf16.mxu1 %v5942_v62 }
 0x1e6   : > { %3756 = vmatpush1.bf16.msra.mxu0 %v5937_v63  ;;  %4084 = vmatpush1.bf16.msra.mxu1 %v5940_v0 }
 0x1e7   : > { %3757 = vmatprep.subr.bf16.mxu0 %v5945_v1  ;;  %4085 = vmatprep.subr.bf16.mxu1 %v5948_v2 }
 0x1ea   : > { %3758 = vmatpush1.bf16.msra.mxu0 %v5943_v3  ;;  %4086 = vmatpush1.bf16.msra.mxu1 %v5946_v4  ;;  %v271_v3 = vld [vmem:[#allocation2] sm:$0xff] }
 0x1eb   : > { %3759 = vmatprep.subr.bf16.mxu0 %v5951_v5  ;;  %4087 = vmatprep.subr.bf16.mxu1 %v5954_v6  ;;  %v4201_v6 = vld [vmem:[%s6987_s3 + $0x80] sm:$0xff] (!%p5014_p7) }
 0x1ee   : > { %3760 = vmatpush1.bf16.msra.mxu0 %v5949_v7  ;;  %4088 = vmatpush1.bf16.msra.mxu1 %v5952_v8  ;;  %v4202_v7 = vld [vmem:[%s6987_s3 + $0x88] sm:$0xff] (!%p5014_p7)  ;;  %v4185_v8 = vld [vmem:[%s6987_s3] sm:$0xff] (!%p5014_p7) }
 0x1ef   : > { %3761 = vmatprep.subr.bf16.mxu0 %v5957_v9  ;;  %4089 = vmatprep.subr.bf16.mxu1 %v5960_v10  ;;  %v5091_v9 = vpack.c.bf16 (!%p5014_p7), %v4202_v7, %v4201_v6  ;;  %v4186_v10 = vld [vmem:[%s6987_s3 + $0x8] sm:$0xff] (!%p5014_p7) }
 0x1f2   : > { %3762 = vmatpush1.bf16.msra.mxu0 %v5955_v11  ;;  %4090 = vmatpush1.bf16.msra.mxu1 %v5958_v12  ;;  %v4233_v11 = vld [vmem:[%s6987_s3 + $0x180] sm:$0xff] (!%p5014_p7)  ;;  %v4234_v12 = vld [vmem:[%s6987_s3 + $0x188] sm:$0xff] (!%p5014_p7) }
 0x1f3   : > { %3763 = vmatprep.subr.bf16.mxu0 %v5963_v13  ;;  %4091 = vmatprep.subr.bf16.mxu1 %v5966_v15  ;;  %v5093_v13 = vpack.c.bf16 (!%p5014_p7), %v4186_v10, %v4185_v8  ;;  %v5123_v15 = vpack.c.bf16 (!%p5014_p7), %v4234_v12, %v4233_v11  ;;  %v4196_v10 = vld [vmem:[%s6987_s3 + $0x58] sm:$0xff] (!%p5014_p7)  ;;  %v4227_v11 = vld [vmem:[%s6987_s3 + $0x150] sm:$0xff] (!%p5014_p7) }
 0x1f6   : > { %3764 = vmatpush1.bf16.msra.mxu0 %v5961_v17  ;;  %4092 = vmatpush1.bf16.msra.mxu1 %v5964_v53  ;;  %v4217_v17 = vld [vmem:[%s6987_s3 + $0x100] sm:$0xff] (!%p5014_p7)  ;;  %v4218_v53 = vld [vmem:[%s6987_s3 + $0x108] sm:$0xff] (!%p5014_p7) }
 0x1f7   : > { %3765 = vmatprep.subr.bf16.mxu0 %v5969_v18  ;;  %4093 = vmatprep.subr.bf16.mxu1 %v5972_v19  ;;  %v4203_v18 = vld [vmem:[%s6987_s3 + $0x90] sm:$0xff] (!%p5014_p7)  ;;  %v5125_v19 = vpack.c.bf16 (!%p5014_p7), %v4218_v53, %v4217_v17  ;;  %v4214_v17 = vld [vmem:[%s6987_s3 + $0xe8] sm:$0xff] (!%p5014_p7)  ;;  %v4151_v53 = vsub.s32 (!%p5014_p7), 0, %v6176_v44 }
 0x1fa   : > { %3766 = vmatpush1.bf16.msra.mxu0 %v5967_v20  ;;  %4094 = vmatpush1.bf16.msra.mxu1 %v5970_v21  ;;  %v4204_v20 = vld [vmem:[%s6987_s3 + $0x98] sm:$0xff] (!%p5014_p7)  ;;  %v4187_v21 = vld [vmem:[%s6987_s3 + $0x10] sm:$0xff] (!%p5014_p7) }
 0x1fb   : > { %3767 = vmatprep.subr.bf16.mxu0 %v5975_v23  ;;  %4095 = vmatprep.subr.bf16.mxu1 %v5978_v24  ;;  %v4188_v23 = vld [vmem:[%s6987_s3 + $0x18] sm:$0xff] (!%p5014_p7)  ;;  %v5095_v24 = vpack.c.bf16 (!%p5014_p7), %v4204_v20, %v4203_v18  ;;  %v4155_v18 = vsub.s32 (!%p5014_p7), 1, %v6176_v44  ;;  %v4245_v20 = vld [vmem:[%s6987_s3 + $0x1e0] sm:$0xff] (!%p5014_p7) }
 0x1fe   : > { %3768 = vmatpush1.bf16.msra.mxu0 %v5973_v25  ;;  %4096 = vmatpush1.bf16.msra.mxu1 %v5976_v27  ;;  %v5097_v25 = vpack.c.bf16 (!%p5014_p7), %v4188_v23, %v4187_v21  ;;  %v4235_v27 = vld [vmem:[%s6987_s3 + $0x190] sm:$0xff] (!%p5014_p7)  ;;  %v4246_v21 = vld [vmem:[%s6987_s3 + $0x1e8] sm:$0xff] (!%p5014_p7)  ;;  %v4163_v23 = vsub.s32 (!%p5014_p7), 3, %v6176_v44 }
 0x1ff   : > { %3769 = vmatprep.subr.bf16.mxu0 %v5981_v29  ;;  %4097 = vmatprep.subr.bf16.mxu1 %v5984_v30  ;;  %v4236_v29 = vld [vmem:[%s6987_s3 + $0x198] sm:$0xff] (!%p5014_p7)  ;;  %v4219_v30 = vld [vmem:[%s6987_s3 + $0x110] sm:$0xff] (!%p5014_p7) }
 0x202   : > { %3770 = vmatpush1.bf16.msra.mxu0 %v5979_v31  ;;  %4098 = vmatpush1.bf16.msra.mxu1 %v5982_v16  ;;  %v5127_v31 = vpack.c.bf16 (!%p5014_p7), %v4236_v29, %v4235_v27  ;;  %v4220_v16 = vld [vmem:[%s6987_s3 + $0x118] sm:$0xff] (!%p5014_p7) }
 0x203   : > { %3771 = vmatprep.subr.bf16.mxu0 %v5987_v32  ;;  %4099 = vmatprep.subr.bf16.mxu1 %v5990_v33  ;;  %v4205_v32 = vld [vmem:[%s6987_s3 + $0xa0] sm:$0xff] (!%p5014_p7)  ;;  %v4206_v33 = vld [vmem:[%s6987_s3 + $0xa8] sm:$0xff] (!%p5014_p7) }
 0x206   : > { %3772 = vmatpush1.bf16.msra.mxu0 %v5985_v34  ;;  %4100 = vmatpush1.bf16.msra.mxu1 %v5988_v26  ;;  %v5129_v34 = vpack.c.bf16 (!%p5014_p7), %v4220_v16, %v4219_v30  ;;  %v5099_v26 = vpack.c.bf16 (!%p5014_p7), %v4206_v33, %v4205_v32  ;;  %v4198_v30 = vld [vmem:[%s6987_s3 + $0x68] sm:$0xff] (!%p5014_p7)  ;;  %v5147_v16 = vpack.c.bf16 (!%p5014_p7), %v4246_v21, %v4245_v20  ;;  %v4215_v33 = vld [vmem:[%s6987_s3 + $0xf0] sm:$0xff] (!%p5014_p7) }
 0x207   : > { %3773 = vmatprep.subr.bf16.mxu0 %v5993_v35  ;;  %4101 = vmatprep.subr.bf16.mxu1 %v5996_v36  ;;  %v4189_v35 = vld [vmem:[%s6987_s3 + $0x20] sm:$0xff] (!%p5014_p7)  ;;  %v4190_v36 = vld [vmem:[%s6987_s3 + $0x28] sm:$0xff] (!%p5014_p7) }
 0x208   : > { %v4230_v32 = vld [vmem:[%s6987_s3 + $0x168] sm:$0xff] (!%p5014_p7) }
 0x20a   : > { %3774 = vmatpush1.bf16.msra.mxu0 %v5991_v14  ;;  %4102 = vmatpush1.bf16.msra.mxu1 %v5994_v39  ;;  %v4237_v14 = vld [vmem:[%s6987_s3 + $0x1a0] sm:$0xff] (!%p5014_p7)  ;;  %v4238_v39 = vld [vmem:[%s6987_s3 + $0x1a8] sm:$0xff] (!%p5014_p7) }
 0x20b   : > { %3775 = vmatprep.subr.bf16.mxu0 %v5999_v40  ;;  %4103 = vmatprep.subr.bf16.mxu1 %v6002_v22  ;;  %v4221_v40 = vld [vmem:[%s6987_s3 + $0x120] sm:$0xff] (!%p5014_p7)  ;;  %v4222_v22 = vld [vmem:[%s6987_s3 + $0x128] sm:$0xff] (!%p5014_p7) }
 0x20e   : > { %3776 = vmatpush1.bf16.msra.mxu0 %v5997_v42  ;;  %4104 = vmatpush1.bf16.msra.mxu1 %v6000_v43  ;;  %v5101_v42 = vpack.c.bf16 (!%p5014_p7), %v4190_v36, %v4189_v35  ;;  %v5131_v43 = vpack.c.bf16 (!%p5014_p7), %v4238_v39, %v4237_v14  ;;  %v4247_v14 = vld [vmem:[%s6987_s3 + $0x1f0] sm:$0xff] (!%p5014_p7)  ;;  %v4248_v39 = vld [vmem:[%s6987_s3 + $0x1f8] sm:$0xff] (!%p5014_p7) }
 0x20f   : > { %3777 = vmatprep.subr.bf16.mxu0 %v6005_v28  ;;  %4105 = vmatprep.subr.bf16.mxu1 %v6008_v45  ;;  %v4207_v28 = vld [vmem:[%s6987_s3 + $0xb0] sm:$0xff] (!%p5014_p7)  ;;  %v4208_v45 = vld [vmem:[%s6987_s3 + $0xb8] sm:$0xff] (!%p5014_p7) }
 0x212   : > { %3778 = vmatpush1.bf16.msra.mxu0 %v6003_v46  ;;  %4106 = vmatpush1.bf16.msra.mxu1 %v6006_v47  ;;  %v4191_v46 = vld [vmem:[%s6987_s3 + $0x30] sm:$0xff] (!%p5014_p7)  ;;  %v5133_v47 = vpack.c.bf16 (!%p5014_p7), %v4222_v22, %v4221_v40 }
 0x213   : > { %3779 = vmatprep.subr.bf16.mxu0 %v6011_v37  ;;  %4107 = vmatprep.subr.bf16.mxu1 %v6014_v48  ;;  %v5103_v37 = vpack.c.bf16 (!%p5014_p7), %v4208_v45, %v4207_v28  ;;  %v4192_v48 = vld [vmem:[%s6987_s3 + $0x38] sm:$0xff] (!%p5014_p7)  ;;  %v4199_v45 = vld [vmem:[%s6987_s3 + $0x70] sm:$0xff] (!%p5014_p7) }
 0x216   : > { %3780 = vmatpush1.bf16.msra.mxu0 %v6009_v49  ;;  %4108 = vmatpush1.bf16.msra.mxu1 %v6012_v52  ;;  %v4239_v49 = vld [vmem:[%s6987_s3 + $0x1b0] sm:$0xff] (!%p5014_p7)  ;;  %v4240_v52 = vld [vmem:[%s6987_s3 + $0x1b8] sm:$0xff] (!%p5014_p7) }
 0x217   : > { %5092 = vmatprep.subr.bf16.mxu0 (!%p5014_p7), %v5091_v9  ;;  %5124 = vmatprep.subr.bf16.mxu1 (!%p5014_p7), %v5123_v15  ;;  %v4195_v9 = vld [vmem:[%s6987_s3 + $0x50] sm:$0xff] (!%p5014_p7)  ;;  %v4213_v15 = vld [vmem:[%s6987_s3 + $0xe0] sm:$0xff] (!%p5014_p7) }
 0x218   : > { %v5115_v29 = vpack.c.bf16 (!%p5014_p7), %v4214_v17, %v4213_v15 }
 0x219   : > { %3782 = vmatmul.mubr.bf16.vlgmr.msra.gmra.mrb[0].mxu0 %v883_v54  ;;  %4110 = vmatmul.mubr.bf16.vlgmr.msra.gmra.mrb[0].mxu1 %v883_v54  ;;  %v5135_v54 = vpack.c.bf16 (!%p5014_p7), %v4240_v52, %v4239_v49  ;;  %v4232_v49 = vld [vmem:[%s6987_s3 + $0x178] sm:$0xff] (!%p5014_p7) }
 0x21a   : > { %5094 = vmatpush3.bf16.msra.mxu0 (!%p5014_p7), %v5093_v13  ;;  %5126 = vmatpush3.bf16.msra.mxu1 (!%p5014_p7), %v5125_v19  ;;  %v4228_v13 = vld [vmem:[%s6987_s3 + $0x158] sm:$0xff] (!%p5014_p7)  ;;  %v4159_v19 = vsub.s32 (!%p5014_p7), 2, %v6176_v44  ;;  %v4147_v44 = vld [vmem:[%s6986_s2] sm:$0xf] (!%p5014_p7) }
 0x21b   : > { %5096 = vmatprep.subr.bf16.mxu0 (!%p5014_p7), %v5095_v24  ;;  %5128 = vmatprep.subr.bf16.mxu1 (!%p5014_p7), %v5127_v31  ;;  %v5113_v24 = vpack.c.bf16 (!%p5014_p7), %v4196_v10, %v4195_v9  ;;  %v5145_v27 = vpack.c.bf16 (!%p5014_p7), %v4228_v13, %v4227_v11  ;;  %v4229_v31 = vld [vmem:[%s6987_s3 + $0x160] sm:$0xff] (!%p5014_p7)  ;;  %v4156_v35 = vrot.slane (!%p5014_p7), %v4147_v44, %v4155_v18 }
 0x21c   : > { %v4160_v36 = vrot.slane (!%p5014_p7), %v4147_v44, %v4159_v19  ;;  %v4164_v40 = vrot.slane (!%p5014_p7), %v4147_v44, %v4163_v23 }
 0x21e   : > { %5098 = vmatpush3.bf16.msra.mxu0 (!%p5014_p7), %v5097_v25  ;;  %5130 = vmatpush3.bf16.msra.mxu1 (!%p5014_p7), %v5129_v34  ;;  %v4197_v25 = vld [vmem:[%s6987_s3 + $0x60] sm:$0xff] (!%p5014_p7)  ;;  %v4216_v34 = vld [vmem:[%s6987_s3 + $0xf8] sm:$0xff] (!%p5014_p7) }
 0x21f   : > { %5100 = vmatprep.subr.bf16.mxu0 (!%p5014_p7), %v5099_v26  ;;  %5132 = vmatprep.subr.bf16.mxu1 (!%p5014_p7), %v5131_v43  ;;  %v4152_v26 = vrot.slane (!%p5014_p7), %v4147_v44, %v4151_v53  ;;  %v5117_v22 = vpack.c.bf16 (!%p5014_p7), %v4198_v30, %v4197_v25  ;;  %v5149_v43 = vpack.c.bf16 (!%p5014_p7), %v4230_v32, %v4229_v31 }
 0x220   : > { %v5119_v28 = vpack.c.bf16 (!%p5014_p7), %v4216_v34, %v4215_v33 }
 0x222   : > { %5102 = vmatpush3.bf16.msra.mxu0 (!%p5014_p7), %v5101_v42  ;;  %5134 = vmatpush3.bf16.msra.mxu1 (!%p5014_p7), %v5133_v47  ;;  %v4165_v42 = vcombine.low (!%p5014_p7), %v4152_v26, %v4156_v35  ;;  %v4166_v47 = vcombine.low (!%p5014_p7), %v4160_v36, %v4164_v40 }
 0x223   : > { %5104 = vmatprep.subr.bf16.mxu0 (!%p5014_p7), %v5103_v37  ;;  %5136 = vmatprep.subr.bf16.mxu1 (!%p5014_p7), %v5135_v54  ;;  %v5151_v37 = vpack.c.bf16 (!%p5014_p7), %v4248_v39, %v4247_v14 }
 0x224   : > { %v4173_v52 = vrot.slane (!%p5014_p7), %v4165_v42, %v6736_v58  ;;  %v4180_v54 = vrot.slane (!%p5014_p7), %v4166_v47, %v6736_v58 }
 0x2ec   : > { %v3783_v50 = vpop.f32.mrb[0].mxu0  ;;  %v4111_v41 = vpop.f32.mrb[0].mxu1 }
 0x2ed   : > { %v3785_v59 = vpop.f32.mrb[1].mxu0  ;;  %v4113_v51 = vpop.f32.mrb[1].mxu1 }
 0x2ee   : > { %v4122_v60 = vcombine.low %v3783_v50, %v3785_v59  ;;  %v4123_v61 = vcombine.low %v4111_v41, %v4113_v51  ;;  %v3787_v62 = vpop.f32.mrb[2].mxu0  ;;  %v4115_v63 = vpop.f32.mrb[2].mxu1  ;;  %v4210_v50 = vld [vmem:[%s6987_s3 + $0xc8] sm:$0xff] (!%p5014_p7)  ;;  %v5105_v41 = vpack.c.bf16 (!%p5014_p7), %v4192_v48, %v4191_v46  ;;  %v4241_v59 = vld [vmem:[%s6987_s3 + $0x1c0] sm:$0xff] (!%p5014_p7)  ;;  %v4200_v46 = vld [vmem:[%s6987_s3 + $0x78] sm:$0xff] (!%p5014_p7) }
 0x2ef   : > { %v3788_v0 = vpop.f32.mrb[3].mxu0  ;;  %v4116_v38 = vpop.f32.mrb[3].mxu1  ;;  %v4242_v51 = vld [vmem:[%s6987_s3 + $0x1c8] sm:$0xff] (!%p5014_p7)  ;;  %v4193_v62 = vld [vmem:[%s6987_s3 + $0x40] sm:$0xff] (!%p5014_p7)  ;;  %v4231_v48 = vld [vmem:[%s6987_s3 + $0x170] sm:$0xff] (!%p5014_p7) }
 0x2f0   : > { %v4130_v1 = vrot.slane %v4122_v60, %v6736_v58  ;;  %v4137_v2 = vrot.slane %v4123_v61, %v6736_v58  ;;  %4145 = sbr.rel (%p5014_p7) target bundleno = 995 (0x3e3), region = 48  ;;  %v5137_v60 = vpack.c.bf16 (!%p5014_p7), %v4224_v56, %v4223_v55  ;;  %v5107_v61 = vpack.c.bf16 (!%p5014_p7), %v4210_v50, %v4209_v57  ;;  %v4194_v63 = vld [vmem:[%s6987_s3 + $0x48] sm:$0xff] (!%p5014_p7)  ;;  %v4225_v0 = vld [vmem:[%s6987_s3 + $0x140] sm:$0xff] (!%p5014_p7)  ;;  %5106 = vmatpush3.bf16.msra.mxu0 (!%p5014_p7), %v5105_v41 }
 0x2f1   : > { %v5139_v38 = vpack.c.bf16 (!%p5014_p7), %v4242_v51, %v4241_v59  ;;  %v5109_v6 = vpack.c.bf16 (!%p5014_p7), %v4194_v63, %v4193_v62  ;;  %v5121_v55 = vpack.c.bf16 (!%p5014_p7), %v4200_v46, %v4199_v45  ;;  %v5153_v57 = vpack.c.bf16 (!%p5014_p7), %v4232_v49, %v4231_v48 }
 0x2f2   : > { %v4138_v4 = vcombine.low %v4130_v1, %v4137_v2  ;;  %v4226_v1 = vld [vmem:[%s6987_s3 + $0x148] sm:$0xff] (!%p5014_p7)  ;;  %v4211_v2 = vld [vmem:[%s6987_s3 + $0xd0] sm:$0xff] (!%p5014_p7)  ;;  %5138 = vmatpush3.bf16.msra.mxu1 (!%p5014_p7), %v5137_v60  ;;  %5108 = vmatprep.subr.bf16.mxu0 (!%p5014_p7), %v5107_v61  ;;  %v4181_v50 = vcombine.low (!%p5014_p7), %v4173_v52, %v4180_v54 }
 0x2f3   : > { %v5141_v7 = vpack.c.bf16 (!%p5014_p7), %v4226_v1, %v4225_v0  ;;  %5140 = vmatprep.subr.bf16.mxu1 (!%p5014_p7), %v5139_v38  ;;  %v5015_v38 = vld [vmem:[%s6988_s4] ss:$0 sm:$0xff] (!%p5014_p7) }
 0x2f4   : > { %v4140_v5 = vadd.f32 %v4138_v4, %v271_v3  ;;  %v4212_v3 = vld [vmem:[%s6987_s3 + $0xd8] sm:$0xff] (!%p5014_p7)  ;;  %v4243_v4 = vld [vmem:[%s6987_s3 + $0x1d0] sm:$0xff] (!%p5014_p7)  ;;  %5110 = vmatpush3.bf16.msra.mxu0 (!%p5014_p7), %v5109_v6 }
 0x2f5   : > { %v5111_v8 = vpack.c.bf16 (!%p5014_p7), %v4212_v3, %v4211_v2 }
 0x2f6   : > { %4141 = vst [vmem:[#allocation2] sm:$0xff] %v4140_v5  ;;  %v4244_v5 = vld [vmem:[%s6987_s3 + $0x1d8] sm:$0xff] (!%p5014_p7)  ;;  %5142 = vmatpush3.bf16.msra.mxu1 (!%p5014_p7), %v5141_v7 }
 0x2f7   : > { %v5143_v12 = vpack.c.bf16 %v4244_v5, %v4243_v4  ;;  %5112 = vmatprep.subr.bf16.mxu0 %v5111_v8 }
 0x2f8   : > { %5114 = vmatpush3.bf16.msra.mxu0 %v5113_v24 }
 0x2f9   : > { %5144 = vmatprep.subr.bf16.mxu1 %v5143_v12  ;;  %5116 = vmatprep.subr.bf16.mxu0 %v5115_v29 }
 0x2fa   : > { %5146 = vmatpush3.bf16.msra.mxu1 %v5145_v27 }
 0x2fb   : > { %5148 = vmatprep.subr.bf16.mxu1 %v5147_v16 }
 0x2fc   : > { %5118 = vmatpush3.bf16.msra.mxu0 %v5117_v22 }
 0x2fd   : > { %v4146_v56 = vld [vmem:[#allocation2] sm:$0xff]  ;;  %5120 = vmatprep.subr.bf16.mxu0 %v5119_v28 }
 0x2fe   : > { %5150 = vmatpush3.bf16.msra.mxu1 %v5149_v43  ;;  %v4183_v41 = vadd.f32 %v4181_v50, %v4146_v56 }
 0x2ff   : > { %5152 = vmatprep.subr.bf16.mxu1 %v5151_v37 }
 0x300   : > { %5122 = vmatpush3.bf16.msra.mxu0 %v5121_v55  ;;  %v4184_v59 = vmax.f32 %v4183_v41, 0.0 }
 0x302   : > { %5154 = vmatpush3.bf16.msra.mxu1 %v5153_v57  ;;  %v4264_v51 = vrot.slane %v4184_v59, %v6736_v58  ;;  %v4257_v60 = vcombine.high %v4184_v59, %v4184_v59 }
 0x304   : > { %v4272_v61 = vcombine.high %v4264_v51, %v4264_v51  ;;  %v4271_v62 = vrot.slane %v4257_v60, %v6736_v58 }
 0x306   : > { %4342 = vmatprep.mubr.f32.mxu0 %v4272_v61  ;;  %v4273_v63 = vcombine.high %v4271_v62, %v4271_v62 }
 0x307   : > { %4343 = vmatmul.mubr.f32.vlgmr.msra.gmra.mrb[0].mxu0 %v4264_v51 }
 0x308   : > { %4412 = vmatprep.mubr.f32.mxu1 %v4273_v63 }
 0x309   : > { %4413 = vmatmul.mubr.f32.vlgmr.msra.gmra.mrb[0].mxu1 %v4271_v62 }
 0x3da   : > { %v5053_v0 = vpop.f32.mrb[0].mxu0 }
 0x3db   : > { %v5054_v1 = vpop.f32.mrb[1].mxu0 }
 0x3dc   : > { %v5055_v2 = vadd.f32 %v5054_v1, %v5053_v0  ;;  %v5088_v3 = vpop.f32.mrb[0].mxu1 }
 0x3dd   : > { %v5089_v4 = vpop.f32.mrb[1].mxu1 }
 0x3de   : > { %v4345_v5 = vadd.f32 %v5055_v2, %v5015_v38  ;;  %v5090_v6 = vadd.f32 %v5089_v4, %v5088_v3 }
 0x3e0   : > { %v4415_v7 = vadd.f32 %v5090_v6, %v4345_v5 }
 0x3e2   : > { %4418 = vst [vmem:[#allocation3] sm:$0x3] %v4415_v7 }
 0x3e3 PF: > { %p6949_p8 = scmp.eq.s32.totalorder %s4493_s21, 7  ;;  %s6072_s14 = smov [#allocation3]  }
 0x3e4   : > { %s4428_s15 = sshll.u32 %s6072_s14, 4  ;;  %s4429_s15 = int_to_ptr.vmem [resolvable:$true] %s4428_s15 }
 0x3e5   : > { %s6015_s16 = scalar_lea.vmem %s4429_s15, 32  ;;  %p6022_p12 = scmp.lt.s32.totalorder %s4429_s15, %s4429_s15 }
 0x3e6   : > { %p6016_p9 = scmp.ne.s32.totalorder %s4429_s15, %s6015_s16  ;;  %p6023_p13 = scmp.lt.s32.totalorder %s6015_s16, %s6015_s16 }
 0x3e8   : > { %p6017_p10 = pnand %p6016_p9, %p6949_p8  ;;  %p6024_p0 = por %p6023_p13, %p6022_p12 }
 0x3ea   : > { %p6018_p11 = pneg %p6017_p10 }
 0x3ec   : > { %p6025_p1 = pnand %p6024_p0, %p6018_p11 }
 0x3ee   : > { %6028 = shalt.err (!%p6025_p1)
}
 0x3ef   : > { %s6029_s21 = scalar_lea.hbm %s6989_s5, 32 }
 0x3f0   : > { %p6030_p2 = scmp.ne.s32.totalorder %s6989_s5, %s6029_s21  ;;  %p6035_p5 = scmp.lt.u32.totalorder %s6029_s21, %s6989_s5 }
 0x3f2   : > { %p6031_p3 = pnand %p6030_p2, %p6949_p8 }
 0x3f4   : > { %p6032_p4 = pneg %p6031_p3 }
 0x3f6   : > { %p6037_p6 = pnand %p6035_p5, %p6032_p4 }
 0x3f8   : > { %6040 = shalt.err (!%p6037_p6)
}
 0x3f9   : > { %5212 = dma.vmem_to_hbm [thread:$0]  (%p6949_p8), %s4429_s15, 32, %s6989_s5, [#allocation4]  }
 0x3fa   : > { %6054 = dma.done.wait (%p6949_p8), [#allocation4], 32  }
 0x3fb   : > { %6056 = vsyncadd (%p6949_p8), [#allocation4], 4294967264 }
 0x3fc PF: > { %s16_s20 = sadd.s32 1, %s6067_s20   ;;  %s6991_s18 = smov %s6063_s19 }
 0x3fd   : > { %p13_p7 = scmp.ge.s32.totalorder %s16_s20, 10   ;;  %s6992_s19 = smov %s6994_s22 }
 0x3ff   :  { %15 = sbr.rel (!%p13_p7) target bundleno = 2 (0x2), region = 79 }
 0x406   :  { %4441 = vsyncpa [#allocation4], 1 }
 0x407   :  { %4443 = vsyncpa [#allocation4 + $0x1], 1 }

</bundles_post_ra>
